<compile_context>
chip_gen: v6e
topology: v6e:2x2x1
jax: 0.10.0
libtpu: 0.0.40
codegen_flags: <defaults>
</compile_context>

<pallas_src>
import functools
import math

import jax
import jax.numpy as jnp
from jax import lax
from jax.experimental import pallas as pl
from jax.experimental.pallas import tpu as pltpu


# dimension_numbers for an "NT" 2-D matmul (contract the last dim of both operands).
_NT = (((1,), (1,)), ((), ()))


def attention_block_kernel(
    x_cl_ref,   # (1, C, L)  input, NCL layout (residual / output layout)
    x_lc_ref,   # (1, L, C)  input, LC layout (compute layout)
    gmat_ref,   # (C, G)     one-hot group-membership matrix
    gn_w_ref,   # (1, C)     GroupNorm weight
    gn_b_ref,   # (1, C)     GroupNorm bias
    wq_ref,     # (C, C)     bf16, fused (qkv_q -> in_proj_q), scale folded, [C_in, C_out]
    wk_ref,     # (C, C)     bf16, fused (qkv_k -> in_proj_k)
    wv_ref,     # (C, C)     bf16, fused (qkv_v -> in_proj_v)
    bq_ref,     # (1, C)     f32, fused bias (scale folded)
    bk_ref,     # (1, C)
    bv_ref,     # (1, C)
    wop_ref,    # (C, C)     bf16, fused (out_proj -> proj_out), [C_out, C_headdims]
    bop_ref,    # (C, 1)     f32, fused bias
    o_ref,      # (1, C, L)
    *,
    num_heads: int,
    eps: float,
):
    x_cl = x_cl_ref[0]                      # (C, L) f32
    x = x_lc_ref[0]                         # (L, C) f32
    L, C = x.shape
    G = gmat_ref.shape[1]
    Dh = C // num_heads
    gmat = gmat_ref[...]                    # (C, G) f32

    # ---------------- GroupNorm (two-pass biased variance, f32) ----------------
    inv_n = 1.0 / float(L * (C // G))
    ch_sum = jnp.sum(x, axis=0, keepdims=True)                                       # (1, C)
    mean_g = jnp.dot(ch_sum, gmat, preferred_element_type=jnp.float32) * inv_n       # (1, G)
    mean_c = lax.dot_general(mean_g, gmat, _NT, preferred_element_type=jnp.float32)  # (1, C)
    xc = x - mean_c
    ch_sq = jnp.sum(xc * xc, axis=0, keepdims=True)                                  # (1, C)
    var_g = jnp.dot(ch_sq, gmat, preferred_element_type=jnp.float32) * inv_n         # (1, G)
    inv_g = lax.rsqrt(var_g + eps)
    inv_c = lax.dot_general(inv_g, gmat, _NT, preferred_element_type=jnp.float32)    # (1, C)
    h = (xc * inv_c * gn_w_ref[...] + gn_b_ref[...]).astype(jnp.bfloat16)            # (L, C)

    # -------- fused qkv-conv + MHA in_proj (bf16 MXU operands, f32 accumulate) --------
    q = (jnp.dot(h, wq_ref[...], preferred_element_type=jnp.float32)
         + bq_ref[...]).astype(jnp.bfloat16)                                         # (L, C)
    k = (jnp.dot(h, wk_ref[...], preferred_element_type=jnp.float32)
         + bk_ref[...]).astype(jnp.bfloat16)                                         # (L, C)
    v = (jnp.dot(h, wv_ref[...], preferred_element_type=jnp.float32)
         + bv_ref[...]).astype(jnp.bfloat16)                                         # (L, C)
    w_op = wop_ref[...]                                                              # (C, C) bf16

    # -------- per-head attention; (out_proj ∘ proj_out) fused, accumulated as (C, L) --------
    acc = jnp.zeros((C, L), jnp.float32)
    for hd in range(num_heads):
        s = hd * Dh
        qh = q[:, s:s + Dh]                 # (L, Dh)  (1/sqrt(Dh) already folded into wq)
        kh = k[:, s:s + Dh]                 # (L, Dh)
        vh = v[:, s:s + Dh]                 # (L, Dh)
        sc = lax.dot_general(qh, kh, _NT, preferred_element_type=jnp.float32)        # (L, L)
        sc = sc - jnp.max(sc, axis=-1, keepdims=True)
        e = jnp.exp(sc)
        p = (e * pl.reciprocal(jnp.sum(e, axis=-1, keepdims=True), approx=True)
             ).astype(jnp.bfloat16)                                                  # (L, L)
        oh = jnp.dot(p, vh, preferred_element_type=jnp.float32).astype(jnp.bfloat16)  # (L, Dh)
        # fused out_proj+proj_out for this head, produced directly in (C, L) layout
        acc = acc + lax.dot_general(w_op[:, s:s + Dh], oh, _NT,
                                    preferred_element_type=jnp.float32)              # (C, L)

    # ---------------- residual (lane-dense NCL store) ----------------
    o_ref[0] = (x_cl + acc + bop_ref[...]).astype(o_ref.dtype)


def attention_block(x_ncl, params, *, num_heads: int, num_groups: int, eps: float = 1e-5):
    """x_ncl: (B, C, L) float32 (PyTorch convention). Returns (B, C, L)."""
    B, C, L = x_ncl.shape
    G = num_groups
    Dh = C // num_heads
    scale = 1.0 / math.sqrt(Dh)

    x = x_ncl.astype(jnp.float32)                       # (B, C, L)
    x_lc = jnp.transpose(x, (0, 2, 1))                  # (B, L, C) compute-layout copy

    # one-hot group-membership matrix (C, G)
    gmat = (jnp.arange(C)[:, None] // (C // G) == jnp.arange(G)[None, :]).astype(jnp.float32)

    # ---- weight fusions (done once, outside the kernel, in f32) ----
    w_qkv = params["w_qkv"].astype(jnp.float32)         # (3C, C)
    b_qkv = params["b_qkv"].astype(jnp.float32)         # (3C,)
    wq_eff = (params["w_q"] @ w_qkv[:C]) * scale
    bq_eff = (params["w_q"] @ b_qkv[:C] + params["b_q"]) * scale
    wk_eff = params["w_k"] @ w_qkv[C:2 * C]
    bk_eff = params["w_k"] @ b_qkv[C:2 * C] + params["b_k"]
    wv_eff = params["w_v"] @ w_qkv[2 * C:]
    bv_eff = params["w_v"] @ b_qkv[2 * C:] + params["b_v"]
    w_op = params["w_p"] @ params["w_o"]                # (C, C)
    b_op = params["w_p"] @ params["b_o"] + params["b_p"]

    row = lambda a: a.reshape(1, -1).astype(jnp.float32)
    col = lambda a: a.reshape(-1, 1).astype(jnp.float32)
    bf = lambda a: a.astype(jnp.bfloat16)

    operands = (
        x,                       # (B, C, L)
        x_lc,                    # (B, L, C)
        gmat,                    # (C, G)
        row(params["gn_w"]),
        row(params["gn_b"]),
        bf(wq_eff.T),            # (C_in, C_out) bf16
        bf(wk_eff.T),
        bf(wv_eff.T),
        row(bq_eff),
        row(bk_eff),
        row(bv_eff),
        bf(w_op),                # (C_out, C) bf16
        col(b_op),               # (C, 1) f32
    )

    def const_spec(shape):
        n = len(shape)
        return pl.BlockSpec(shape, lambda b, n=n: (0,) * n)

    in_specs = [
        pl.BlockSpec((1, C, L), lambda b: (b, 0, 0)),
        pl.BlockSpec((1, L, C), lambda b: (b, 0, 0)),
    ] + [const_spec(op.shape) for op in operands[2:]]

    kernel = functools.partial(attention_block_kernel, num_heads=num_heads, eps=eps)

    out = pl.pallas_call(
        kernel,
        out_shape=jax.ShapeDtypeStruct((B, C, L), jnp.float32),
        grid=(B,),
        in_specs=in_specs,
        out_specs=pl.BlockSpec((1, C, L), lambda b: (b, 0, 0)),
        compiler_params=pltpu.CompilerParams(
            dimension_semantics=("parallel",),
            vmem_limit_bytes=48 * 1024 * 1024,
        ),
    )(*operands)
    return out


def attention_block_reference(x_ncl, params, *, num_heads: int, num_groups: int, eps: float = 1e-5):
    """Pure-JAX f32 reference mirroring the PyTorch module semantics (unfused)."""
    B, C, L = x_ncl.shape
    G = num_groups
    H = num_heads
    Dh = C // H
    x = jnp.transpose(x_ncl, (0, 2, 1)).astype(jnp.float32)   # (B, L, C)

    xg = x.reshape(B, L, G, C // G)
    mean = xg.mean(axis=(1, 3), keepdims=True)
    var = ((xg - mean) ** 2).mean(axis=(1, 3), keepdims=True)
    hn = ((xg - mean) / jnp.sqrt(var + eps)).reshape(B, L, C)
    h = hn * params["gn_w"][None, None, :] + params["gn_b"][None, None, :]

    qkv = jnp.einsum("blc,oc->blo", h, params["w_qkv"]) + params["b_qkv"]
    q0, k0, v0 = jnp.split(qkv, 3, axis=-1)
    q = q0 @ params["w_q"].T + params["b_q"]
    k = k0 @ params["w_k"].T + params["b_k"]
    v = v0 @ params["w_v"].T + params["b_v"]

    qh = q.reshape(B, L, H, Dh).transpose(0, 2, 1, 3)
    kh = k.reshape(B, L, H, Dh).transpose(0, 2, 1, 3)
    vh = v.reshape(B, L, H, Dh).transpose(0, 2, 1, 3)
    sc = jnp.einsum("bhld,bhmd->bhlm", qh, kh) / (Dh ** 0.5)
    p = jax.nn.softmax(sc, axis=-1)
    oh = jnp.einsum("bhlm,bhmd->bhld", p, vh)
    attn = oh.transpose(0, 2, 1, 3).reshape(B, L, C)
    attn = attn @ params["w_o"].T + params["b_o"]

    proj = attn @ params["w_p"].T + params["b_p"]
    out = x + proj
    return jnp.transpose(out, (0, 2, 1))


def init_params(key, channels: int):
    C = channels
    ks = jax.random.split(key, 12)
    s = 0.1
    p = {
        "gn_w": 1.0 + s * jax.random.normal(ks[0], (C,)),
        "gn_b": s * jax.random.normal(ks[1], (C,)),
        "w_qkv": s * jax.random.normal(ks[2], (3 * C, C)),   # Conv1d(C, 3C, k=1) weight (squeezed)
        "b_qkv": s * jax.random.normal(ks[3], (3 * C,)),
        "w_o": s * jax.random.normal(ks[6], (C, C)),          # MHA out_proj
        "b_o": s * jax.random.normal(ks[7], (C,)),
        "w_p": s * jax.random.normal(ks[8], (C, C)),          # proj_out Conv1d(C, C, k=1)
        "b_p": s * jax.random.normal(ks[9], (C,)),
    }
    in_proj_w = s * jax.random.normal(ks[4], (3 * C, C))      # MHA in_proj_weight
    in_proj_b = s * jax.random.normal(ks[5], (3 * C,))
    p["w_q"], p["w_k"], p["w_v"] = in_proj_w[:C], in_proj_w[C:2 * C], in_proj_w[2 * C:]
    p["b_q"], p["b_k"], p["b_v"] = in_proj_b[:C], in_proj_b[C:2 * C], in_proj_b[2 * C:]
    return jax.tree_util.tree_map(lambda a: a.astype(jnp.float32), p)


if __name__ == "__main__":
    B, C, L = 2, 32, 128          # channels divisible by num_heads=4 and num_groups=8
    num_heads, num_groups = 4, 8

    key = jax.random.PRNGKey(0)
    kx, kp = jax.random.split(key)
    x = jax.random.normal(kx, (B, C, L), dtype=jnp.float32)   # PyTorch (batch, channels, seq)
    params = init_params(kp, C)

    out = attention_block(x, params, num_heads=num_heads, num_groups=num_groups)
    out = jax.block_until_ready(out)

    ref = attention_block_reference(x, params, num_heads=num_heads, num_groups=num_groups)
    max_err = float(jnp.max(jnp.abs(out - ref)))
    assert out.shape == (B, C, L)
    # bf16 MXU operands with f32 accumulation: validated tolerance
    assert max_err < 1e-2, f"mismatch vs f32 reference: {max_err}"

    print("KERNEL_OK")
</pallas_src>

<mosaic_0001>
module attributes {stable_mosaic.version = 11 : i64} {
  func.func @attention_block_kernel(%arg0: i32, %arg1: memref<1x32x128xf32, #tpu.memory_space<vmem>>, %arg2: memref<1x128x32xf32, #tpu.memory_space<vmem>>, %arg3: memref<32x8xf32, #tpu.memory_space<vmem>>, %arg4: memref<1x32xf32, #tpu.memory_space<vmem>>, %arg5: memref<1x32xf32, #tpu.memory_space<vmem>>, %arg6: memref<32x32xbf16, #tpu.memory_space<vmem>>, %arg7: memref<32x32xbf16, #tpu.memory_space<vmem>>, %arg8: memref<32x32xbf16, #tpu.memory_space<vmem>>, %arg9: memref<1x32xf32, #tpu.memory_space<vmem>>, %arg10: memref<1x32xf32, #tpu.memory_space<vmem>>, %arg11: memref<1x32xf32, #tpu.memory_space<vmem>>, %arg12: memref<32x32xbf16, #tpu.memory_space<vmem>>, %arg13: memref<32x1xf32, #tpu.memory_space<vmem>>, %arg14: memref<1x32x128xf32, #tpu.memory_space<vmem>>) attributes {dimension_semantics = [#tpu.dimension_semantics<parallel>], iteration_bounds = array<i64: 2>, scalar_prefetch = 0 : i64, scratch_operands = 0 : i64, tpu.core_type = #tpu.core_type<tc>, window_params = [{transform_indices = @transform_0, window_bounds = array<i64: 1, 32, 128>}, {transform_indices = @transform_1, window_bounds = array<i64: 1, 128, 32>}, {pipeline_mode = #tpu.pipeline_mode<synchronous>, transform_indices = @transform_2, window_bounds = array<i64: 32, 8>}, {pipeline_mode = #tpu.pipeline_mode<synchronous>, transform_indices = @transform_3, window_bounds = array<i64: 1, 32>}, {pipeline_mode = #tpu.pipeline_mode<synchronous>, transform_indices = @transform_4, window_bounds = array<i64: 1, 32>}, {pipeline_mode = #tpu.pipeline_mode<synchronous>, transform_indices = @transform_5, window_bounds = array<i64: 32, 32>}, {pipeline_mode = #tpu.pipeline_mode<synchronous>, transform_indices = @transform_6, window_bounds = array<i64: 32, 32>}, {pipeline_mode = #tpu.pipeline_mode<synchronous>, transform_indices = @transform_7, window_bounds = array<i64: 32, 32>}, {pipeline_mode = #tpu.pipeline_mode<synchronous>, transform_indices = @transform_8, window_bounds = array<i64: 1, 32>}, {pipeline_mode = #tpu.pipeline_mode<synchronous>, transform_indices = @transform_9, window_bounds = array<i64: 1, 32>}, {pipeline_mode = #tpu.pipeline_mode<synchronous>, transform_indices = @transform_10, window_bounds = array<i64: 1, 32>}, {pipeline_mode = #tpu.pipeline_mode<synchronous>, transform_indices = @transform_11, window_bounds = array<i64: 32, 32>}, {pipeline_mode = #tpu.pipeline_mode<synchronous>, transform_indices = @transform_12, window_bounds = array<i64: 32, 1>}, {transform_indices = @transform_13, window_bounds = array<i64: 1, 32, 128>}]} {
    %c0 = arith.constant 0 : index
    %c0_0 = arith.constant 0 : index
    %c0_1 = arith.constant 0 : index
    %0 = vector.load %arg1[%c0, %c0_0, %c0_1] : memref<1x32x128xf32, #tpu.memory_space<vmem>>, vector<1x32x128xf32>
    %1 = vector.shape_cast %0 : vector<1x32x128xf32> to vector<32x128xf32>
    %c0_2 = arith.constant 0 : index
    %c0_3 = arith.constant 0 : index
    %c0_4 = arith.constant 0 : index
    %2 = vector.load %arg2[%c0_2, %c0_3, %c0_4] : memref<1x128x32xf32, #tpu.memory_space<vmem>>, vector<1x128x32xf32>
    %3 = vector.shape_cast %2 : vector<1x128x32xf32> to vector<128x32xf32>
    %c0_5 = arith.constant 0 : index
    %c0_6 = arith.constant 0 : index
    %4 = vector.load %arg3[%c0_5, %c0_6] : memref<32x8xf32, #tpu.memory_space<vmem>>, vector<32x8xf32>
    %cst = arith.constant dense<0.000000e+00> : vector<32xf32>
    %5 = vector.multi_reduction <add>, %3, %cst [0] : vector<128x32xf32> to vector<32xf32>
    %6 = vector.shape_cast %5 : vector<32xf32> to vector<1x32xf32>
    %cst_7 = arith.constant dense<0.000000e+00> : vector<1x8xf32>
    %7 = tpu.matmul %6, %4, %cst_7 {dimension_numbers = #tpu.dot_dimension_numbers<[1], [0], [0], [1], [0, 0, 1, 1], [], []>} : vector<1x32xf32>, vector<32x8xf32>, vector<1x8xf32> -> vector<1x8xf32>
    %cst_8 = arith.constant 0.001953125 : f32
    %8 = vector.broadcast %cst_8 : f32 to vector<1x8xf32>
    %9 = arith.mulf %7, %8 : vector<1x8xf32>
    %cst_9 = arith.constant dense<0.000000e+00> : vector<1x32xf32>
    %10 = tpu.matmul %9, %4, %cst_9 {dimension_numbers = #tpu.dot_dimension_numbers<[1], [1], [0], [0], [0, 0, 1, 0], [], []>} : vector<1x8xf32>, vector<32x8xf32>, vector<1x32xf32> -> vector<1x32xf32>
    %11 = vector.broadcast %10 : vector<1x32xf32> to vector<128x32xf32>
    %12 = arith.subf %3, %11 : vector<128x32xf32>
    %13 = arith.mulf %12, %12 : vector<128x32xf32>
    %cst_10 = arith.constant dense<0.000000e+00> : vector<32xf32>
    %14 = vector.multi_reduction <add>, %13, %cst_10 [0] : vector<128x32xf32> to vector<32xf32>
    %15 = vector.shape_cast %14 : vector<32xf32> to vector<1x32xf32>
    %cst_11 = arith.constant dense<0.000000e+00> : vector<1x8xf32>
    %16 = tpu.matmul %15, %4, %cst_11 {dimension_numbers = #tpu.dot_dimension_numbers<[1], [0], [0], [1], [0, 0, 1, 1], [], []>} : vector<1x32xf32>, vector<32x8xf32>, vector<1x8xf32> -> vector<1x8xf32>
    %cst_12 = arith.constant 0.001953125 : f32
    %17 = vector.broadcast %cst_12 : f32 to vector<1x8xf32>
    %18 = arith.mulf %16, %17 : vector<1x8xf32>
    %cst_13 = arith.constant 9.99999974E-6 : f32
    %19 = vector.broadcast %cst_13 : f32 to vector<1x8xf32>
    %20 = arith.addf %18, %19 : vector<1x8xf32>
    %21 = math.rsqrt %20 : vector<1x8xf32>
    %cst_14 = arith.constant dense<0.000000e+00> : vector<1x32xf32>
    %22 = tpu.matmul %21, %4, %cst_14 {dimension_numbers = #tpu.dot_dimension_numbers<[1], [1], [0], [0], [0, 0, 1, 0], [], []>} : vector<1x8xf32>, vector<32x8xf32>, vector<1x32xf32> -> vector<1x32xf32>
    %23 = vector.broadcast %22 : vector<1x32xf32> to vector<128x32xf32>
    %24 = arith.mulf %12, %23 : vector<128x32xf32>
    %c0_15 = arith.constant 0 : index
    %c0_16 = arith.constant 0 : index
    %25 = vector.load %arg4[%c0_15, %c0_16] : memref<1x32xf32, #tpu.memory_space<vmem>>, vector<1x32xf32>
    %26 = vector.broadcast %25 : vector<1x32xf32> to vector<128x32xf32>
    %27 = arith.mulf %24, %26 : vector<128x32xf32>
    %c0_17 = arith.constant 0 : index
    %c0_18 = arith.constant 0 : index
    %28 = vector.load %arg5[%c0_17, %c0_18] : memref<1x32xf32, #tpu.memory_space<vmem>>, vector<1x32xf32>
    %29 = vector.broadcast %28 : vector<1x32xf32> to vector<128x32xf32>
    %30 = arith.addf %27, %29 : vector<128x32xf32>
    %31 = arith.truncf %30 : vector<128x32xf32> to vector<128x32xbf16>
    %c0_19 = arith.constant 0 : index
    %c0_20 = arith.constant 0 : index
    %32 = vector.load %arg6[%c0_19, %c0_20] : memref<32x32xbf16, #tpu.memory_space<vmem>>, vector<32x32xbf16>
    %cst_21 = arith.constant dense<0.000000e+00> : vector<128x32xf32>
    %33 = tpu.matmul %31, %32, %cst_21 {dimension_numbers = #tpu.dot_dimension_numbers<[1], [0], [0], [1], [0, 0, 1, 1], [], []>} : vector<128x32xbf16>, vector<32x32xbf16>, vector<128x32xf32> -> vector<128x32xf32>
    %c0_22 = arith.constant 0 : index
    %c0_23 = arith.constant 0 : index
    %34 = vector.load %arg9[%c0_22, %c0_23] : memref<1x32xf32, #tpu.memory_space<vmem>>, vector<1x32xf32>
    %35 = vector.broadcast %34 : vector<1x32xf32> to vector<128x32xf32>
    %36 = arith.addf %33, %35 : vector<128x32xf32>
    %37 = arith.truncf %36 : vector<128x32xf32> to vector<128x32xbf16>
    %c0_24 = arith.constant 0 : index
    %c0_25 = arith.constant 0 : index
    %38 = vector.load %arg7[%c0_24, %c0_25] : memref<32x32xbf16, #tpu.memory_space<vmem>>, vector<32x32xbf16>
    %cst_26 = arith.constant dense<0.000000e+00> : vector<128x32xf32>
    %39 = tpu.matmul %31, %38, %cst_26 {dimension_numbers = #tpu.dot_dimension_numbers<[1], [0], [0], [1], [0, 0, 1, 1], [], []>} : vector<128x32xbf16>, vector<32x32xbf16>, vector<128x32xf32> -> vector<128x32xf32>
    %c0_27 = arith.constant 0 : index
    %c0_28 = arith.constant 0 : index
    %40 = vector.load %arg10[%c0_27, %c0_28] : memref<1x32xf32, #tpu.memory_space<vmem>>, vector<1x32xf32>
    %41 = vector.broadcast %40 : vector<1x32xf32> to vector<128x32xf32>
    %42 = arith.addf %39, %41 : vector<128x32xf32>
    %43 = arith.truncf %42 : vector<128x32xf32> to vector<128x32xbf16>
    %c0_29 = arith.constant 0 : index
    %c0_30 = arith.constant 0 : index
    %44 = vector.load %arg8[%c0_29, %c0_30] : memref<32x32xbf16, #tpu.memory_space<vmem>>, vector<32x32xbf16>
    %cst_31 = arith.constant dense<0.000000e+00> : vector<128x32xf32>
    %45 = tpu.matmul %31, %44, %cst_31 {dimension_numbers = #tpu.dot_dimension_numbers<[1], [0], [0], [1], [0, 0, 1, 1], [], []>} : vector<128x32xbf16>, vector<32x32xbf16>, vector<128x32xf32> -> vector<128x32xf32>
    %c0_32 = arith.constant 0 : index
    %c0_33 = arith.constant 0 : index
    %46 = vector.load %arg11[%c0_32, %c0_33] : memref<1x32xf32, #tpu.memory_space<vmem>>, vector<1x32xf32>
    %47 = vector.broadcast %46 : vector<1x32xf32> to vector<128x32xf32>
    %48 = arith.addf %45, %47 : vector<128x32xf32>
    %49 = arith.truncf %48 : vector<128x32xf32> to vector<128x32xbf16>
    %c0_34 = arith.constant 0 : index
    %c0_35 = arith.constant 0 : index
    %50 = vector.load %arg12[%c0_34, %c0_35] : memref<32x32xbf16, #tpu.memory_space<vmem>>, vector<32x32xbf16>
    %cst_36 = arith.constant 0.000000e+00 : f32
    %51 = vector.broadcast %cst_36 : f32 to vector<32x128xf32>
    %52 = vector.extract_strided_slice %37 {offsets = [0, 0], sizes = [128, 8], strides = [1, 1]} : vector<128x32xbf16> to vector<128x8xbf16>
    %53 = vector.extract_strided_slice %43 {offsets = [0, 0], sizes = [128, 8], strides = [1, 1]} : vector<128x32xbf16> to vector<128x8xbf16>
    %54 = vector.extract_strided_slice %49 {offsets = [0, 0], sizes = [128, 8], strides = [1, 1]} : vector<128x32xbf16> to vector<128x8xbf16>
    %cst_37 = arith.constant dense<0.000000e+00> : vector<128x128xf32>
    %55 = tpu.matmul %52, %53, %cst_37 {dimension_numbers = #tpu.dot_dimension_numbers<[1], [1], [0], [0], [0, 0, 1, 0], [], []>} : vector<128x8xbf16>, vector<128x8xbf16>, vector<128x128xf32> -> vector<128x128xf32>
    %cst_38 = arith.constant dense<0xFF800000> : vector<128xf32>
    %56 = vector.multi_reduction <maximumf>, %55, %cst_38 [1] : vector<128x128xf32> to vector<128xf32>
    %57 = vector.shape_cast %56 : vector<128xf32> to vector<128x1xf32>
    %58 = vector.broadcast %57 : vector<128x1xf32> to vector<128x128xf32>
    %59 = arith.subf %55, %58 : vector<128x128xf32>
    %60 = math.exp %59 : vector<128x128xf32>
    %cst_39 = arith.constant dense<0.000000e+00> : vector<128xf32>
    %61 = vector.multi_reduction <add>, %60, %cst_39 [1] : vector<128x128xf32> to vector<128xf32>
    %62 = vector.shape_cast %61 : vector<128xf32> to vector<128x1xf32>
    %63 = tpu.reciprocal %62 {approx = true} : vector<128x1xf32> -> vector<128x1xf32>
    %64 = vector.broadcast %63 : vector<128x1xf32> to vector<128x128xf32>
    %65 = arith.mulf %60, %64 : vector<128x128xf32>
    %66 = arith.truncf %65 : vector<128x128xf32> to vector<128x128xbf16>
    %cst_40 = arith.constant dense<0.000000e+00> : vector<128x8xf32>
    %67 = tpu.matmul %66, %54, %cst_40 {dimension_numbers = #tpu.dot_dimension_numbers<[1], [0], [0], [1], [0, 0, 1, 1], [], []>} : vector<128x128xbf16>, vector<128x8xbf16>, vector<128x8xf32> -> vector<128x8xf32>
    %68 = arith.truncf %67 : vector<128x8xf32> to vector<128x8xbf16>
    %69 = vector.extract_strided_slice %50 {offsets = [0, 0], sizes = [32, 8], strides = [1, 1]} : vector<32x32xbf16> to vector<32x8xbf16>
    %cst_41 = arith.constant dense<0.000000e+00> : vector<32x128xf32>
    %70 = tpu.matmul %69, %68, %cst_41 {dimension_numbers = #tpu.dot_dimension_numbers<[1], [1], [0], [0], [0, 0, 1, 0], [], []>} : vector<32x8xbf16>, vector<128x8xbf16>, vector<32x128xf32> -> vector<32x128xf32>
    %71 = arith.addf %51, %70 : vector<32x128xf32>
    %72 = vector.extract_strided_slice %37 {offsets = [0, 8], sizes = [128, 8], strides = [1, 1]} : vector<128x32xbf16> to vector<128x8xbf16>
    %73 = vector.extract_strided_slice %43 {offsets = [0, 8], sizes = [128, 8], strides = [1, 1]} : vector<128x32xbf16> to vector<128x8xbf16>
    %74 = vector.extract_strided_slice %49 {offsets = [0, 8], sizes = [128, 8], strides = [1, 1]} : vector<128x32xbf16> to vector<128x8xbf16>
    %cst_42 = arith.constant dense<0.000000e+00> : vector<128x128xf32>
    %75 = tpu.matmul %72, %73, %cst_42 {dimension_numbers = #tpu.dot_dimension_numbers<[1], [1], [0], [0], [0, 0, 1, 0], [], []>} : vector<128x8xbf16>, vector<128x8xbf16>, vector<128x128xf32> -> vector<128x128xf32>
    %cst_43 = arith.constant dense<0xFF800000> : vector<128xf32>
    %76 = vector.multi_reduction <maximumf>, %75, %cst_43 [1] : vector<128x128xf32> to vector<128xf32>
    %77 = vector.shape_cast %76 : vector<128xf32> to vector<128x1xf32>
    %78 = vector.broadcast %77 : vector<128x1xf32> to vector<128x128xf32>
    %79 = arith.subf %75, %78 : vector<128x128xf32>
    %80 = math.exp %79 : vector<128x128xf32>
    %cst_44 = arith.constant dense<0.000000e+00> : vector<128xf32>
    %81 = vector.multi_reduction <add>, %80, %cst_44 [1] : vector<128x128xf32> to vector<128xf32>
    %82 = vector.shape_cast %81 : vector<128xf32> to vector<128x1xf32>
    %83 = tpu.reciprocal %82 {approx = true} : vector<128x1xf32> -> vector<128x1xf32>
    %84 = vector.broadcast %83 : vector<128x1xf32> to vector<128x128xf32>
    %85 = arith.mulf %80, %84 : vector<128x128xf32>
    %86 = arith.truncf %85 : vector<128x128xf32> to vector<128x128xbf16>
    %cst_45 = arith.constant dense<0.000000e+00> : vector<128x8xf32>
    %87 = tpu.matmul %86, %74, %cst_45 {dimension_numbers = #tpu.dot_dimension_numbers<[1], [0], [0], [1], [0, 0, 1, 1], [], []>} : vector<128x128xbf16>, vector<128x8xbf16>, vector<128x8xf32> -> vector<128x8xf32>
    %88 = arith.truncf %87 : vector<128x8xf32> to vector<128x8xbf16>
    %89 = vector.extract_strided_slice %50 {offsets = [0, 8], sizes = [32, 8], strides = [1, 1]} : vector<32x32xbf16> to vector<32x8xbf16>
    %cst_46 = arith.constant dense<0.000000e+00> : vector<32x128xf32>
    %90 = tpu.matmul %89, %88, %cst_46 {dimension_numbers = #tpu.dot_dimension_numbers<[1], [1], [0], [0], [0, 0, 1, 0], [], []>} : vector<32x8xbf16>, vector<128x8xbf16>, vector<32x128xf32> -> vector<32x128xf32>
    %91 = arith.addf %71, %90 : vector<32x128xf32>
    %92 = vector.extract_strided_slice %37 {offsets = [0, 16], sizes = [128, 8], strides = [1, 1]} : vector<128x32xbf16> to vector<128x8xbf16>
    %93 = vector.extract_strided_slice %43 {offsets = [0, 16], sizes = [128, 8], strides = [1, 1]} : vector<128x32xbf16> to vector<128x8xbf16>
    %94 = vector.extract_strided_slice %49 {offsets = [0, 16], sizes = [128, 8], strides = [1, 1]} : vector<128x32xbf16> to vector<128x8xbf16>
    %cst_47 = arith.constant dense<0.000000e+00> : vector<128x128xf32>
    %95 = tpu.matmul %92, %93, %cst_47 {dimension_numbers = #tpu.dot_dimension_numbers<[1], [1], [0], [0], [0, 0, 1, 0], [], []>} : vector<128x8xbf16>, vector<128x8xbf16>, vector<128x128xf32> -> vector<128x128xf32>
    %cst_48 = arith.constant dense<0xFF800000> : vector<128xf32>
    %96 = vector.multi_reduction <maximumf>, %95, %cst_48 [1] : vector<128x128xf32> to vector<128xf32>
    %97 = vector.shape_cast %96 : vector<128xf32> to vector<128x1xf32>
    %98 = vector.broadcast %97 : vector<128x1xf32> to vector<128x128xf32>
    %99 = arith.subf %95, %98 : vector<128x128xf32>
    %100 = math.exp %99 : vector<128x128xf32>
    %cst_49 = arith.constant dense<0.000000e+00> : vector<128xf32>
    %101 = vector.multi_reduction <add>, %100, %cst_49 [1] : vector<128x128xf32> to vector<128xf32>
    %102 = vector.shape_cast %101 : vector<128xf32> to vector<128x1xf32>
    %103 = tpu.reciprocal %102 {approx = true} : vector<128x1xf32> -> vector<128x1xf32>
    %104 = vector.broadcast %103 : vector<128x1xf32> to vector<128x128xf32>
    %105 = arith.mulf %100, %104 : vector<128x128xf32>
    %106 = arith.truncf %105 : vector<128x128xf32> to vector<128x128xbf16>
    %cst_50 = arith.constant dense<0.000000e+00> : vector<128x8xf32>
    %107 = tpu.matmul %106, %94, %cst_50 {dimension_numbers = #tpu.dot_dimension_numbers<[1], [0], [0], [1], [0, 0, 1, 1], [], []>} : vector<128x128xbf16>, vector<128x8xbf16>, vector<128x8xf32> -> vector<128x8xf32>
    %108 = arith.truncf %107 : vector<128x8xf32> to vector<128x8xbf16>
    %109 = vector.extract_strided_slice %50 {offsets = [0, 16], sizes = [32, 8], strides = [1, 1]} : vector<32x32xbf16> to vector<32x8xbf16>
    %cst_51 = arith.constant dense<0.000000e+00> : vector<32x128xf32>
    %110 = tpu.matmul %109, %108, %cst_51 {dimension_numbers = #tpu.dot_dimension_numbers<[1], [1], [0], [0], [0, 0, 1, 0], [], []>} : vector<32x8xbf16>, vector<128x8xbf16>, vector<32x128xf32> -> vector<32x128xf32>
    %111 = arith.addf %91, %110 : vector<32x128xf32>
    %112 = vector.extract_strided_slice %37 {offsets = [0, 24], sizes = [128, 8], strides = [1, 1]} : vector<128x32xbf16> to vector<128x8xbf16>
    %113 = vector.extract_strided_slice %43 {offsets = [0, 24], sizes = [128, 8], strides = [1, 1]} : vector<128x32xbf16> to vector<128x8xbf16>
    %114 = vector.extract_strided_slice %49 {offsets = [0, 24], sizes = [128, 8], strides = [1, 1]} : vector<128x32xbf16> to vector<128x8xbf16>
    %cst_52 = arith.constant dense<0.000000e+00> : vector<128x128xf32>
    %115 = tpu.matmul %112, %113, %cst_52 {dimension_numbers = #tpu.dot_dimension_numbers<[1], [1], [0], [0], [0, 0, 1, 0], [], []>} : vector<128x8xbf16>, vector<128x8xbf16>, vector<128x128xf32> -> vector<128x128xf32>
    %cst_53 = arith.constant dense<0xFF800000> : vector<128xf32>
    %116 = vector.multi_reduction <maximumf>, %115, %cst_53 [1] : vector<128x128xf32> to vector<128xf32>
    %117 = vector.shape_cast %116 : vector<128xf32> to vector<128x1xf32>
    %118 = vector.broadcast %117 : vector<128x1xf32> to vector<128x128xf32>
    %119 = arith.subf %115, %118 : vector<128x128xf32>
    %120 = math.exp %119 : vector<128x128xf32>
    %cst_54 = arith.constant dense<0.000000e+00> : vector<128xf32>
    %121 = vector.multi_reduction <add>, %120, %cst_54 [1] : vector<128x128xf32> to vector<128xf32>
    %122 = vector.shape_cast %121 : vector<128xf32> to vector<128x1xf32>
    %123 = tpu.reciprocal %122 {approx = true} : vector<128x1xf32> -> vector<128x1xf32>
    %124 = vector.broadcast %123 : vector<128x1xf32> to vector<128x128xf32>
    %125 = arith.mulf %120, %124 : vector<128x128xf32>
    %126 = arith.truncf %125 : vector<128x128xf32> to vector<128x128xbf16>
    %cst_55 = arith.constant dense<0.000000e+00> : vector<128x8xf32>
    %127 = tpu.matmul %126, %114, %cst_55 {dimension_numbers = #tpu.dot_dimension_numbers<[1], [0], [0], [1], [0, 0, 1, 1], [], []>} : vector<128x128xbf16>, vector<128x8xbf16>, vector<128x8xf32> -> vector<128x8xf32>
    %128 = arith.truncf %127 : vector<128x8xf32> to vector<128x8xbf16>
    %129 = vector.extract_strided_slice %50 {offsets = [0, 24], sizes = [32, 8], strides = [1, 1]} : vector<32x32xbf16> to vector<32x8xbf16>
    %cst_56 = arith.constant dense<0.000000e+00> : vector<32x128xf32>
    %130 = tpu.matmul %129, %128, %cst_56 {dimension_numbers = #tpu.dot_dimension_numbers<[1], [1], [0], [0], [0, 0, 1, 0], [], []>} : vector<32x8xbf16>, vector<128x8xbf16>, vector<32x128xf32> -> vector<32x128xf32>
    %131 = arith.addf %111, %130 : vector<32x128xf32>
    %132 = arith.addf %1, %131 : vector<32x128xf32>
    %c0_57 = arith.constant 0 : index
    %c0_58 = arith.constant 0 : index
    %133 = vector.load %arg13[%c0_57, %c0_58] : memref<32x1xf32, #tpu.memory_space<vmem>>, vector<32x1xf32>
    %134 = vector.broadcast %133 : vector<32x1xf32> to vector<32x128xf32>
    %135 = arith.addf %132, %134 : vector<32x128xf32>
    %c0_59 = arith.constant 0 : index
    %c0_60 = arith.constant 0 : index
    %c0_61 = arith.constant 0 : index
    %136 = vector.load %arg14[%c0_59, %c0_60, %c0_61] : memref<1x32x128xf32, #tpu.memory_space<vmem>>, vector<1x32x128xf32>
    %137 = vector.shape_cast %136 : vector<1x32x128xf32> to vector<32x128xf32>
    %138 = vector.shape_cast %135 : vector<32x128xf32> to vector<1x32x128xf32>
    tpu.vector_store %arg14[%c0_59, %c0_60, %c0_61], %138 {strides = array<i32>} : memref<1x32x128xf32, #tpu.memory_space<vmem>>, vector<1x32x128xf32>,
    return
  }
  func.func @transform_0(%arg0: i32) -> (i32, i32, i32) {
    %c0_i32 = arith.constant 0 : i32
    %c0_i32_0 = arith.constant 0 : i32
    %c0_i32_1 = arith.constant 0 : i32
    return %arg0, %c0_i32, %c0_i32_0 : i32, i32, i32
  }
  func.func @transform_1(%arg0: i32) -> (i32, i32, i32) {
    %c0_i32 = arith.constant 0 : i32
    %c0_i32_0 = arith.constant 0 : i32
    %c0_i32_1 = arith.constant 0 : i32
    return %arg0, %c0_i32, %c0_i32_0 : i32, i32, i32
  }
  func.func @transform_2(%arg0: i32) -> (i32, i32) {
    %c0_i32 = arith.constant 0 : i32
    %c0_i32_0 = arith.constant 0 : i32
    %c0_i32_1 = arith.constant 0 : i32
    return %c0_i32, %c0_i32_0 : i32, i32
  }
  func.func @transform_3(%arg0: i32) -> (i32, i32) {
    %c0_i32 = arith.constant 0 : i32
    %c0_i32_0 = arith.constant 0 : i32
    %c0_i32_1 = arith.constant 0 : i32
    return %c0_i32, %c0_i32_0 : i32, i32
  }
  func.func @transform_4(%arg0: i32) -> (i32, i32) {
    %c0_i32 = arith.constant 0 : i32
    %c0_i32_0 = arith.constant 0 : i32
    %c0_i32_1 = arith.constant 0 : i32
    return %c0_i32, %c0_i32_0 : i32, i32
  }
  func.func @transform_5(%arg0: i32) -> (i32, i32) {
    %c0_i32 = arith.constant 0 : i32
    %c0_i32_0 = arith.constant 0 : i32
    %c0_i32_1 = arith.constant 0 : i32
    return %c0_i32, %c0_i32_0 : i32, i32
  }
  func.func @transform_6(%arg0: i32) -> (i32, i32) {
    %c0_i32 = arith.constant 0 : i32
    %c0_i32_0 = arith.constant 0 : i32
    %c0_i32_1 = arith.constant 0 : i32
    return %c0_i32, %c0_i32_0 : i32, i32
  }
  func.func @transform_7(%arg0: i32) -> (i32, i32) {
    %c0_i32 = arith.constant 0 : i32
    %c0_i32_0 = arith.constant 0 : i32
    %c0_i32_1 = arith.constant 0 : i32
    return %c0_i32, %c0_i32_0 : i32, i32
  }
  func.func @transform_8(%arg0: i32) -> (i32, i32) {
    %c0_i32 = arith.constant 0 : i32
    %c0_i32_0 = arith.constant 0 : i32
    %c0_i32_1 = arith.constant 0 : i32
    return %c0_i32, %c0_i32_0 : i32, i32
  }
  func.func @transform_9(%arg0: i32) -> (i32, i32) {
    %c0_i32 = arith.constant 0 : i32
    %c0_i32_0 = arith.constant 0 : i32
    %c0_i32_1 = arith.constant 0 : i32
    return %c0_i32, %c0_i32_0 : i32, i32
  }
  func.func @transform_10(%arg0: i32) -> (i32, i32) {
    %c0_i32 = arith.constant 0 : i32
    %c0_i32_0 = arith.constant 0 : i32
    %c0_i32_1 = arith.constant 0 : i32
    return %c0_i32, %c0_i32_0 : i32, i32
  }
  func.func @transform_11(%arg0: i32) -> (i32, i32) {
    %c0_i32 = arith.constant 0 : i32
    %c0_i32_0 = arith.constant 0 : i32
    %c0_i32_1 = arith.constant 0 : i32
    return %c0_i32, %c0_i32_0 : i32, i32
  }
  func.func @transform_12(%arg0: i32) -> (i32, i32) {
    %c0_i32 = arith.constant 0 : i32
    %c0_i32_0 = arith.constant 0 : i32
    %c0_i32_1 = arith.constant 0 : i32
    return %c0_i32, %c0_i32_0 : i32, i32
  }
  func.func @transform_13(%arg0: i32) -> (i32, i32, i32) {
    %c0_i32 = arith.constant 0 : i32
    %c0_i32_0 = arith.constant 0 : i32
    %c0_i32_1 = arith.constant 0 : i32
    return %arg0, %c0_i32, %c0_i32_0 : i32, i32, i32
  }
}

</mosaic_0001>

<bundles_post_ra>
// kernel: tpu_custom_call.1
= control target key start
LH: loop header
LB: loop body
LE: loop exit
PB: predicated region body
PF: predicated region fallthrough
CT: control target
= control target key end

     0   :  { %s6582_s0 = inlined_call_operand.vmem [shape: f32[2,32,128], index: 0, kind: input, shape index: {}]   ;;  %s6583_s1 = inlined_call_operand.vmem [shape: f32[2,128,32], index: 1, kind: input, shape index: {}]   ;;  %s6584_s2 = inlined_call_operand.vmem [shape: f32[32,8], index: 2, kind: input, shape index: {}]   ;;  %s6585_s3 = inlined_call_operand.vmem [shape: f32[1,32], index: 3, kind: input, shape index: {}]   ;;  %s6586_s4 = inlined_call_operand.vmem [shape: f32[1,32], index: 4, kind: input, shape index: {}]   ;;  %s6587_s5 = inlined_call_operand.vmem [shape: bf16[32,32], index: 5, kind: input, shape index: {}]   ;;  %s6588_s6 = inlined_call_operand.vmem [shape: bf16[32,32], index: 6, kind: input, shape index: {}]   ;;  %s6589_s7 = inlined_call_operand.vmem [shape: bf16[32,32], index: 7, kind: input, shape index: {}]   ;;  %s6590_s8 = inlined_call_operand.vmem [shape: f32[1,32], index: 8, kind: input, shape index: {}]   ;;  %s6591_s9 = inlined_call_operand.vmem [shape: f32[1,32], index: 9, kind: input, shape index: {}]   ;;  %s6592_s10 = inlined_call_operand.vmem [shape: f32[1,32], index: 10, kind: input, shape index: {}]   ;;  %s6593_s11 = inlined_call_operand.vmem [shape: bf16[32,32], index: 11, kind: input, shape index: {}]   ;;  %s6594_s12 = inlined_call_operand.vmem [shape: f32[32,1], index: 12, kind: input, shape index: {}]   ;;  %s6595_s13 = inlined_call_operand.hbm [shape: f32[2,32,128], index: 13, kind: output, shape index: {}]  }
   0x1   :  { %6596 = sst [smem:[#allocation5_spill]] %s6582_s0 }
   0x2   :  { %6597 = sst [smem:[#allocation6_spill]] %s6583_s1 }
   0x3   :  { %6598 = sst [smem:[#allocation7_spill]] %s6584_s2 }
   0x4   :  { %18 = vsyncpa [#allocation3], 0 }
   0x5   :  { %20 = vsyncpa [#allocation3 + $0x1], 0  ;;  %s4946_s25 = smov 0   ;;  %s4948_s26 = smov 0  }
   0x6   :  { %s4950_s27 = smov 0   ;;  %s4952_s28 = smov 0  }
   0x7 LB: > { %s4967_s29 = sadd.s32 4294967295, %s4865_s28   ;;  %s3660_s30 = sadd.s32 4294967294, %s4865_s28   ;;  %s4865_s28 = sphi %s4952_s28, %s6607_s28   ;;  %s4861_s27 = sphi %s4950_s27, %s6606_s27   ;;  %s4857_s26 = sphi %s4948_s26, %s6605_s26   ;;  %s4853_s25 = sphi %s4946_s25, %s6604_s25  }
   0x8   : > { %s4971_s14 = sadd.s32 1, %s4865_s28   ;;  %s316_s15 = sadd.s32 1, %s4861_s27 }
   0x9   : > { %s313_s16 = ssub.s32 %s4865_s28, %s4971_s14  ;;  %p326_p0 = scmp.ne.s32.totalorder %s4861_s27, %s4857_s26 }
   0xa   : > { %p314_p1 = scmp.eq.s32.totalorder %s313_s16, 0  ;;  %p327_p2 = scmp.eq.s32.totalorder %s4967_s29, 1 }
   0xb   : > { %p332_p3 = scmp.ne.s32.totalorder %s4857_s26, %s4853_s25  ;;  %p333_p4 = scmp.eq.s32.totalorder %s3660_s30, 1 }
   0xc   : > { %s4982_s17 = scalar_select %p314_p1, %s4861_s27, %s316_s15  }
   0xd   : > { %p4984_p5 = por %p327_p2, %p326_p0  ;;  %p4988_p6 = por %p333_p4, %p332_p3 }
   0xe   : > { %p3663_p7 = scmp.ge.s32.totalorder %s4865_s28, 1  ;;  %p400_p8 = scmp.lt.s32.totalorder %s4865_s28, 3 }
  0x10   : > { %p401_p9 = pnand %p3663_p7, %p400_p8 }
  0x11   : > { %s6601_s2 = sld [smem:[#allocation7_spill]] (!%p401_p9)  ;;  %p449_p10 = scmp.lt.s32.totalorder (!%p401_p9), %s4967_s29, 1 }
  0x12   : > { %404 = sbr.rel (%p401_p9) target bundleno = 4139 (0x102b), region = 72  ;;  %s6602_s1 = sld [smem:[#allocation6_spill]] (!%p401_p9) }
  0x13   : > { %s4870_s20 = smov (!%p401_p9), 112   ;;  %s4871_s22 = smov (!%p401_p9), 104  }
  0x14   : > { %s6603_s0 = sld [smem:[#allocation5_spill]] (!%p401_p9)  ;;  %s3765_s30 = sshll.u32 (!%p401_p9), %s4967_s29, 9 }
  0x17   : > { %v4997_v0 = vld [vmem:[%s6601_s2 + $0x18] sm:$0xff]  ;;  %v4867_v1 = vmov 0.0   ;;  %v5004_v2 = vld [vmem:[%s6601_s2 + $0x10] sm:$0xff]  ;;  %vm4868_vm0 = vmmov 0   ;;  %v5012_v3 = vld [vmem:[%s6601_s2 + $0x8] sm:$0xff]  ;;  %s5015_s15 = scalar_select %p449_p10, %s4967_s29, 1  ;;  %v682_v61 = vlaneseq }
  0x18   : > { %3984 = vmatprep.subr.mxu1 %v4867_v1  ;;  %3992 = vmatprep.mubr.msk.f32.mxu1 %vm4868_vm0, %v4867_v1  ;;  %v5022_v4 = vld [vmem:[%s6601_s2] sm:$0xff]  ;;  %vm484_vm1 = vcmask 261120   ;;  %vm596_vm2 = vcmask 64512  }
  0x19   : > { %3985 = vmatpush3.msra.mxu1 %v4997_v0  ;;  %4006 = vmatprep.subr.mxu0 %v4867_v1  ;;  %s3764_s21 = sshll.u32 %s5015_s15, 7  ;;  %v5141_v62 = vshrl.u32 %v682_v61, 7  ;;  %s3763_s16 = sshll.u32 %s5015_s15, 5 }
  0x1a   : > { %3986 = vmatprep.subr.mxu1 %v4867_v1  ;;  %4007 = vmatpush3.msra.mxu0 %v4997_v0  ;;  %s5032_s24 = scalar_lea.vmem %s6602_s1, %s3764_s21  ;;  %s4869_s21 = smov 120  }
  0x1b   : > { %3987 = vmatpush3.msra.mxu1 %v5004_v2  ;;  %4008 = vmatprep.subr.mxu0 %v4867_v1  ;;  %v5037_v5 = vld [vmem:[%s5032_s24] sm:$0xff]  ;;  %v5040_v6 = vld [vmem:[%s5032_s24 + $0x8] sm:$0xff]  ;;  %v5043_v7 = vld [vmem:[%s5032_s24 + $0x10] sm:$0xff]  ;;  %v684_v63 = vsub.s32 0, %v5141_v62 }
  0x1c   : > { %3988 = vmatprep.subr.mxu1 %v4867_v1  ;;  %4009 = vmatpush3.msra.mxu0 %v5004_v2  ;;  %v5048_v8 = vld [vmem:[%s5032_s24 + $0x18] sm:$0xff]  ;;  %v485_v9 = vsel %vm484_vm1, %v5037_v5, 0.0  ;;  %v486_v10 = vsel %vm484_vm1, %v5040_v6, 0.0  ;;  %v488_v11 = vsel %vm484_vm1, %v5043_v7, 0.0  ;;  %v5059_v12 = vld [vmem:[%s5032_s24 + $0x20] sm:$0xff]  ;;  %v5067_v15 = vld [vmem:[%s5032_s24 + $0x28] sm:$0xff] }
  0x1d   : > { %3989 = vmatpush3.msra.mxu1 %v5012_v3  ;;  %4010 = vmatprep.subr.mxu0 %v4867_v1  ;;  %v487_v13 = vadd.f32 %v486_v10, %v485_v9  ;;  %v490_v14 = vsel %vm484_vm1, %v5048_v8, 0.0  ;;  %v492_v17 = vsel %vm484_vm1, %v5059_v12, 0.0  ;;  %v5075_v18 = vld [vmem:[%s5032_s24 + $0x30] sm:$0xff]  ;;  %v494_v20 = vsel %vm484_vm1, %v5067_v15, 0.0  ;;  %v5080_v21 = vld [vmem:[%s5032_s24 + $0x38] sm:$0xff]  ;;  %v5085_v24 = vld [vmem:[%s5032_s24 + $0x40] sm:$0xff] }
  0x1e   : > { %3990 = vmatprep.subr.mxu1 %v4867_v1  ;;  %4011 = vmatpush3.msra.mxu0 %v5012_v3  ;;  %v496_v23 = vsel %vm484_vm1, %v5075_v18, 0.0  ;;  %v498_v26 = vsel %vm484_vm1, %v5080_v21, 0.0  ;;  %v5090_v27 = vld [vmem:[%s5032_s24 + $0x48] sm:$0xff]  ;;  %v500_v29 = vsel %vm484_vm1, %v5085_v24, 0.0  ;;  %v5095_v30 = vld [vmem:[%s5032_s24 + $0x50] sm:$0xff]  ;;  %v5100_v33 = vld [vmem:[%s5032_s24 + $0x58] sm:$0xff] }
  0x1f   : > { %3991 = vmatpush3.msra.mxu1 %v5022_v4  ;;  %4012 = vmatprep.subr.mxu0 %v4867_v1  ;;  %v489_v16 = vadd.f32 %v488_v11, %v487_v13  ;;  %v502_v32 = vsel %vm484_vm1, %v5090_v27, 0.0  ;;  %v504_v35 = vsel %vm484_vm1, %v5095_v30, 0.0  ;;  %v5105_v36 = vld [vmem:[%s5032_s24 + $0x60] sm:$0xff]  ;;  %v506_v38 = vsel %vm484_vm1, %v5100_v33, 0.0  ;;  %v5110_v39 = vld [vmem:[%s5032_s24 + $0x68] sm:$0xff]  ;;  %v5115_v42 = vld [vmem:[%s5032_s24 + $0x70] sm:$0xff] }
  0x20   : > { %3995 = vmatprep.subr.mxu1 %v4867_v1  ;;  %4013 = vmatpush3.msra.mxu0 %v5022_v4  ;;  %v508_v41 = vsel %vm484_vm1, %v5105_v36, 0.0  ;;  %v510_v44 = vsel %vm484_vm1, %v5110_v39, 0.0  ;;  %v5120_v45 = vld [vmem:[%s5032_s24 + $0x78] sm:$0xff]  ;;  %v512_v47 = vsel %vm484_vm1, %v5115_v42, 0.0 }
  0x21   : > { %4014 = vmatprep.mubr.msk.f32.mxu0 %vm4868_vm0, %v4867_v1  ;;  %4017 = vmatprep.subr.mxu0 %v4867_v1  ;;  %v491_v19 = vadd.f32 %v490_v14, %v489_v16  ;;  %v514_v49 = vsel %vm484_vm1, %v5120_v45, 0.0 }
  0x23   : > { %v493_v22 = vadd.f32 %v492_v17, %v491_v19 }
  0x25   : > { %v495_v25 = vadd.f32 %v494_v20, %v493_v22 }
  0x27   : > { %v497_v28 = vadd.f32 %v496_v23, %v495_v25 }
  0x29   : > { %v499_v31 = vadd.f32 %v498_v26, %v497_v28 }
  0x2b   : > { %v501_v34 = vadd.f32 %v500_v29, %v499_v31 }
  0x2d   : > { %v503_v37 = vadd.f32 %v502_v32, %v501_v34 }
  0x2f   : > { %v505_v40 = vadd.f32 %v504_v35, %v503_v37 }
  0x31   : > { %v507_v43 = vadd.f32 %v506_v38, %v505_v40 }
  0x33   : > { %v509_v46 = vadd.f32 %v508_v41, %v507_v43 }
  0x35   : > { %v511_v48 = vadd.f32 %v510_v44, %v509_v46 }
  0x37   : > { %v513_v50 = vadd.f32 %v512_v47, %v511_v48 }
  0x39   : > { %v515_v51 = vadd.f32 %v514_v49, %v513_v50 }
  0x3b   : > { %v516_v52 = vrot.slane %v515_v51, 4 }
  0x3d   : > { %v517_v53 = vadd.f32 %v516_v52, %v515_v51 }
  0x3f   : > { %v518_v54 = vrot.slane %v517_v53, 2 }
  0x41   : > { %v519_v55 = vadd.f32 %v518_v54, %v517_v53 }
  0x43   : > { %v520_v56 = vrot.slane %v519_v55, 1 }
  0x45   : > { %v521_v57 = vadd.f32 %v520_v56, %v519_v55 }
  0x47   : > { %3993 = vmatmul.mubr.msk.f32.vlgmr.msra.gmra.mxu1 %vm484_vm1, %v521_v57 }
  0x48   : > { %3996 = vmatpush3.xpose.msk.msra.mxu1 %vm596_vm2, %v4997_v0  ;;  %4003 = vmatprep.mubr.msk.f32.mxu1 %vm4868_vm0, %v4867_v1 }
  0x49   : > { %3997 = vmatprep.subr.mxu1 %v4867_v1 }
  0x4c   : > { %3998 = vmatpush3.xpose.msk.msra.mxu1 %vm596_vm2, %v5004_v2 }
  0x4d   : > { %3999 = vmatprep.subr.mxu1 %v4867_v1 }
  0x50   : > { %4000 = vmatpush3.xpose.msk.msra.mxu1 %vm596_vm2, %v5012_v3 }
  0x51   : > { %4001 = vmatprep.subr.mxu1 %v4867_v1 }
  0x54   : > { %4002 = vmatpush3.xpose.msk.msra.mxu1 %vm596_vm2, %v5022_v4 }
 0x107   : > { %v591_v58 = vpop.f32.mrf.mxu1 }
 0x108   : > { %v595_v59 = vmul.f32 0.001953125, %v591_v58 }
 0x109   : > { %v3994_v60 = vpop.f32.mrf.mxu1 }
 0x10a   : > { %4004 = vmatmul.mubr.msk.f32.vlgmr.msra.gmra.mxu1 %vm596_vm2, %v595_v59 }
 0x1ca   : > { %v678_v9 = vpop.f32.mrf.mxu1 }
 0x1cb   : > { %v685_v10 = vrot.slane %v678_v9, %v684_v63 }
 0x1cc   : > { %v4005_v11 = vpop.f32.mrf.mxu1 }
 0x1cd   : > { %v5147_v13 = vsub.f32 %v5037_v5, %v685_v10  ;;  %v5150_v14 = vsub.f32 %v5040_v6, %v685_v10  ;;  %v5153_v16 = vsub.f32 %v5043_v7, %v685_v10  ;;  %v5156_v17 = vsub.f32 %v5048_v8, %v685_v10 }
 0x1ce   : > { %v5163_v22 = vsub.f32 %v5059_v12, %v685_v10  ;;  %v5168_v6 = vsub.f32 %v5067_v15, %v685_v10  ;;  %v5175_v26 = vsub.f32 %v5075_v18, %v685_v10  ;;  %v5181_v15 = vsub.f32 %v5080_v21, %v685_v10 }
 0x1cf   : > { %v702_v19 = vmul.f32 %v5147_v13, %v5147_v13  ;;  %v703_v20 = vmul.f32 %v5150_v14, %v5150_v14  ;;  %v704_v5 = vmul.f32 %v5153_v16, %v5153_v16  ;;  %v705_v7 = vmul.f32 %v5156_v17, %v5156_v17 }
 0x1d0   : > { %v706_v12 = vmul.f32 %v5163_v22, %v5163_v22  ;;  %v707_v31 = vmul.f32 %v5168_v6, %v5168_v6  ;;  %v5187_v35 = vsub.f32 %v5085_v24, %v685_v10  ;;  %v708_v18 = vmul.f32 %v5175_v26, %v5175_v26 }
 0x1d1   : > { %v718_v8 = vsel %vm484_vm1, %v702_v19, 0.0  ;;  %v719_v23 = vsel %vm484_vm1, %v703_v20, 0.0  ;;  %v721_v28 = vsel %vm484_vm1, %v704_v5, 0.0  ;;  %v723_v32 = vsel %vm484_vm1, %v705_v7, 0.0 }
 0x1d2   : > { %v720_v25 = vadd.f32 %v719_v23, %v718_v8  ;;  %v725_v37 = vsel %vm484_vm1, %v706_v12, 0.0  ;;  %v5193_v40 = vsub.f32 %v5090_v27, %v685_v10  ;;  %v709_v21 = vmul.f32 %v5181_v15, %v5181_v15 }
 0x1d3   : > { %v727_v41 = vsel %vm484_vm1, %v707_v31, 0.0  ;;  %v5199_v44 = vsub.f32 %v5095_v30, %v685_v10  ;;  %v710_v24 = vmul.f32 %v5187_v35, %v5187_v35  ;;  %v729_v46 = vsel %vm484_vm1, %v708_v18, 0.0 }
 0x1d4   : > { %v722_v29 = vadd.f32 %v721_v28, %v720_v25  ;;  %v5205_v48 = vsub.f32 %v5100_v33, %v685_v10  ;;  %v711_v27 = vmul.f32 %v5193_v40, %v5193_v40  ;;  %v731_v49 = vsel %vm484_vm1, %v709_v21, 0.0  ;;  %v4541_v21 = vld [vmem:[%s6589_s7 + $0x8] sm:$0xff]  }
 0x1d5   : > { %v5211_v51 = vsub.f32 %v5105_v36, %v685_v10  ;;  %v712_v30 = vmul.f32 %v5199_v44, %v5199_v44  ;;  %v733_v52 = vsel %vm484_vm1, %v710_v24, 0.0  ;;  %v5217_v54 = vsub.f32 %v5110_v39, %v685_v10 }
 0x1d6   : > { %v724_v34 = vadd.f32 %v723_v32, %v722_v29  ;;  %v713_v33 = vmul.f32 %v5205_v48, %v5205_v48  ;;  %v735_v55 = vsel %vm484_vm1, %v711_v27, 0.0  ;;  %v5223_v57 = vsub.f32 %v5115_v42, %v685_v10 }
 0x1d7   : > { %v714_v36 = vmul.f32 %v5211_v51, %v5211_v51  ;;  %v737_v58 = vsel %vm484_vm1, %v712_v30, 0.0  ;;  %v5229_v60 = vsub.f32 %v5120_v45, %v685_v10  ;;  %v715_v39 = vmul.f32 %v5217_v54, %v5217_v54 }
 0x1d8   : > { %v726_v38 = vadd.f32 %v725_v37, %v724_v34  ;;  %v739_v61 = vsel %vm484_vm1, %v713_v33, 0.0  ;;  %v716_v11 = vmul.f32 %v5223_v57, %v5223_v57 }
 0x1d9   : > { %v741_v42 = vsel %vm484_vm1, %v714_v36, 0.0  ;;  %v717_v20 = vmul.f32 %v5229_v60, %v5229_v60  ;;  %v743_v5 = vsel %vm484_vm1, %v715_v39, 0.0 }
 0x1da   : > { %v728_v43 = vadd.f32 %v727_v41, %v726_v38  ;;  %v745_v45 = vsel %vm484_vm1, %v716_v11, 0.0 }
 0x1db   : > { %v747_v8 = vsel %vm484_vm1, %v717_v20, 0.0 }
 0x1dc   : > { %v730_v47 = vadd.f32 %v729_v46, %v728_v43  ;;  %v5279_v46 = vld [vmem:[%s6585_s3] ss:$0 sm:$0xff] }
 0x1de   : > { %v732_v50 = vadd.f32 %v731_v49, %v730_v47 }
 0x1e0   : > { %v734_v53 = vadd.f32 %v733_v52, %v732_v50 }
 0x1e2   : > { %v736_v56 = vadd.f32 %v735_v55, %v734_v53 }
 0x1e4   : > { %v738_v59 = vadd.f32 %v737_v58, %v736_v56 }
 0x1e6   : > { %v740_v9 = vadd.f32 %v739_v61, %v738_v59 }
 0x1e8   : > { %v742_v19 = vadd.f32 %v741_v42, %v740_v9 }
 0x1ea   : > { %v744_v7 = vadd.f32 %v743_v5, %v742_v19 }
 0x1ec   : > { %v746_v10 = vadd.f32 %v745_v45, %v744_v7 }
 0x1ee   : > { %v748_v23 = vadd.f32 %v747_v8, %v746_v10 }
 0x1f0   : > { %v749_v25 = vrot.slane %v748_v23, 4 }
 0x1f2   : > { %v750_v12 = vadd.f32 %v749_v25, %v748_v23 }
 0x1f4   : > { %v751_v28 = vrot.slane %v750_v12, 2 }
 0x1f6   : > { %v752_v29 = vadd.f32 %v751_v28, %v750_v12 }
 0x1f8   : > { %v753_v31 = vrot.slane %v752_v29, 1 }
 0x1fa   : > { %v754_v32 = vadd.f32 %v753_v31, %v752_v29 }
 0x1fc   : > { %4015 = vmatmul.mubr.msk.f32.vlgmr.msra.gmra.mxu0 %vm484_vm1, %v754_v32 }
 0x1fd   : > { %4018 = vmatpush3.xpose.msk.msra.mxu0 %vm596_vm2, %v4997_v0  ;;  %4025 = vmatprep.mubr.msk.f32.mxu0 %vm4868_vm0, %v4867_v1 }
 0x1fe   : > { %4019 = vmatprep.subr.mxu0 %v4867_v1 }
 0x201   : > { %4020 = vmatpush3.xpose.msk.msra.mxu0 %vm596_vm2, %v5004_v2  ;;  %v4537_v2 = vld [vmem:[%s6587_s5 + $0x8] sm:$0xff]  }
 0x202   : > { %4021 = vmatprep.subr.mxu0 %v4867_v1  ;;  %4028 = vmatprep.subr.bf16.mxu1 %v4537_v2 }
 0x203   : > { %4029 = vmatpush3.bf16.msra.mxu1 %v4537_v2 }
 0x205   : > { %4022 = vmatpush3.xpose.msk.msra.mxu0 %vm596_vm2, %v5012_v3  ;;  %v4538_v3 = vld [vmem:[%s6588_s6 + $0x8] sm:$0xff]  }
 0x206   : > { %4023 = vmatprep.subr.mxu0 %v4867_v1  ;;  %v4539_v1 = vld [vmem:[%s6587_s5] sm:$0xff]  }
 0x207   : > { %4030 = vmatprep.subr.bf16.mxu1 %v4539_v1 }
 0x208   : > { %4031 = vmatpush3.bf16.msra.mxu1 %v4539_v1 }
 0x209   : > { %4024 = vmatpush3.xpose.msk.msra.mxu0 %vm596_vm2, %v5022_v4  ;;  %v4540_v4 = vld [vmem:[%s6588_s6] sm:$0xff]   ;;  %4068 = vmatprep.subr.bf16.mxu1 %v4541_v21 }
 0x20a   : > { %4048 = vmatprep.subr.bf16.mxu0 %v4538_v3 }
 0x2bc   : > { %v824_v34 = vpop.f32.mrf.mxu0 }
 0x2bd   : > { %v828_v0 = vmul.f32 0.001953125, %v824_v34 }
 0x2be   : > { %v4016_v18 = vpop.f32.mrf.mxu0 }
 0x2bf   : > { %v829_v37 = vadd.f32 1e-05, %v828_v0 }
 0x2c1   : > { %4545 = vrsqrt.f32 %v829_v37 }
 0x2ce   : > { %v4546_v38 = vpop.eup %4545 }
 0x2cf   : > { %4026 = vmatmul.mubr.msk.f32.vlgmr.msra.gmra.mxu0 %vm596_vm2, %v4546_v38 }
 0x2d0   : > { %4049 = vmatpush3.bf16.msra.mxu0 %v4538_v3 }
 0x2d1   : > { %4050 = vmatprep.subr.bf16.mxu0 %v4540_v4 }
 0x2d4   : > { %4051 = vmatpush3.bf16.msra.mxu0 %v4540_v4  ;;  %v5380_v4 = vld [vmem:[%s6590_s8] ss:$0 sm:$0xff] }
 0x38f   : > { %v900_v41 = vpop.f32.mrf.mxu0 }
 0x390   : > { %v5274_v43 = vrot.slane %v900_v41, %v684_v63  ;;  %v5292_v63 = vld [vmem:[%s6586_s4] ss:$0 sm:$0xff] }
 0x391   : > { %v4027_v24 = vpop.f32.mrf.mxu0 }
 0x392   : > { %v908_v47 = vmul.f32 %v5274_v43, %v5147_v13  ;;  %v909_v27 = vmul.f32 %v5274_v43, %v5150_v14  ;;  %v910_v49 = vmul.f32 %v5274_v43, %v5153_v16  ;;  %v911_v62 = vmul.f32 %v5274_v43, %v5156_v17  ;;  %v5386_v24 = vld [vmem:[%s6591_s9] ss:$0 sm:$0xff] }
 0x393   : > { %v912_v50 = vmul.f32 %v5274_v43, %v5163_v22  ;;  %v913_v13 = vmul.f32 %v5274_v43, %v5168_v6  ;;  %v914_v33 = vmul.f32 %v5274_v43, %v5175_v26  ;;  %v915_v22 = vmul.f32 %v5274_v43, %v5181_v15 }
 0x394   : > { %v931_v30 = vmul.f32 %v5279_v46, %v908_v47  ;;  %v932_v14 = vmul.f32 %v5279_v46, %v909_v27  ;;  %v933_v16 = vmul.f32 %v5279_v46, %v910_v49  ;;  %v934_v52 = vmul.f32 %v5279_v46, %v911_v62 }
 0x395   : > { %v935_v17 = vmul.f32 %v5279_v46, %v912_v50  ;;  %v936_v53 = vmul.f32 %v5279_v46, %v913_v13  ;;  %v916_v26 = vmul.f32 %v5274_v43, %v5187_v35  ;;  %v917_v15 = vmul.f32 %v5274_v43, %v5193_v40  ;;  %v4542_v35 = vld [vmem:[%s6589_s7] sm:$0xff]  }
 0x396   : > { %v954_v6 = vadd.f32 %v5292_v63, %v931_v30  ;;  %v955_v55 = vadd.f32 %v5292_v63, %v932_v14  ;;  %v956_v56 = vadd.f32 %v5292_v63, %v933_v16  ;;  %v957_v36 = vadd.f32 %v5292_v63, %v934_v52 }
 0x397   : > { %v958_v58 = vadd.f32 %v5292_v63, %v935_v17  ;;  %v959_v59 = vadd.f32 %v5292_v63, %v936_v53  ;;  %v937_v9 = vmul.f32 %v5279_v46, %v914_v33  ;;  %v938_v11 = vmul.f32 %v5279_v46, %v915_v22 }
 0x398   : > { %v970_v39 = vpack.c.bf16 %v955_v55, %v954_v6  ;;  %v971_v61 = vpack.c.bf16 %v957_v36, %v956_v56  ;;  %v939_v19 = vmul.f32 %v5279_v46, %v916_v26  ;;  %v940_v20 = vmul.f32 %v5279_v46, %v917_v15 }
 0x399   : > { %v972_v42 = vpack.c.bf16 %v959_v59, %v958_v58  ;;  %v960_v40 = vadd.f32 %v5292_v63, %v937_v9  ;;  %v961_v5 = vadd.f32 %v5292_v63, %v938_v11  ;;  %v918_v7 = vmul.f32 %v5274_v43, %v5199_v44 }
 0x39a   : > { %4032 = vmatprep.mubr.msk.bf16.mxu1 %vm484_vm1, %v970_v39  ;;  %4052 = vmatprep.mubr.msk.bf16.mxu0 %vm484_vm1, %v970_v39  ;;  %v919_v45 = vmul.f32 %v5274_v43, %v5205_v48  ;;  %v962_v10 = vadd.f32 %v5292_v63, %v939_v19  ;;  %v963_v8 = vadd.f32 %v5292_v63, %v940_v20 }
 0x39b   : > { %4033 = vmatmul.mubr.msk.bf16.vlgmr.msra.gmra.mxu1 %vm484_vm1, %v971_v61  ;;  %4053 = vmatmul.mubr.msk.bf16.vlgmr.msra.gmra.mxu0 %vm484_vm1, %v971_v61  ;;  %v920_v23 = vmul.f32 %v5274_v43, %v5211_v51  ;;  %v921_v25 = vmul.f32 %v5274_v43, %v5217_v54  ;;  %v973_v12 = vpack.c.bf16 %v961_v5, %v960_v40 }
 0x39c   : > { %4036 = vmatprep.mubr.msk.bf16.mxu1 %vm484_vm1, %v972_v42  ;;  %4056 = vmatprep.mubr.msk.bf16.mxu0 %vm484_vm1, %v972_v42  ;;  %v941_v28 = vmul.f32 %v5279_v46, %v918_v7  ;;  %v942_v44 = vmul.f32 %v5279_v46, %v919_v45  ;;  %v974_v29 = vpack.c.bf16 %v963_v8, %v962_v10 }
 0x39d   : > { %4069 = vmatpush3.bf16.msra.mxu1 %v4541_v21  ;;  %v943_v48 = vmul.f32 %v5279_v46, %v920_v23  ;;  %v944_v31 = vmul.f32 %v5279_v46, %v921_v25  ;;  %v922_v32 = vmul.f32 %v5274_v43, %v5223_v57  ;;  %v923_v34 = vmul.f32 %v5274_v43, %v5229_v60 }
 0x39e   : > { %4070 = vmatprep.subr.bf16.mxu1 %v4542_v35  ;;  %v964_v51 = vadd.f32 %v5292_v63, %v941_v28  ;;  %v965_v54 = vadd.f32 %v5292_v63, %v942_v44 }
 0x39f   : > { %v966_v0 = vadd.f32 %v5292_v63, %v943_v48  ;;  %v967_v18 = vadd.f32 %v5292_v63, %v944_v31  ;;  %v945_v38 = vmul.f32 %v5279_v46, %v922_v32  ;;  %v946_v2 = vmul.f32 %v5279_v46, %v923_v34 }
 0x3a0   : > { %v975_v37 = vpack.c.bf16 %v965_v54, %v964_v51 }
 0x3a1   : > { %4071 = vmatpush3.bf16.msra.mxu1 %v4542_v35  ;;  %v976_v3 = vpack.c.bf16 %v967_v18, %v966_v0  ;;  %v968_v57 = vadd.f32 %v5292_v63, %v945_v38  ;;  %v969_v60 = vadd.f32 %v5292_v63, %v946_v2 }
 0x3a3   : > { %4037 = vmatmul.mubr.msk.bf16.gmra.mxu1 %vm484_vm1, %v973_v12  ;;  %4057 = vmatmul.mubr.msk.bf16.gmra.mxu0 %vm484_vm1, %v973_v12  ;;  %v977_v1 = vpack.c.bf16 %v969_v60, %v968_v57 }
 0x3a4   : > { %4040 = vmatprep.mubr.msk.bf16.mxu1 %vm484_vm1, %v974_v29  ;;  %4060 = vmatprep.mubr.msk.bf16.mxu0 %vm484_vm1, %v974_v29 }
 0x3ab   : > { %4041 = vmatmul.mubr.msk.bf16.gmra.mxu1 %vm484_vm1, %v975_v37  ;;  %4061 = vmatmul.mubr.msk.bf16.gmra.mxu0 %vm484_vm1, %v975_v37 }
 0x3ac   : > { %4044 = vmatprep.mubr.msk.bf16.mxu1 %vm484_vm1, %v976_v3  ;;  %4064 = vmatprep.mubr.msk.bf16.mxu0 %vm484_vm1, %v976_v3 }
 0x3b3   : > { %4045 = vmatmul.mubr.msk.bf16.gmra.mxu1 %vm484_vm1, %v977_v1  ;;  %4065 = vmatmul.mubr.msk.bf16.gmra.mxu0 %vm484_vm1, %v977_v1 }
 0x3b4   : > { %4072 = vmatprep.mubr.msk.bf16.mxu1 %vm484_vm1, %v970_v39 }
 0x3bb   : > { %4073 = vmatmul.mubr.msk.bf16.vlgmr.msra.gmra.mxu1 %vm484_vm1, %v971_v61 }
 0x3bc   : > { %4076 = vmatprep.mubr.msk.bf16.mxu1 %vm484_vm1, %v972_v42 }
 0x3c3   : > { %4077 = vmatmul.mubr.msk.bf16.gmra.mxu1 %vm484_vm1, %v973_v12 }
 0x3c4   : > { %4080 = vmatprep.mubr.msk.bf16.mxu1 %vm484_vm1, %v974_v29 }
 0x3cb   : > { %4081 = vmatmul.mubr.msk.bf16.gmra.mxu1 %vm484_vm1, %v975_v37 }
 0x3cc   : > { %4084 = vmatprep.mubr.msk.bf16.mxu1 %vm484_vm1, %v976_v3 }
 0x3d3   : > { %4085 = vmatmul.mubr.msk.bf16.gmra.mxu1 %vm484_vm1, %v977_v1 }
 0x45b   : > { %v4034_v21 = vpop.f32.mrf.mxu1  ;;  %v4054_v41 = vpop.f32.mrf.mxu0 }
 0x45c   : > { %v1068_v43 = vadd.f32 %v4034_v21, %v5380_v4  ;;  %v1196_v62 = vadd.f32 %v4054_v41, %v5386_v24 }
 0x45d   : > { %v1059_v46 = vpop.f32.mrf.mxu1  ;;  %v1187_v47 = vpop.f32.mrf.mxu0 }
 0x45e   : > { %v1060_v13 = vadd.f32 %v5380_v4, %v1059_v46  ;;  %v1188_v30 = vadd.f32 %v5386_v24, %v1187_v47 }
 0x45f   : > { %v4035_v27 = vpop.f32.mrf.mxu1  ;;  %v4055_v49 = vpop.f32.mrf.mxu0 }
 0x460   : > { %v1071_v63 = vadd.f32 %v4035_v27, %v5380_v4  ;;  %v1199_v50 = vadd.f32 %v4055_v49, %v5386_v24 }
 0x461   : > { %v1062_v14 = vpop.f32.mrf.mxu1  ;;  %v1190_v16 = vpop.f32.mrf.mxu0 }
 0x462   : > { %v5393_v52 = vpack.c.bf16 %v1071_v63, %v1068_v43  ;;  %v5395_v17 = vpack.c.bf16 %v1199_v50, %v1196_v62  ;;  %v1063_v53 = vadd.f32 %v5380_v4, %v1062_v14  ;;  %v1191_v33 = vadd.f32 %v5386_v24, %v1190_v16 }
 0x463   : > { %v4038_v22 = vpop.f32.mrf.mxu1  ;;  %v5399_v6 = vpop.f32.mrf.mxu0 }
 0x464   : > { %v5401_v55 = vpack.c.bf16 %v1063_v53, %v1060_v13  ;;  %v5403_v56 = vpack.c.bf16 %v1191_v33, %v1188_v30  ;;  %v1084_v36 = vadd.f32 %v4038_v22, %v5380_v4 }
 0x465   : > { %v1075_v58 = vpop.f32.mrf.mxu1  ;;  %v5406_v59 = vpop.f32.mrf.mxu0 }
 0x466   : > { %v1076_v39 = vadd.f32 %v5380_v4, %v1075_v58  ;;  %4104 = vmatprep.mubr.msk.bf16.mxu0 %vm596_vm2, %v5401_v55 }
 0x467   : > { %v4039_v61 = vpop.f32.mrf.mxu1  ;;  %v5411_v26 = vpop.f32.mrf.mxu0 }
 0x468   : > { %v1087_v15 = vadd.f32 %v4039_v61, %v5380_v4 }
 0x469   : > { %v1078_v9 = vpop.f32.mrf.mxu1  ;;  %v5414_v11 = vpop.f32.mrf.mxu0 }
 0x46a   : > { %v5416_v42 = vpack.c.bf16 %v1087_v15, %v1084_v36  ;;  %v1079_v19 = vadd.f32 %v5380_v4, %v1078_v9 }
 0x46b   : > { %v4042_v20 = vpop.f32.mrf.mxu1  ;;  %v4062_v35 = vpop.f32.mrf.mxu0 }
 0x46c   : > { %v5419_v40 = vpack.c.bf16 %v1079_v19, %v1076_v39  ;;  %v1100_v5 = vadd.f32 %v4042_v20, %v5380_v4  ;;  %v1228_v30 = vadd.f32 %v4062_v35, %v5386_v24  ;;  %v1215_v35 = vadd.f32 %v5411_v26, %v5386_v24 }
 0x46d   : > { %v1091_v7 = vpop.f32.mrf.mxu1  ;;  %v1219_v45 = vpop.f32.mrf.mxu0 }
 0x46e   : > { %v1092_v10 = vadd.f32 %v5380_v4, %v1091_v7  ;;  %v1220_v39 = vadd.f32 %v5386_v24, %v1219_v45  ;;  %v1212_v7 = vadd.f32 %v5399_v6, %v5386_v24 }
 0x46f   : > { %v4043_v8 = vpop.f32.mrf.mxu1  ;;  %v4063_v23 = vpop.f32.mrf.mxu0 }
 0x470   : > { %v1103_v25 = vadd.f32 %v4043_v8, %v5380_v4  ;;  %v1231_v50 = vadd.f32 %v4063_v23, %v5386_v24 }
 0x471   : > { %v1094_v12 = vpop.f32.mrf.mxu1  ;;  %v1222_v28 = vpop.f32.mrf.mxu0 }
 0x472   : > { %v5424_v44 = vpack.c.bf16 %v1103_v25, %v1100_v5  ;;  %v1095_v29 = vadd.f32 %v5380_v4, %v1094_v12  ;;  %v5465_v16 = vpack.c.bf16 %v1231_v50, %v1228_v30  ;;  %v1223_v36 = vadd.f32 %v5386_v24, %v1222_v28  ;;  %v3705_v25 = vld [vmem:[%s6592_s10] ss:$0 sm:$0xff] }
 0x473   : > { %v4046_v48 = vpop.f32.mrf.mxu1  ;;  %v4066_v31 = vpop.f32.mrf.mxu0  ;;  %v1207_v12 = vadd.f32 %v5386_v24, %v5414_v11  ;;  %v1418_v30 = vsel %vm596_vm2, %v5395_v17, 0 }
 0x474   : > { %v5427_v51 = vpack.c.bf16 %v1095_v29, %v1092_v10  ;;  %v1116_v54 = vadd.f32 %v4046_v48, %v5380_v4  ;;  %v1244_v38 = vadd.f32 %v4066_v31, %v5386_v24  ;;  %v5473_v15 = vpack.c.bf16 %v1223_v36, %v1220_v39 }
 0x475   : > { %v1107_v32 = vpop.f32.mrf.mxu1  ;;  %v1235_v34 = vpop.f32.mrf.mxu0  ;;  %v1430_v9 = vsel %vm596_vm2, %v5465_v16, 0  ;;  %v5483_v10 = vpack.c.bf16 %v1215_v35, %v1212_v7  ;;  %v1204_v48 = vadd.f32 %v5386_v24, %v5406_v59 }
 0x476   : > { %v1108_v0 = vadd.f32 %v5380_v4, %v1107_v32  ;;  %v1236_v57 = vadd.f32 %v5386_v24, %v1235_v34  ;;  %v1427_v8 = vsel %vm596_vm2, %v5473_v15, 0 }
 0x477   : > { %v4047_v18 = vpop.f32.mrf.mxu1  ;;  %v4067_v37 = vpop.f32.mrf.mxu0  ;;  %v5498_v34 = vpack.c.bf16 %v1207_v12, %v1204_v48  ;;  %v1424_v11 = vsel %vm596_vm2, %v5483_v10, 0 }
 0x478   : > { %v1119_v2 = vadd.f32 %v4047_v18, %v5380_v4  ;;  %v1247_v3 = vadd.f32 %v4067_v37, %v5386_v24 }
 0x479   : > { %v1110_v60 = vpop.f32.mrf.mxu1  ;;  %v1238_v1 = vpop.f32.mrf.mxu0 }
 0x47a   : > { %v5435_v21 = vpack.c.bf16 %v1119_v2, %v1116_v54  ;;  %v5437_v41 = vpack.c.bf16 %v1247_v3, %v1244_v38  ;;  %v1111_v43 = vadd.f32 %v5380_v4, %v1110_v60  ;;  %v1239_v46 = vadd.f32 %v5386_v24, %v1238_v1 }
 0x47b   : > { %v5441_v47 = vpop.f32.mrf.mxu1 }
 0x47c   : > { %v5443_v27 = vpack.c.bf16 %v1111_v43, %v1108_v0  ;;  %v5445_v49 = vpack.c.bf16 %v1239_v46, %v1236_v57  ;;  %1838 = vrot.lane.b32.xlu0 %v5437_v41, %s4869_s21  ;;  %4424 = vmatprep.subr.msk.bf16.mxu0 %vm596_vm2, %v5437_v41  ;;  %v1436_v62 = vsel %vm596_vm2, %v5437_v41, 0  ;;  %v1421_v57 = vsel %vm596_vm2, %v5498_v34, 0 }
 0x47d   : > { %v5453_v63 = vpop.f32.mrf.mxu1  ;;  %4089 = vmatpush3.bf16.xpose.msra.mxu0 %v1436_v62 }
 0x47e   : > { %1836 = vrot.lane.b32.xlu1 %v5445_v49, %s4869_s21  ;;  %4425 = vmatprep.subr.msk.bf16.mxu0 %vm596_vm2, %v5445_v49  ;;  %v1433_v53 = vsel %vm596_vm2, %v5445_v49, 0 }
 0x47f   : > { %v5459_v4 = vpop.f32.mrf.mxu1 }
 0x480   : > { %v1327_v62 = vadd.f32 %v5459_v4, %v3705_v25  ;;  %v1316_v4 = vadd.f32 %v3705_v25, %v5453_v63 }
 0x481   : > { %v5462_v13 = vpop.f32.mrf.mxu1 }
 0x483   : > { %v4078_v14 = vpop.f32.mrf.mxu1 }
 0x484   : > { %v1340_v60 = vadd.f32 %v4078_v14, %v3705_v25  ;;  %v1324_v14 = vadd.f32 %v5441_v47, %v3705_v25  ;;  %v1415_v47 = vsel %vm596_vm2, %v5403_v56, 0 }
 0x485   : > { %v1331_v33 = vpop.f32.mrf.mxu1  ;;  %4091 = vmatpush3.bf16.xpose.msra.mxu0 %v1433_v53 }
 0x486   : > { %4426 = vmatprep.subr.msk.bf16.mxu0 %vm596_vm2, %v5465_v16  ;;  %v1332_v46 = vadd.f32 %v3705_v25, %v1331_v33  ;;  %v5535_v53 = vpack.c.bf16 %v1327_v62, %v1324_v14  ;;  %v1319_v33 = vadd.f32 %v3705_v25, %v5462_v13 }
 0x487   : > { %v4079_v22 = vpop.f32.mrf.mxu1 }
 0x488   : > { %v1343_v2 = vadd.f32 %v4079_v22, %v3705_v25  ;;  %v5541_v22 = vpack.c.bf16 %v1319_v33, %v1316_v4 }
 0x489   : > { %v1334_v58 = vpop.f32.mrf.mxu1 }
 0x48a   : > { %v5521_v1 = vpack.c.bf16 %v1343_v2, %v1340_v60  ;;  %v1335_v43 = vadd.f32 %v3705_v25, %v1334_v58 }
 0x48b   : > { %v4082_v61 = vpop.f32.mrf.mxu1 }
 0x48c   : > { %v1356_v37 = vadd.f32 %v4082_v61, %v3705_v25  ;;  %v5526_v50 = vpack.c.bf16 %v1335_v43, %v1332_v46 }
 0x48d   : > { %v1347_v19 = vpop.f32.mrf.mxu1  ;;  %4093 = vmatpush3.bf16.xpose.msra.mxu0 %v1430_v9 }
 0x48e   : > { %4427 = vmatprep.subr.msk.bf16.mxu0 %vm596_vm2, %v5473_v15  ;;  %v1348_v38 = vadd.f32 %v3705_v25, %v1347_v19 }
 0x48f   : > { %v4083_v20 = vpop.f32.mrf.mxu1 }
 0x490   : > { %v1359_v0 = vadd.f32 %v4083_v20, %v3705_v25 }
 0x491   : > { %v1350_v5 = vpop.f32.mrf.mxu1 }
 0x492   : > { %v5509_v24 = vpack.c.bf16 %v1359_v0, %v1356_v37  ;;  %v1351_v59 = vadd.f32 %v3705_v25, %v1350_v5 }
 0x493   : > { %v4086_v45 = vpop.f32.mrf.mxu1 }
 0x494   : > { %v1372_v6 = vadd.f32 %v4086_v45, %v3705_v25  ;;  %v5513_v3 = vpack.c.bf16 %v1351_v59, %v1348_v38 }
 0x495   : > { %v1363_v23 = vpop.f32.mrf.mxu1  ;;  %4095 = vmatpush3.bf16.xpose.msra.mxu0 %v1427_v8 }
 0x496   : > { %4428 = vmatprep.subr.msk.bf16.mxu0 %vm596_vm2, %v5483_v10  ;;  %v1364_v31 = vadd.f32 %v3705_v25, %v1363_v23 }
 0x497   : > { %v4087_v26 = vpop.f32.mrf.mxu1 }
 0x498   : > { %v1375_v28 = vadd.f32 %v4087_v26, %v3705_v25 }
 0x499   : > { %v1366_v29 = vpop.f32.mrf.mxu1 }
 0x49a   : > { %v5496_v54 = vpack.c.bf16 %v1375_v28, %v1372_v6  ;;  %v1367_v32 = vadd.f32 %v3705_v25, %v1366_v29 }
 0x49c   : > { %v5500_v18 = vpack.c.bf16 %v1367_v32, %v1364_v31  ;;  %4120 = vmatprep.subr.bf16.mxu1 %v5496_v54 }
 0x49d   : > { %4097 = vmatpush3.bf16.xpose.msra.mxu0 %v1424_v11  ;;  %4121 = vmatpush3.bf16.msra.mxu1 %v5496_v54 }
 0x49e   : > { %4429 = vmatprep.subr.msk.bf16.mxu0 %vm596_vm2, %v5498_v34  ;;  %4122 = vmatprep.subr.bf16.mxu1 %v5500_v18 }
 0x4a1   : > { %4123 = vmatpush3.bf16.msra.mxu1 %v5500_v18 }
 0x4a2   : > { %4124 = vmatprep.subr.bf16.mxu1 %v5509_v24 }
 0x4a5   : > { %4099 = vmatpush3.bf16.xpose.msra.mxu0 %v1421_v57  ;;  %4125 = vmatpush3.bf16.msra.mxu1 %v5509_v24 }
 0x4a6   : > { %4430 = vmatprep.subr.msk.bf16.mxu0 %vm596_vm2, %v5395_v17  ;;  %4126 = vmatprep.subr.bf16.mxu1 %v5513_v3 }
 0x4a9   : > { %4127 = vmatpush3.bf16.msra.mxu1 %v5513_v3 }
 0x4aa   : > { %4128 = vmatprep.subr.bf16.mxu1 %v5521_v1 }
 0x4ad   : > { %4101 = vmatpush3.bf16.xpose.msra.mxu0 %v1418_v30  ;;  %4129 = vmatpush3.bf16.msra.mxu1 %v5521_v1 }
 0x4ae   : > { %4431 = vmatprep.subr.msk.bf16.mxu0 %vm596_vm2, %v5403_v56  ;;  %4130 = vmatprep.subr.bf16.mxu1 %v5526_v50 }
 0x4b1   : > { %4131 = vmatpush3.bf16.msra.mxu1 %v5526_v50 }
 0x4b2   : > { %4132 = vmatprep.subr.bf16.mxu1 %v5535_v53 }
 0x4b5   : > { %4103 = vmatpush3.bf16.xpose.msra.mxu0 %v1415_v47  ;;  %4133 = vmatpush3.bf16.msra.mxu1 %v5535_v53 }
 0x4b6   : > { %4134 = vmatprep.subr.bf16.mxu1 %v5541_v22 }
 0x4b9   : > { %4135 = vmatpush3.bf16.msra.mxu1 %v5541_v22 }
 0x4bc   : > { %4105 = vmatmul.mubr.msk.bf16.vlgmr.msra.gmra.mxu0 %vm596_vm2, %v5393_v52 }
 0x4bd   : > { %4108 = vmatprep.mubr.msk.bf16.mxu0 %vm596_vm2, %v5419_v40 }
 0x4c4   : > { %4109 = vmatmul.mubr.msk.bf16.gmra.mxu0 %vm596_vm2, %v5416_v42 }
 0x4c5   : > { %4112 = vmatprep.mubr.msk.bf16.mxu0 %vm596_vm2, %v5427_v51 }
 0x4cc   : > { %4113 = vmatmul.mubr.msk.bf16.gmra.mxu0 %vm596_vm2, %v5424_v44 }
 0x4cd   : > { %4116 = vmatprep.mubr.msk.bf16.mxu0 %vm596_vm2, %v5443_v27 }
 0x4d4   : > { %4117 = vmatmul.mubr.msk.bf16.gmra.mxu0 %vm596_vm2, %v5435_v21 }
 0x4ee   : > { %v5562_v63 = vpop.permute.xlu0 %1838 }
 0x4ef   : > { %4432 = vmatprep.subr.msk.bf16.mxu1 %vm596_vm2, %v5562_v63 }
 0x4f0   : > { %v5600_v12 = vpop.permute.xlu1 %1836 }
 0x57c   : > { %v4106_v13 = vpop.f32.mrf.mxu0 }
 0x57d   : > { %1539 = vmax.xlane.f32.xlu1 %v4106_v13 }
 0x57e   : > { %v1472_v36 = vpop.f32.mrf.mxu0 }
 0x57f   : > { %1535 = vmax.xlane.f32.xlu0 %v1472_v36 }
 0x580   : > { %v4107_v58 = vpop.f32.mrf.mxu0 }
 0x581   : > { %1541 = vmax.xlane.f32.xlu1 %v4107_v58 }
 0x582   : > { %v1475_v39 = vpop.f32.mrf.mxu0 }
 0x583   : > { %1537 = vmax.xlane.f32.xlu0 %v1475_v39 }
 0x584   : > { %v4110_v61 = vpop.f32.mrf.mxu0 }
 0x586   : > { %v5566_v9 = vpop.f32.mrf.mxu0 }
 0x587   : > { %1547 = vmax.xlane.f32.xlu0 %v4110_v61 }
 0x588   : > { %v5568_v19 = vpop.f32.mrf.mxu0 }
 0x589   : > { %1549 = vmax.xlane.f32.xlu1 %v5568_v19 }
 0x58a   : > { %v5571_v20 = vpop.f32.mrf.mxu0 }
 0x58b   : > { %1543 = vmax.xlane.f32.xlu0 %v5566_v9 }
 0x58c   : > { %v5574_v35 = vpop.f32.mrf.mxu0 }
 0x58d   : > { %1545 = vmax.xlane.f32.xlu1 %v5571_v20 }
 0x58e   : > { %v5577_v5 = vpop.f32.mrf.mxu0 }
 0x58f   : > { %1555 = vmax.xlane.f32.xlu0 %v5574_v35 }
 0x590   : > { %v5580_v7 = vpop.f32.mrf.mxu0 }
 0x591   : > { %1557 = vmax.xlane.f32.xlu1 %v5580_v7 }
 0x592   : > { %v5583_v45 = vpop.f32.mrf.mxu0 }
 0x593   : > { %1551 = vmax.xlane.f32.xlu0 %v5577_v5 }
 0x594   : > { %v4118_v8 = vpop.f32.mrf.mxu0 }
 0x595   : > { %1553 = vmax.xlane.f32.xlu1 %v5583_v45 }
 0x596   : > { %v5587_v23 = vpop.f32.mrf.mxu0 }
 0x597   : > { %1563 = vmax.xlane.f32.xlu0 %v4118_v8 }
 0x598   : > { %v5594_v25 = vpop.f32.mrf.mxu0 }
 0x59a   : > { %v5597_v26 = vpop.f32.mrf.mxu0 }
 0x59b   : > { %1559 = vmax.xlane.f32.xlu0 %v5587_v23 }
 0x5a6   : > { %1832 = vrot.lane.b32.xlu1 %v5473_v15, %s4869_s21 }
 0x5b1   : > { %1834 = vrot.lane.b32.xlu0 %v5465_v16, %s4869_s21 }
 0x5ca   : > { %1565 = vmax.xlane.f32.xlu1 %v5594_v25 }
 0x5ce   : > { %1561 = vmax.xlane.f32.xlu1 %v5597_v26 }
 0x606   : > { %v1540_v6 = vpop.xlane.xlu1 %1539 }
 0x607   : > { %v1569_v28 = vsub.f32 %v4106_v13, %v1540_v6 }
 0x608   : > { %v1536_v29 = vpop.xlane.xlu0 %1535 }
 0x609   : > { %v1587_v48 = vmul.f32 1.442695, %v1569_v28  ;;  %v1567_v31 = vsub.f32 %v1472_v36, %v1536_v29 }
 0x60a   : > { %v1542_v32 = vpop.xlane.xlu1 %1541 }
 0x60b   : > { %4547 = vpow2.f32 %v1587_v48  ;;  %v1583_v0 = vmul.f32 1.442695, %v1567_v31  ;;  %v1570_v11 = vsub.f32 %v4107_v58, %v1542_v32 }
 0x60c   : > { %v1538_v37 = vpop.xlane.xlu0 %1537 }
 0x60d   : > { %v1589_v59 = vmul.f32 1.442695, %v1570_v11  ;;  %v1568_v38 = vsub.f32 %v1475_v39, %v1538_v37  ;;  %4549 = vpow2.f32 %v1583_v0 }
 0x60f   : > { %4551 = vpow2.f32 %v1589_v59  ;;  %v1585_v2 = vmul.f32 1.442695, %v1568_v38 }
 0x610   : > { %v1548_v62 = vpop.xlane.xlu0 %1547 }
 0x611   : > { %4553 = vpow2.f32 %v1585_v2  ;;  %v1573_v47 = vsub.f32 %v4110_v61, %v1548_v62 }
 0x612   : > { %v1550_v33 = vpop.xlane.xlu1 %1549 }
 0x613   : > { %v1595_v39 = vmul.f32 1.442695, %v1573_v47  ;;  %v1574_v28 = vsub.f32 %v5568_v19, %v1550_v33 }
 0x614   : > { %v1544_v30 = vpop.xlane.xlu0 %1543 }
 0x615   : > { %v1571_v36 = vsub.f32 %v5566_v9, %v1544_v30  ;;  %4555 = vpow2.f32 %v1595_v39  ;;  %v1597_v11 = vmul.f32 1.442695, %v1574_v28 }
 0x616   : > { %v1546_v13 = vpop.xlane.xlu1 %1545 }
 0x617   : > { %v1572_v6 = vsub.f32 %v5571_v20, %v1546_v13  ;;  %v1591_v29 = vmul.f32 1.442695, %v1571_v36 }
 0x618   : > { %v5602_v57 = vpop.eup %4547  ;;  %v1556_v14 = vpop.xlane.xlu0 %1555 }
 0x619   : > { %1619 = vadd.xlane.f32.xlu0 %v5602_v57  ;;  %v1593_v31 = vmul.f32 1.442695, %v1572_v6  ;;  %4557 = vpow2.f32 %v1591_v29  ;;  %v1577_v37 = vsub.f32 %v5574_v35, %v1556_v14 }
 0x61a   : > { %v5605_v60 = vpop.eup %4549  ;;  %v1558_v48 = vpop.xlane.xlu1 %1557 }
 0x61b   : > { %4559 = vpow2.f32 %v1593_v31  ;;  %v1603_v38 = vmul.f32 1.442695, %v1577_v37  ;;  %v1578_v2 = vsub.f32 %v5580_v7, %v1558_v48 }
 0x61c   : > { %v5607_v43 = vpop.eup %4551  ;;  %v1552_v4 = vpop.xlane.xlu0 %1551  ;;  %4561 = vpow2.f32 %v1597_v11 }
 0x61d   : > { %1615 = vadd.xlane.f32.xlu0 %v5605_v60  ;;  %1621 = vadd.xlane.f32.xlu1 %v5607_v43  ;;  %v1575_v20 = vsub.f32 %v5577_v5, %v1552_v4  ;;  %v1605_v35 = vmul.f32 1.442695, %v1578_v2 }
 0x61e   : > { %v5611_v46 = vpop.eup %4553  ;;  %v1554_v59 = vpop.xlane.xlu1 %1553 }
 0x61f   : > { %v1599_v62 = vmul.f32 1.442695, %v1575_v20  ;;  %v1576_v5 = vsub.f32 %v5583_v45, %v1554_v59 }
 0x620   : > { %v1564_v58 = vpop.xlane.xlu0 %1563 }
 0x621   : > { %1617 = vadd.xlane.f32.xlu1 %v5611_v46  ;;  %v1581_v32 = vsub.f32 %v4118_v8, %v1564_v58  ;;  %v1601_v36 = vmul.f32 1.442695, %v1576_v5 }
 0x622   : > { %v5625_v8 = vpop.permute.xlu1 %1832  ;;  %v5627_v30 = vpop.eup %4555 }
 0x623   : > { %v1611_v61 = vmul.f32 1.442695, %v1581_v32 }
 0x624   : > { %v1560_v0 = vpop.xlane.xlu0 %1559 }
 0x625   : > { %v1579_v9 = vsub.f32 %v5587_v23, %v1560_v0  ;;  %4563 = vpow2.f32 %v1611_v61 }
 0x626   : > { %4565 = vpow2.f32 %v1603_v38  ;;  %v5630_v14 = vpop.eup %4557 }
 0x627   : > { %v1607_v19 = vmul.f32 1.442695, %v1579_v9 }
 0x628   : > { %v5634_v4 = vpop.eup %4559  ;;  %v1835_v32 = vpop.permute.xlu0 %1834 }
 0x629   : > { %4567 = vpow2.f32 %v1607_v19  ;;  %v5638_v13 = vpop.eup %4561 }
 0x62a   : > { %4569 = vpow2.f32 %v1599_v62 }
 0x62b   : > { %4571 = vpow2.f32 %v1605_v35 }
 0x632   : > { %1828 = vrot.lane.b32.xlu1 %v5498_v34, %s4869_s21  ;;  %v5641_v39 = vpop.eup %4563 }
 0x633   : > { %1830 = vrot.lane.b32.xlu0 %v5483_v10, %s4869_s21  ;;  %v5645_v45 = vpop.eup %4565 }
 0x636   : > { %v5647_v6 = vpop.eup %4567 }
 0x637   : > { %v5651_v28 = vpop.eup %4569 }
 0x652   : > { %1627 = vadd.xlane.f32.xlu0 %v5627_v30 }
 0x653   : > { %v1566_v23 = vpop.xlane.xlu1 %1565 }
 0x654   : > { %v1582_v33 = vsub.f32 %v5594_v25, %v1566_v23 }
 0x656   : > { %v1613_v7 = vmul.f32 1.442695, %v1582_v33  ;;  %1625 = vadd.xlane.f32.xlu0 %v5634_v4  ;;  %1623 = vadd.xlane.f32.xlu1 %v5630_v14  ;;  %v1886_v33 = vsel %vm596_vm2, %v5562_v63, 0 }
 0x657   : > { %v1562_v47 = vpop.xlane.xlu1 %1561 }
 0x658   : > { %4573 = vpow2.f32 %v1613_v7  ;;  %v1580_v58 = vsub.f32 %v5597_v26, %v1562_v47  ;;  %v5654_v26 = vpop.eup %4571 }
 0x659   : > { %4575 = vpow2.f32 %v1601_v36 }
 0x65a   : > { %1643 = vadd.xlane.f32.xlu0 %v5641_v39  ;;  %1629 = vadd.xlane.f32.xlu1 %v5638_v13  ;;  %v1609_v25 = vmul.f32 1.442695, %v1580_v58 }
 0x65c   : > { %4577 = vpow2.f32 %v1609_v25 }
 0x65e   : > { %1639 = vadd.xlane.f32.xlu0 %v5647_v6  ;;  %1635 = vadd.xlane.f32.xlu1 %v5645_v45 }
 0x662   : > { %1631 = vadd.xlane.f32.xlu1 %v5651_v28 }
 0x665   : > { %v5656_v29 = vpop.eup %4573 }
 0x666   : > { %1645 = vadd.xlane.f32.xlu0 %v5656_v29  ;;  %1637 = vadd.xlane.f32.xlu1 %v5654_v26  ;;  %v5660_v48 = vpop.eup %4575 }
 0x669   : > { %v5663_v31 = vpop.eup %4577 }
 0x66a   : > { %1633 = vadd.xlane.f32.xlu1 %v5660_v48 }
 0x66e   : > { %1641 = vadd.xlane.f32.xlu1 %v5663_v31 }
 0x67c   : > { %1826 = vrot.lane.b32.xlu0 %v5395_v17, %s4869_s21 }
 0x67f   : > { %1824 = vrot.lane.b32.xlu1 %v5403_v56, %s4869_s21 }
 0x680   : > { %1800 = vrot.lane.b32.xlu0 %v5401_v55, %s4869_s21 }
 0x683   : > { %1802 = vrot.lane.b32.xlu1 %v5393_v52, %s4869_s21 }
 0x684   : > { %1804 = vrot.lane.b32.xlu0 %v5419_v40, %s4869_s21 }
 0x687   : > { %1806 = vrot.lane.b32.xlu1 %v5416_v42, %s4869_s21 }
 0x688   : > { %1808 = vrot.lane.b32.xlu0 %v5427_v51, %s4869_s21 }
 0x68b   : > { %1810 = vrot.lane.b32.xlu1 %v5424_v44, %s4869_s21 }
 0x68c   : > { %1812 = vrot.lane.b32.xlu0 %v5443_v27, %s4869_s21 }
 0x68f   : > { %1814 = vrot.lane.b32.xlu1 %v5435_v21, %s4869_s21 }
 0x690   : > { %2159 = vrot.lane.b32.xlu0 %v5496_v54, %s4869_s21 }
 0x693   : > { %2157 = vrot.lane.b32.xlu1 %v5500_v18, %s4869_s21 }
 0x694   : > { %2155 = vrot.lane.b32.xlu0 %v5509_v24, %s4869_s21 }
 0x6a2   : > { %v1620_v0 = vpop.xlane.xlu0 %1619 }
 0x6a6   : > { %v1616_v11 = vpop.xlane.xlu0 %1615  ;;  %v1622_v37 = vpop.xlane.xlu1 %1621 }
 0x6a7   : > { %4579 = vrcp.f32 %v1622_v37 }
 0x6a8   : > { %4581 = vrcp.f32 %v1616_v11 }
 0x6a9   : > { %4583 = vrcp.f32 %v1620_v0 }
 0x6aa   : > { %v1618_v61 = vpop.xlane.xlu1 %1617  ;;  %v1831_v63 = vpop.permute.xlu0 %1830 }
 0x6ab   : > { %4585 = vrcp.f32 %v1618_v61 }
 0x6b4   : > { %v4580_v9 = vpop.eup %4579 }
 0x6b5   : > { %v4582_v59 = vpop.eup %4581  ;;  %v1666_v19 = vmul.f32 %v4580_v9, %v5607_v43  ;;  %v1883_v43 = vsel %vm596_vm2, %v5600_v12, 0 }
 0x6b6   : > { %v4584_v38 = vpop.eup %4583  ;;  %v1663_v2 = vmul.f32 %v4582_v59, %v5605_v60  ;;  %v1880_v60 = vsel %vm596_vm2, %v1835_v32, 0 }
 0x6b7   : > { %v1665_v35 = vmul.f32 %v4584_v38, %v5602_v57  ;;  %v1877_v57 = vsel %vm596_vm2, %v5625_v8, 0 }
 0x6b8   : > { %v4586_v20 = vpop.eup %4585 }
 0x6b9   : > { %v1664_v62 = vmul.f32 %v4586_v20, %v5611_v46  ;;  %v1680_v5 = vpack.c.bf16 %v1666_v19, %v1665_v35  ;;  %v1829_v46 = vpop.permute.xlu1 %1828 }
 0x6bb   : > { %v1679_v23 = vpack.c.bf16 %v1664_v62, %v1663_v2 }
 0x6bd   : > { %4136 = vmatprep.mubr.bf16.mxu1 %v1679_v23 }
 0x6be   : > { %4137 = vmatmul.mubr.bf16.vlgmr.msra.gmra.mxu1 %v1680_v5 }
 0x6bf   : > { %4153 = vmatpush3.bf16.xpose.msra.mxu1 %v1886_v33 }
 0x6c0   : > { %4433 = vmatprep.subr.msk.bf16.mxu1 %vm596_vm2, %v5600_v12  ;;  %v1874_v12 = vsel %vm596_vm2, %v1831_v63, 0 }
 0x6c7   : > { %4155 = vmatpush3.bf16.xpose.msra.mxu1 %v1883_v43 }
 0x6c8   : > { %4434 = vmatprep.subr.msk.bf16.mxu1 %vm596_vm2, %v1835_v32 }
 0x6cf   : > { %4157 = vmatpush3.bf16.xpose.msra.mxu1 %v1880_v60 }
 0x6d0   : > { %4435 = vmatprep.subr.msk.bf16.mxu1 %vm596_vm2, %v5625_v8  ;;  %v1871_v8 = vsel %vm596_vm2, %v1829_v46, 0 }
 0x6d7   : > { %4159 = vmatpush3.bf16.xpose.msra.mxu1 %v1877_v57 }
 0x6d8   : > { %4436 = vmatprep.subr.msk.bf16.mxu1 %vm596_vm2, %v1831_v63 }
 0x6db   : > { %v1628_v7 = vpop.xlane.xlu0 %1627 }
 0x6df   : > { %4161 = vmatpush3.bf16.xpose.msra.mxu1 %v1874_v12  ;;  %v1626_v47 = vpop.xlane.xlu0 %1625  ;;  %v1624_v36 = vpop.xlane.xlu1 %1623 }
 0x6e0   : > { %4587 = vrcp.f32 %v1626_v47  ;;  %4437 = vmatprep.subr.msk.bf16.mxu1 %vm596_vm2, %v1829_v46 }
 0x6e1   : > { %4589 = vrcp.f32 %v1624_v36 }
 0x6e2   : > { %4591 = vrcp.f32 %v1628_v7 }
 0x6e3   : > { %v1630_v58 = vpop.xlane.xlu1 %1629  ;;  %v1644_v25 = vpop.xlane.xlu0 %1643 }
 0x6e4   : > { %4593 = vrcp.f32 %v1630_v58 }
 0x6e7   : > { %4163 = vmatpush3.bf16.xpose.msra.mxu1 %v1871_v8  ;;  %v1636_v32 = vpop.xlane.xlu1 %1635  ;;  %v1640_v0 = vpop.xlane.xlu0 %1639 }
 0x6eb   : > { %v1632_v11 = vpop.xlane.xlu1 %1631 }
 0x6ed   : > { %v4588_v37 = vpop.eup %4587 }
 0x6ee   : > { %v4590_v61 = vpop.eup %4589  ;;  %v1668_v9 = vmul.f32 %v4588_v37, %v5634_v4 }
 0x6ef   : > { %v1646_v59 = vpop.xlane.xlu0 %1645  ;;  %v1638_v38 = vpop.xlane.xlu1 %1637  ;;  %v1667_v20 = vmul.f32 %v4590_v61, %v5630_v14 }
 0x6f0   : > { %v4592_v19 = vpop.eup %4591  ;;  %4595 = vrcp.f32 %v1638_v38 }
 0x6f1   : > { %v1681_v2 = vpack.c.bf16 %v1668_v9, %v1667_v20  ;;  %v4594_v62 = vpop.eup %4593  ;;  %4597 = vrcp.f32 %v1632_v11  ;;  %v1669_v5 = vmul.f32 %v4592_v19, %v5627_v30 }
 0x6f2   : > { %4599 = vrcp.f32 %v1636_v32  ;;  %v1670_v33 = vmul.f32 %v4594_v62, %v5638_v13 }
 0x6f3   : > { %4140 = vmatprep.mubr.bf16.mxu1 %v1681_v2  ;;  %v1827_v35 = vpop.permute.xlu0 %1826  ;;  %v1634_v23 = vpop.xlane.xlu1 %1633 }
 0x6f4   : > { %4601 = vrcp.f32 %v1634_v23  ;;  %4438 = vmatprep.subr.msk.bf16.mxu1 %vm596_vm2, %v1827_v35  ;;  %v1868_v4 = vsel %vm596_vm2, %v1827_v35, 0  ;;  %v1682_v14 = vpack.c.bf16 %v1670_v33, %v1669_v5 }
 0x6f5   : > { %4165 = vmatpush3.bf16.xpose.msra.mxu1 %v1868_v4  ;;  %4603 = vrcp.f32 %v1640_v0 }
 0x6f6   : > { %4141 = vmatmul.mubr.bf16.gmra.mxu1 %v1682_v14 }
 0x6f7   : > { %v1801_v43 = vpop.permute.xlu0 %1800  ;;  %v1642_v60 = vpop.xlane.xlu1 %1641 }
 0x6f8   : > { %4605 = vrcp.f32 %v1642_v60 }
 0x6f9   : > { %4607 = vrcp.f32 %v1646_v59 }
 0x6fa   : > { %4609 = vrcp.f32 %v1644_v25 }
 0x6fb   : > { %v1805_v57 = vpop.permute.xlu0 %1804  ;;  %v1825_v63 = vpop.permute.xlu1 %1824 }
 0x6fc   : > { %4439 = vmatprep.subr.msk.bf16.mxu1 %vm596_vm2, %v1825_v63  ;;  %v1865_v30 = vsel %vm596_vm2, %v1825_v63, 0 }
 0x6fd   : > { %4167 = vmatpush3.bf16.xpose.msra.mxu1 %v1865_v30  ;;  %v4596_v13 = vpop.eup %4595 }
 0x6fe   : > { %v4598_v46 = vpop.eup %4597  ;;  %v1674_v58 = vmul.f32 %v4596_v13, %v5654_v26 }
 0x6ff   : > { %v1809_v7 = vpop.permute.xlu0 %1808  ;;  %v1803_v12 = vpop.permute.xlu1 %1802  ;;  %v1671_v8 = vmul.f32 %v4598_v46, %v5651_v28 }
 0x700   : > { %v4600_v47 = vpop.eup %4599 }
 0x701   : > { %v4602_v36 = vpop.eup %4601  ;;  %v1673_v37 = vmul.f32 %v4600_v47, %v5645_v45 }
 0x702   : > { %v1672_v32 = vmul.f32 %v4602_v36, %v5660_v48  ;;  %v4604_v25 = vpop.eup %4603 }
 0x703   : > { %v1813_v0 = vpop.permute.xlu0 %1812  ;;  %v1807_v11 = vpop.permute.xlu1 %1806  ;;  %v1684_v59 = vpack.c.bf16 %v1674_v58, %v1673_v37  ;;  %v1675_v20 = vmul.f32 %v4604_v25, %v5647_v6 }
 0x704   : > { %v1683_v61 = vpack.c.bf16 %v1672_v32, %v1671_v8 }
 0x705   : > { %v4606_v9 = vpop.eup %4605 }
 0x706   : > { %v4608_v38 = vpop.eup %4607  ;;  %4144 = vmatprep.mubr.bf16.mxu1 %v1683_v61  ;;  %v1676_v19 = vmul.f32 %v4606_v9, %v5663_v31 }
 0x707   : > { %v2160_v2 = vpop.permute.xlu0 %2159  ;;  %4145 = vmatmul.mubr.bf16.gmra.mxu1 %v1684_v59  ;;  %v1811_v26 = vpop.permute.xlu1 %1810  ;;  %v1678_v62 = vmul.f32 %v4608_v38, %v5656_v29 }
 0x708   : > { %v4610_v28 = vpop.eup %4609  ;;  %4184 = vmatprep.subr.bf16.mxu0 %v2160_v2  ;;  %v1685_v48 = vpack.c.bf16 %v1676_v19, %v1675_v20 }
 0x709   : > { %4185 = vmatpush3.bf16.msra.mxu0 %v2160_v2  ;;  %v1677_v35 = vmul.f32 %v4610_v28, %v5641_v39 }
 0x70a   : > { %4148 = vmatprep.mubr.bf16.mxu1 %v1685_v48 }
 0x70b   : > { %v1815_v45 = vpop.permute.xlu1 %1814  ;;  %v1686_v23 = vpack.c.bf16 %v1678_v62, %v1677_v35  ;;  %v2156_v6 = vpop.permute.xlu0 %2155 }
 0x70f   : > { %4149 = vmatmul.mubr.bf16.gmra.mxu1 %v1686_v23  ;;  %v2158_v5 = vpop.permute.xlu1 %2157 }
 0x710   : > { %4168 = vmatprep.mubr.msk.bf16.mxu1 %vm596_vm2, %v1801_v43  ;;  %4186 = vmatprep.subr.bf16.mxu0 %v2158_v5 }
 0x711   : > { %4187 = vmatpush3.bf16.msra.mxu0 %v2158_v5 }
 0x712   : > { %4188 = vmatprep.subr.bf16.mxu0 %v2156_v6 }
 0x715   : > { %4189 = vmatpush3.bf16.msra.mxu0 %v2156_v6 }
 0x717   : > { %4169 = vmatmul.mubr.msk.bf16.vlgmr.msra.gmra.mxu1 %vm596_vm2, %v1803_v12 }
 0x718   : > { %4172 = vmatprep.mubr.msk.bf16.mxu1 %vm596_vm2, %v1805_v57 }
 0x71f   : > { %4173 = vmatmul.mubr.msk.bf16.gmra.mxu1 %vm596_vm2, %v1807_v11 }
 0x720   : > { %4176 = vmatprep.mubr.msk.bf16.mxu1 %vm596_vm2, %v1809_v7 }
 0x727   : > { %4177 = vmatmul.mubr.msk.bf16.gmra.mxu1 %vm596_vm2, %v1811_v26 }
 0x728   : > { %4180 = vmatprep.mubr.msk.bf16.mxu1 %vm596_vm2, %v1813_v0 }
 0x72f   : > { %4181 = vmatmul.mubr.msk.bf16.gmra.mxu1 %vm596_vm2, %v1815_v45 }
 0x77e   : > { %v4138_v39 = vpop.f32.mrf.mxu1 }
 0x780   : > { %v1721_v29 = vpop.f32.mrf.mxu1 }
 0x782   : > { %v4139_v31 = vpop.f32.mrf.mxu1 }
 0x783   : > { %v5736_v33 = vpack.c.bf16 %v4139_v31, %v4138_v39 }
 0x784   : > { %v1724_v4 = vpop.f32.mrf.mxu1 }
 0x785   : > { %v5738_v14 = vpack.c.bf16 %v1724_v4, %v1721_v29 }
 0x7b6   : > { %v4142_v43 = vpop.f32.mrf.mxu1 }
 0x7b8   : > { %v1737_v60 = vpop.f32.mrf.mxu1 }
 0x7ba   : > { %v4143_v57 = vpop.f32.mrf.mxu1 }
 0x7bb   : > { %v1787_v35 = vpack.c.bf16 %v4143_v57, %v4142_v43  ;;  %v2377_v43 = vsel %vm596_vm2, %v5736_v33, 0 }
 0x7bc   : > { %v1740_v63 = vpop.f32.mrf.mxu1 }
 0x7bd   : > { %v2383_v39 = vsel %vm596_vm2, %v1787_v35, 0  ;;  %v1786_v29 = vpack.c.bf16 %v1740_v63, %v1737_v60  ;;  %v2374_v60 = vsel %vm596_vm2, %v5738_v14, 0 }
 0x7bf   : > { %v2380_v4 = vsel %vm596_vm2, %v1786_v29, 0 }
 0x7c7   : > { %v4146_v30 = vpop.f32.mrf.mxu1 }
 0x7c9   : > { %v1753_v13 = vpop.f32.mrf.mxu1 }
 0x7cb   : > { %v4147_v46 = vpop.f32.mrf.mxu1 }
 0x7cc   : > { %v1789_v9 = vpack.c.bf16 %v4147_v46, %v4146_v30 }
 0x7cd   : > { %v1756_v7 = vpop.f32.mrf.mxu1 }
 0x7ce   : > { %v2389_v26 = vsel %vm596_vm2, %v1789_v9, 0  ;;  %v1788_v28 = vpack.c.bf16 %v1756_v7, %v1753_v13  ;;  %v5823_v13 = vld [vmem:[%s6593_s11 + $0x8] sm:$0xff]  }
 0x7cf   : > { %v4150_v12 = vpop.f32.mrf.mxu1 }
 0x7d0   : > { %v2386_v23 = vsel %vm596_vm2, %v1788_v28, 0 }
 0x7d1   : > { %v1769_v47 = vpop.f32.mrf.mxu1 }
 0x7d3   : > { %v4151_v36 = vpop.f32.mrf.mxu1 }
 0x7d4   : > { %v1791_v58 = vpack.c.bf16 %v4151_v36, %v4150_v12 }
 0x7d5   : > { %v1772_v8 = vpop.f32.mrf.mxu1 }
 0x7d6   : > { %v2395_v32 = vsel %vm596_vm2, %v1791_v58, 0  ;;  %v1790_v25 = vpack.c.bf16 %v1772_v8, %v1769_v47  ;;  %4448 = vmatprep.subr.msk.bf16.mxu1 %vm596_vm2, %v1791_v58 }
 0x7d7   : > { %v5742_v0 = vpop.f32.mrf.mxu1  ;;  %4237 = vmatpush3.bf16.xpose.msra.mxu1 %v2395_v32 }
 0x7d8   : > { %4449 = vmatprep.subr.msk.bf16.mxu1 %vm596_vm2, %v1790_v25  ;;  %1989 = vmax.xlane.f32.xlu0 %v5742_v0  ;;  %v2392_v59 = vsel %vm596_vm2, %v1790_v25, 0 }
 0x7d9   : > { %v5746_v11 = vpop.f32.mrf.mxu1 }
 0x7db   : > { %v5748_v37 = vpop.f32.mrf.mxu1 }
 0x7dc   : > { %1985 = vmax.xlane.f32.xlu0 %v5746_v11 }
 0x7dd   : > { %v5751_v61 = vpop.f32.mrf.mxu1 }
 0x7de   : > { %1987 = vmax.xlane.f32.xlu1 %v5751_v61 }
 0x7df   : > { %v5755_v38 = vpop.f32.mrf.mxu1  ;;  %4239 = vmatpush3.bf16.xpose.msra.mxu1 %v2392_v59 }
 0x7e0   : > { %4450 = vmatprep.subr.msk.bf16.mxu1 %vm596_vm2, %v1789_v9  ;;  %1991 = vmax.xlane.f32.xlu0 %v5748_v37 }
 0x7e1   : > { %v5759_v20 = vpop.f32.mrf.mxu1 }
 0x7e3   : > { %v5761_v19 = vpop.f32.mrf.mxu1 }
 0x7e4   : > { %1997 = vmax.xlane.f32.xlu0 %v5755_v38  ;;  %1999 = vmax.xlane.f32.xlu1 %v5761_v19 }
 0x7e5   : > { %v5765_v2 = vpop.f32.mrf.mxu1 }
 0x7e7   : > { %v5768_v48 = vpop.f32.mrf.mxu1  ;;  %4241 = vmatpush3.bf16.xpose.msra.mxu1 %v2389_v26 }
 0x7e8   : > { %4451 = vmatprep.subr.msk.bf16.mxu1 %vm596_vm2, %v1788_v28  ;;  %1993 = vmax.xlane.f32.xlu0 %v5759_v20 }
 0x7e9   : > { %1995 = vmax.xlane.f32.xlu1 %v5765_v2  ;;  %v5773_v62 = vpop.f32.mrf.mxu1 }
 0x7eb   : > { %v5775_v45 = vpop.f32.mrf.mxu1 }
 0x7ec   : > { %2005 = vmax.xlane.f32.xlu0 %v5768_v48 }
 0x7ed   : > { %2007 = vmax.xlane.f32.xlu1 %v5775_v45  ;;  %v5780_v5 = vpop.f32.mrf.mxu1 }
 0x7ef   : > { %4243 = vmatpush3.bf16.xpose.msra.mxu1 %v2386_v23  ;;  %v5785_v6 = vpop.f32.mrf.mxu1 }
 0x7f0   : > { %4452 = vmatprep.subr.msk.bf16.mxu1 %vm596_vm2, %v1787_v35  ;;  %2001 = vmax.xlane.f32.xlu0 %v5773_v62 }
 0x7f1   : > { %2003 = vmax.xlane.f32.xlu1 %v5780_v5  ;;  %v5789_v31 = vpop.f32.mrf.mxu1 }
 0x7f3   : > { %v5806_v57 = vpop.f32.mrf.mxu1 }
 0x7f4   : > { %2013 = vmax.xlane.f32.xlu0 %v5785_v6 }
 0x7f5   : > { %v5809_v63 = vpop.f32.mrf.mxu1 }
 0x7f7   : > { %4245 = vmatpush3.bf16.xpose.msra.mxu1 %v2383_v39 }
 0x7f8   : > { %4453 = vmatprep.subr.msk.bf16.mxu1 %vm596_vm2, %v1786_v29  ;;  %2009 = vmax.xlane.f32.xlu0 %v5789_v31 }
 0x7ff   : > { %4247 = vmatpush3.bf16.xpose.msra.mxu1 %v2380_v4 }
 0x800   : > { %4454 = vmatprep.subr.msk.bf16.mxu1 %vm596_vm2, %v5736_v33 }
 0x802   : > { %2151 = vrot.lane.b32.xlu1 %v5521_v1, %s4869_s21 }
 0x807   : > { %4249 = vmatpush3.bf16.xpose.msra.mxu1 %v2377_v43 }
 0x808   : > { %4455 = vmatprep.subr.msk.bf16.mxu1 %vm596_vm2, %v5738_v14  ;;  %v5817_v14 = vld [vmem:[%s6593_s11] sm:$0xff]  }
 0x809   : > { %4252 = vmatprep.mubr.msk.bf16.mxu1 %vm596_vm2, %v5817_v14 }
 0x80e   : > { %2153 = vrot.lane.b32.xlu0 %v5513_v3, %s4869_s21 }
 0x80f   : > { %4251 = vmatpush3.bf16.xpose.msra.mxu1 %v2374_v60 }
 0x816   : > { %4253 = vmatmul.mubr.msk.bf16.vlgmr.msra.gmra.mxu1 %vm596_vm2, %v5823_v13 }
 0x826   : > { %2015 = vmax.xlane.f32.xlu1 %v5806_v57 }
 0x82a   : > { %2011 = vmax.xlane.f32.xlu1 %v5809_v63 }
 0x83b   : > { %2149 = vrot.lane.b32.xlu1 %v5526_v50, %s4869_s21 }
 0x861   : > { %v1990_v33 = vpop.xlane.xlu0 %1989 }
 0x862   : > { %v2019_v30 = vsub.f32 %v5742_v0, %v1990_v33 }
 0x864   : > { %v2037_v46 = vmul.f32 1.442695, %v2019_v30 }
 0x865   : > { %v1986_v7 = vpop.xlane.xlu0 %1985 }
 0x866   : > { %4611 = vpow2.f32 %v2037_v46  ;;  %v2017_v12 = vsub.f32 %v5746_v11, %v1986_v7 }
 0x867   : > { %v1988_v47 = vpop.xlane.xlu1 %1987 }
 0x868   : > { %v2033_v36 = vmul.f32 1.442695, %v2017_v12  ;;  %v2018_v58 = vsub.f32 %v5751_v61, %v1988_v47 }
 0x869   : > { %v1992_v8 = vpop.xlane.xlu0 %1991 }
 0x86a   : > { %4613 = vpow2.f32 %v2033_v36  ;;  %v2020_v32 = vsub.f32 %v5748_v37, %v1992_v8  ;;  %v2035_v0 = vmul.f32 1.442695, %v2018_v58 }
 0x86c   : > { %v2039_v25 = vmul.f32 1.442695, %v2020_v32 }
 0x86d   : > { %v1998_v9 = vpop.xlane.xlu0 %1997  ;;  %v2000_v59 = vpop.xlane.xlu1 %1999 }
 0x86e   : > { %4615 = vpow2.f32 %v2039_v25  ;;  %v2023_v26 = vsub.f32 %v5755_v38, %v1998_v9  ;;  %v2024_v11 = vsub.f32 %v5761_v19, %v2000_v59 }
 0x86f   : > { %4617 = vpow2.f32 %v2035_v0 }
 0x870   : > { %v2045_v28 = vmul.f32 1.442695, %v2023_v26  ;;  %v2047_v60 = vmul.f32 1.442695, %v2024_v11 }
 0x871   : > { %v1994_v35 = vpop.xlane.xlu0 %1993 }
 0x872   : > { %4619 = vpow2.f32 %v2045_v28  ;;  %v2021_v23 = vsub.f32 %v5759_v20, %v1994_v35  ;;  %v1996_v61 = vpop.xlane.xlu1 %1995 }
 0x873   : > { %v5835_v39 = vpop.eup %4611  ;;  %v2022_v37 = vsub.f32 %v5765_v2, %v1996_v61 }
 0x874   : > { %v2041_v29 = vmul.f32 1.442695, %v2021_v23  ;;  %2069 = vadd.xlane.f32.xlu1 %v5835_v39 }
 0x875   : > { %v2043_v4 = vmul.f32 1.442695, %v2022_v37  ;;  %v2006_v43 = vpop.xlane.xlu0 %2005 }
 0x876   : > { %4621 = vpow2.f32 %v2041_v29  ;;  %v2027_v38 = vsub.f32 %v5768_v48, %v2006_v43  ;;  %v2008_v33 = vpop.xlane.xlu1 %2007 }
 0x877   : > { %v5840_v30 = vpop.eup %4613  ;;  %4623 = vpow2.f32 %v2043_v4  ;;  %v2028_v19 = vsub.f32 %v5775_v45, %v2008_v33 }
 0x878   : > { %2065 = vadd.xlane.f32.xlu1 %v5840_v30  ;;  %v2053_v20 = vmul.f32 1.442695, %v2027_v38  ;;  %4625 = vpow2.f32 %v2047_v60 }
 0x879   : > { %v2002_v46 = vpop.xlane.xlu0 %2001  ;;  %v2055_v48 = vmul.f32 1.442695, %v2028_v19 }
 0x87a   : > { %v2025_v2 = vsub.f32 %v5773_v62, %v2002_v46  ;;  %v2004_v7 = vpop.xlane.xlu1 %2003  ;;  %4627 = vpow2.f32 %v2053_v20 }
 0x87b   : > { %v5845_v12 = vpop.eup %4615  ;;  %v2026_v36 = vsub.f32 %v5780_v5, %v2004_v7 }
 0x87c   : > { %v2049_v47 = vmul.f32 1.442695, %v2025_v2  ;;  %2071 = vadd.xlane.f32.xlu1 %v5845_v12  ;;  %v5849_v8 = vpop.eup %4617 }
 0x87d   : > { %v2014_v58 = vpop.xlane.xlu0 %2013  ;;  %v2051_v62 = vmul.f32 1.442695, %v2026_v36 }
 0x87e   : > { %4629 = vpow2.f32 %v2049_v47  ;;  %v2031_v45 = vsub.f32 %v5785_v6, %v2014_v58  ;;  %v2152_v35 = vpop.permute.xlu1 %2151 }
 0x87f   : > { %v5852_v32 = vpop.eup %4619  ;;  %4631 = vpow2.f32 %v2055_v48 }
 0x880   : > { %v2061_v25 = vmul.f32 1.442695, %v2031_v45  ;;  %2077 = vadd.xlane.f32.xlu0 %v5852_v32  ;;  %2067 = vadd.xlane.f32.xlu1 %v5849_v8 }
 0x881   : > { %v2010_v0 = vpop.xlane.xlu0 %2009 }
 0x882   : > { %4633 = vpow2.f32 %v2061_v25  ;;  %v2029_v9 = vsub.f32 %v5789_v31, %v2010_v0 }
 0x883   : > { %v5857_v5 = vpop.eup %4621  ;;  %4635 = vpow2.f32 %v2051_v62 }
 0x884   : > { %v5859_v59 = vpop.eup %4623  ;;  %v2057_v26 = vmul.f32 1.442695, %v2029_v9  ;;  %2073 = vadd.xlane.f32.xlu0 %v5857_v5 }
 0x885   : > { %2075 = vadd.xlane.f32.xlu1 %v5859_v59  ;;  %v2154_v6 = vpop.permute.xlu0 %2153  ;;  %v5863_v28 = vpop.eup %4625 }
 0x886   : > { %4637 = vpow2.f32 %v2057_v26  ;;  %4190 = vmatprep.subr.bf16.mxu0 %v2154_v6 }
 0x887   : > { %4191 = vmatpush3.bf16.msra.mxu0 %v2154_v6  ;;  %v5866_v31 = vpop.eup %4627 }
 0x888   : > { %2079 = vadd.xlane.f32.xlu0 %v5863_v28  ;;  %4192 = vmatprep.subr.bf16.mxu0 %v2152_v35 }
 0x88b   : > { %v5868_v11 = vpop.eup %4629  ;;  %4193 = vmatpush3.bf16.msra.mxu0 %v2152_v35 }
 0x88c   : > { %2085 = vadd.xlane.f32.xlu0 %v5866_v31  ;;  %2081 = vadd.xlane.f32.xlu1 %v5868_v11  ;;  %v5872_v23 = vpop.eup %4631 }
 0x88f   : > { %v5874_v61 = vpop.eup %4633 }
 0x890   : > { %2093 = vadd.xlane.f32.xlu1 %v5874_v61  ;;  %2087 = vadd.xlane.f32.xlu0 %v5872_v23  ;;  %v5878_v37 = vpop.eup %4635 }
 0x893   : > { %v5880_v29 = vpop.eup %4637 }
 0x894   : > { %2089 = vadd.xlane.f32.xlu1 %v5880_v29  ;;  %2083 = vadd.xlane.f32.xlu0 %v5878_v37 }
 0x8a5   : > { %2145 = vrot.lane.b32.xlu1 %v5541_v22, %s4869_s21 }
 0x8a9   : > { %2476 = vrot.lane.b32.xlu1 %v5437_v41, %s4870_s20 }
 0x8aa   : > { %2147 = vrot.lane.b32.xlu0 %v5535_v53, %s4869_s21 }
 0x8ad   : > { %2286 = vrot.lane.b32.xlu1 %v5823_v13, %s4869_s21 }
 0x8af   : > { %v2016_v4 = vpop.xlane.xlu1 %2015 }
 0x8b0   : > { %v2032_v38 = vsub.f32 %v5806_v57, %v2016_v4 }
 0x8b1   : > { %2474 = vrot.lane.b32.xlu1 %v5445_v49, %s4870_s20 }
 0x8b2   : > { %v2063_v13 = vmul.f32 1.442695, %v2032_v38 }
 0x8b3   : > { %v2012_v43 = vpop.xlane.xlu1 %2011 }
 0x8b4   : > { %v2030_v60 = vsub.f32 %v5809_v63, %v2012_v43 }
 0x8b5   : > { %2470 = vrot.lane.b32.xlu1 %v5473_v15, %s4870_s20 }
 0x8b6   : > { %v2059_v33 = vmul.f32 1.442695, %v2030_v60 }
 0x8b7   : > { %v2150_v20 = vpop.permute.xlu1 %2149 }
 0x8b8   : > { %4194 = vmatprep.subr.bf16.mxu0 %v2150_v20  ;;  %4639 = vpow2.f32 %v2059_v33 }
 0x8b9   : > { %4195 = vmatpush3.bf16.msra.mxu0 %v2150_v20  ;;  %2466 = vrot.lane.b32.xlu1 %v5498_v34, %s4870_s20  ;;  %4641 = vpow2.f32 %v2063_v13 }
 0x8bd   : > { %2462 = vrot.lane.b32.xlu1 %v5403_v56, %s4870_s20 }
 0x8c1   : > { %2448 = vrot.lane.b32.xlu1 %v5393_v52, %s4870_s20 }
 0x8c5   : > { %2452 = vrot.lane.b32.xlu1 %v5416_v42, %s4870_s20  ;;  %v5906_v57 = vpop.eup %4639 }
 0x8c6   : > { %v5911_v63 = vpop.eup %4641 }
 0x8c9   : > { %2456 = vrot.lane.b32.xlu1 %v5424_v44, %s4870_s20  ;;  %2091 = vadd.xlane.f32.xlu0 %v5906_v57 }
 0x8cd   : > { %2460 = vrot.lane.b32.xlu1 %v5435_v21, %s4870_s20  ;;  %2095 = vadd.xlane.f32.xlu0 %v5911_v63 }
 0x8d1   : > { %3019 = vrot.lane.b32.xlu1 %v5445_v49, %s4871_s22 }
 0x8d5   : > { %3017 = vrot.lane.b32.xlu1 %v5465_v16, %s4871_s22 }
 0x8d9   : > { %3013 = vrot.lane.b32.xlu1 %v5483_v10, %s4871_s22 }
 0x8dd   : > { %3009 = vrot.lane.b32.xlu1 %v5395_v17, %s4871_s22 }
 0x8e1   : > { %3007 = vrot.lane.b32.xlu1 %v5403_v56, %s4871_s22 }
 0x8e3   : > { %2284 = vrot.lane.b32.xlu0 %v5817_v14, %s4869_s21  ;;  %s446_s21 = sand.u32 1, %s4857_s26  }
 0x8e4   : > { %s3664_s23 = sshll.u32 %s446_s21, 5 }
 0x8e5   : > { %2991 = vrot.lane.b32.xlu1 %v5401_v55, %s4871_s22  ;;  %s448_s15 = scalar_lea.vmem [#allocation2], %s3664_s23  ;;  %s4873_s23 = smov [#allocation2]  }
 0x8e6   : > { %s3586_s24 = sshll.u32 %s448_s15, 4  ;;  %s6533_s24 = int_to_ptr.vmem [resolvable:$true] %s3586_s24 }
 0x8e7   : > { %2472 = vrot.lane.b32.xlu0 %v5465_v16, %s4870_s20  ;;  %s4805_s29 = scalar_lea.vmem %s6533_s24, 512 }
 0x8e8   : > { %p4806_p11 = scmp.ne.s32.totalorder %s6533_s24, %s4805_s29 }
 0x8e9   : > { %2993 = vrot.lane.b32.xlu1 %v5393_v52, %s4871_s22 }
 0x8ea   : > { %p4807_p12 = pnand %p4806_p11, %p4984_p5 }
 0x8eb   : > { %2468 = vrot.lane.b32.xlu0 %v5483_v10, %s4870_s20 }
 0x8ec   : > { %p4808_p13 = pneg %p4807_p12 }
 0x8ed   : > { %2995 = vrot.lane.b32.xlu1 %v5419_v40, %s4871_s22 }
 0x8ef   : > { %2464 = vrot.lane.b32.xlu0 %v5395_v17, %s4870_s20 }
 0x8f1   : > { %2997 = vrot.lane.b32.xlu1 %v5416_v42, %s4871_s22 }
 0x8f3   : > { %2446 = vrot.lane.b32.xlu0 %v5401_v55, %s4870_s20 }
 0x8f5   : > { %3001 = vrot.lane.b32.xlu1 %v5424_v44, %s4871_s22 }
 0x8f7   : > { %2450 = vrot.lane.b32.xlu0 %v5419_v40, %s4870_s20 }
 0x8f9   : > { %3005 = vrot.lane.b32.xlu1 %v5435_v21, %s4871_s22 }
 0x8fb   : > { %2454 = vrot.lane.b32.xlu0 %v5427_v51, %s4870_s20 }
 0x8fd   : > { %2787 = vrot.lane.b32.xlu1 %v5500_v18, %s4870_s20  ;;  %v2070_v52 = vpop.xlane.xlu1 %2069 }
 0x8ff   : > { %2458 = vrot.lane.b32.xlu0 %v5443_v27, %s4870_s20 }
 0x901   : > { %2783 = vrot.lane.b32.xlu1 %v5513_v3, %s4870_s20  ;;  %v2066_v17 = vpop.xlane.xlu1 %2065 }
 0x902   : > { %4643 = vrcp.f32 %v2066_v17 }
 0x903   : > { %3021 = vrot.lane.b32.xlu0 %v5437_v41, %s4871_s22 }
 0x905   : > { %v2072_v55 = vpop.xlane.xlu1 %2071 }
 0x907   : > { %3015 = vrot.lane.b32.xlu0 %v5473_v15, %s4871_s22 }
 0x909   : > { %v2078_v56 = vpop.xlane.xlu0 %2077  ;;  %v2068_v42 = vpop.xlane.xlu1 %2067 }
 0x90a   : > { %4645 = vrcp.f32 %v2068_v42 }
 0x90b   : > { %3011 = vrot.lane.b32.xlu0 %v5498_v34, %s4871_s22  ;;  %4647 = vrcp.f32 %v2072_v55 }
 0x90d   : > { %v2074_v40 = vpop.xlane.xlu0 %2073 }
 0x90e   : > { %v2076_v44 = vpop.xlane.xlu1 %2075  ;;  %4649 = vrcp.f32 %v2074_v40 }
 0x90f   : > { %2999 = vrot.lane.b32.xlu0 %v5427_v51, %s4871_s22  ;;  %4651 = vrcp.f32 %v2076_v44  ;;  %v4644_v16 = vpop.eup %4643 }
 0x910   : > { %4653 = vrcp.f32 %v2070_v52  ;;  %v2113_v51 = vmul.f32 %v4644_v16, %v5840_v30 }
 0x911   : > { %v2080_v21 = vpop.xlane.xlu0 %2079 }
 0x912   : > { %4655 = vrcp.f32 %v2080_v21 }
 0x913   : > { %3003 = vrot.lane.b32.xlu0 %v5443_v27, %s4871_s22  ;;  %4657 = vrcp.f32 %v2078_v56 }
 0x915   : > { %v2086_v41 = vpop.xlane.xlu0 %2085  ;;  %v2082_v49 = vpop.xlane.xlu1 %2081 }
 0x917   : > { %2789 = vrot.lane.b32.xlu0 %v5496_v54, %s4870_s20  ;;  %v4646_v15 = vpop.eup %4645 }
 0x918   : > { %v2114_v14 = vmul.f32 %v4646_v15, %v5849_v8  ;;  %v4648_v2 = vpop.eup %4647 }
 0x919   : > { %v2088_v10 = vpop.xlane.xlu0 %2087  ;;  %v5970_v34 = vpop.xlane.xlu1 %2093  ;;  %v2116_v58 = vmul.f32 %v4648_v2, %v5845_v12 }
 0x91a   : > { %v2129_v27 = vpack.c.bf16 %v2114_v14, %v2113_v51 }
 0x91b   : > { %2785 = vrot.lane.b32.xlu0 %v5509_v24, %s4870_s20  ;;  %v4650_v7 = vpop.eup %4649 }
 0x91c   : > { %4200 = vmatprep.mubr.bf16.mxu0 %v2129_v27  ;;  %v4652_v36 = vpop.eup %4651  ;;  %v2117_v45 = vmul.f32 %v4650_v7, %v5857_v5 }
 0x91d   : > { %v2084_v19 = vpop.xlane.xlu0 %2083  ;;  %v2090_v46 = vpop.xlane.xlu1 %2089  ;;  %v2118_v25 = vmul.f32 %v4652_v36, %v5859_v59 }
 0x91e   : > { %4659 = vrcp.f32 %v2084_v19  ;;  %v4654_v30 = vpop.eup %4653 }
 0x91f   : > { %4661 = vrcp.f32 %v2082_v49  ;;  %v2115_v62 = vmul.f32 %v4654_v30, %v5835_v39  ;;  %v4656_v9 = vpop.eup %4655  ;;  %v2131_v6 = vpack.c.bf16 %v2118_v25, %v2117_v45 }
 0x920   : > { %4663 = vrcp.f32 %v2088_v10  ;;  %v4658_v35 = vpop.eup %4657  ;;  %v2120_v43 = vmul.f32 %v4656_v9, %v5863_v28 }
 0x921   : > { %v2148_v47 = vpop.permute.xlu0 %2147  ;;  %v2146_v48 = vpop.permute.xlu1 %2145  ;;  %4665 = vrcp.f32 %v2086_v41  ;;  %v2130_v0 = vpack.c.bf16 %v2116_v58, %v2115_v62  ;;  %v2119_v59 = vmul.f32 %v4658_v35, %v5852_v32 }
 0x922   : > { %4196 = vmatprep.subr.bf16.mxu0 %v2148_v47  ;;  %4667 = vrcp.f32 %v2090_v46 }
 0x923   : > { %4197 = vmatpush3.bf16.msra.mxu0 %v2148_v47  ;;  %v2132_v38 = vpack.c.bf16 %v2120_v43, %v2119_v59 }
 0x924   : > { %4198 = vmatprep.subr.bf16.mxu0 %v2146_v48 }
 0x925   : > { %v5977_v8 = vpop.permute.xlu1 %2476 }
 0x927   : > { %4199 = vmatpush3.bf16.msra.mxu0 %v2146_v48 }
 0x929   : > { %v5982_v26 = vpop.permute.xlu1 %2286 }
 0x92a   : > { %4201 = vmatmul.mubr.bf16.vlgmr.msra.gmra.mxu0 %v2130_v0 }
 0x92b   : > { %v4660_v4 = vpop.eup %4659  ;;  %4204 = vmatprep.mubr.bf16.mxu0 %v2131_v6 }
 0x92c   : > { %v4662_v12 = vpop.eup %4661  ;;  %v2122_v5 = vmul.f32 %v4660_v4, %v5878_v37 }
 0x92d   : > { %v5985_v60 = vpop.permute.xlu1 %2474  ;;  %v2121_v39 = vmul.f32 %v4662_v12, %v5868_v11  ;;  %v4664_v33 = vpop.eup %4663 }
 0x92e   : > { %v4666_v52 = vpop.eup %4665  ;;  %v2124_v17 = vmul.f32 %v4664_v33, %v5872_v23 }
 0x92f   : > { %v2133_v13 = vpack.c.bf16 %v2122_v5, %v2121_v39  ;;  %v2123_v28 = vmul.f32 %v4666_v52, %v5866_v31  ;;  %v4668_v16 = vpop.eup %4667 }
 0x930   : > { %v2125_v14 = vmul.f32 %v4668_v16, %v5880_v29 }
 0x931   : > { %v5990_v20 = vpop.permute.xlu1 %2470  ;;  %v2134_v56 = vpack.c.bf16 %v2124_v17, %v2123_v28 }
 0x932   : > { %4205 = vmatmul.mubr.bf16.gmra.mxu0 %v2132_v38 }
 0x933   : > { %4208 = vmatprep.mubr.bf16.mxu0 %v2133_v13 }
 0x935   : > { %v5993_v55 = vpop.permute.xlu1 %2466 }
 0x939   : > { %v5996_v37 = vpop.permute.xlu1 %2462 }
 0x93a   : > { %4209 = vmatmul.mubr.bf16.gmra.mxu0 %v2134_v56 }
 0x93d   : > { %v5998_v32 = vpop.permute.xlu1 %2448 }
 0x941   : > { %v6000_v11 = vpop.permute.xlu1 %2452 }
 0x945   : > { %v6002_v42 = vpop.permute.xlu1 %2456 }
 0x949   : > { %v6004_v40 = vpop.permute.xlu1 %2460 }
 0x94d   : > { %v6006_v44 = vpop.permute.xlu1 %3019 }
 0x951   : > { %v6008_v21 = vpop.permute.xlu1 %3017 }
 0x952   : > { %v2092_v23 = vpop.xlane.xlu0 %2091 }
 0x953   : > { %4669 = vrcp.f32 %v2092_v23 }
 0x954   : > { %4671 = vrcp.f32 %v5970_v34 }
 0x955   : > { %v6011_v41 = vpop.permute.xlu1 %3013 }
 0x956   : > { %v2096_v31 = vpop.xlane.xlu0 %2095 }
 0x957   : > { %4673 = vrcp.f32 %v2096_v31 }
 0x959   : > { %v6015_v51 = vpop.permute.xlu1 %3009 }
 0x95a   : > { %v2285_v49 = vpop.permute.xlu0 %2284 }
 0x95d   : > { %v6023_v48 = vpop.permute.xlu1 %3007 }
 0x95e   : > { %v6013_v15 = vpop.permute.xlu0 %2472 }
 0x960   : > { %v4670_v10 = vpop.eup %4669 }
 0x961   : > { %v2126_v27 = vmul.f32 %v4670_v10, %v5906_v57  ;;  %v4672_v19 = vpop.eup %4671  ;;  %v6030_v29 = vpop.permute.xlu1 %2991 }
 0x962   : > { %v6019_v46 = vpop.permute.xlu0 %2468  ;;  %v2127_v7 = vmul.f32 %v4672_v19, %v5874_v61 }
 0x963   : > { %v2135_v2 = vpack.c.bf16 %v2126_v27, %v2125_v14 }
 0x964   : > { %v4674_v34 = vpop.eup %4673 }
 0x965   : > { %4212 = vmatprep.mubr.bf16.mxu0 %v2135_v2  ;;  %v2128_v47 = vmul.f32 %v4674_v34, %v5911_v63  ;;  %v6034_v45 = vpop.permute.xlu1 %2993 }
 0x966   : > { %v6025_v36 = vpop.permute.xlu0 %2464 }
 0x967   : > { %v2136_v30 = vpack.c.bf16 %v2128_v47, %v2127_v7 }
 0x969   : > { %4213 = vmatmul.mubr.bf16.gmra.mxu0 %v2136_v30  ;;  %v6040_v63 = vpop.permute.xlu1 %2995 }
 0x96a   : > { %v6027_v58 = vpop.permute.xlu0 %2446  ;;  %4232 = vmatprep.mubr.msk.bf16.mxu0 %vm596_vm2, %v2285_v49 }
 0x96d   : > { %v6044_v0 = vpop.permute.xlu1 %2997 }
 0x96e   : > { %v6032_v57 = vpop.permute.xlu0 %2450 }
 0x971   : > { %v6050_v35 = vpop.permute.xlu1 %3001 }
 0x972   : > { %v6036_v25 = vpop.permute.xlu0 %2454 }
 0x975   : > { %v6054_v12 = vpop.permute.xlu1 %3005 }
 0x976   : > { %v6038_v61 = vpop.permute.xlu0 %2458 }
 0x979   : > { %v2788_v59 = vpop.permute.xlu1 %2787 }
 0x97a   : > { %v6042_v62 = vpop.permute.xlu0 %3021 }
 0x97d   : > { %v2784_v38 = vpop.permute.xlu1 %2783 }
 0x97e   : > { %v6046_v9 = vpop.permute.xlu0 %3015 }
 0x982   : > { %v6048_v6 = vpop.permute.xlu0 %3011 }
 0x986   : > { %v6052_v4 = vpop.permute.xlu0 %2999 }
 0x98a   : > { %v6056_v43 = vpop.permute.xlu0 %3003 }
 0x98e   : > { %v2790_v5 = vpop.permute.xlu0 %2789 }
 0x98f   : > { %4288 = vmatprep.subr.bf16.mxu1 %v2790_v5 }
 0x990   : > { %4289 = vmatpush3.bf16.msra.mxu1 %v2790_v5 }
 0x991   : > { %4290 = vmatprep.subr.bf16.mxu1 %v2788_v59 }
 0x992   : > { %v2786_v39 = vpop.permute.xlu0 %2785 }
 0x994   : > { %4291 = vmatpush3.bf16.msra.mxu1 %v2788_v59 }
 0x995   : > { %4292 = vmatprep.subr.bf16.mxu1 %v2786_v39 }
 0x998   : > { %4293 = vmatpush3.bf16.msra.mxu1 %v2786_v39 }
 0x999   : > { %4294 = vmatprep.subr.bf16.mxu1 %v2784_v38 }
 0x99c   : > { %4295 = vmatpush3.bf16.msra.mxu1 %v2784_v38 }
 0x9ea   : > { %v4202_v33 = vpop.f32.mrf.mxu0 }
 0x9ec   : > { %v2203_v13 = vpop.f32.mrf.mxu0 }
 0x9ee   : > { %v4203_v52 = vpop.f32.mrf.mxu0 }
 0x9ef   : > { %v2267_v17 = vpack.c.bf16 %v4203_v52, %v4202_v33 }
 0x9f0   : > { %v2206_v28 = vpop.f32.mrf.mxu0 }
 0x9f1   : > { %v2266_v56 = vpack.c.bf16 %v2206_v28, %v2203_v13 }
 0x9f2   : > { %v4206_v23 = vpop.f32.mrf.mxu0 }
 0x9f4   : > { %v2219_v31 = vpop.f32.mrf.mxu0 }
 0x9f6   : > { %v4207_v49 = vpop.f32.mrf.mxu0 }
 0x9f7   : > { %v2269_v52 = vpack.c.bf16 %v4207_v49, %v4206_v23  ;;  %v2295_v23 = vsel %vm596_vm2, %v2266_v56, 0 }
 0x9f8   : > { %v2222_v16 = vpop.f32.mrf.mxu0 }
 0x9fa   : > { %v4210_v10 = vpop.f32.mrf.mxu0 }
 0x9fc   : > { %v2235_v14 = vpop.f32.mrf.mxu0 }
 0x9fe   : > { %v4211_v27 = vpop.f32.mrf.mxu0 }
 0x9ff   : > { %v2271_v39 = vpack.c.bf16 %v4211_v27, %v4210_v10  ;;  %v2268_v10 = vpack.c.bf16 %v2222_v16, %v2219_v31  ;;  %v2524_v31 = vsel %vm596_vm2, %v5977_v8, 0 }
 0xa00   : > { %v2238_v19 = vpop.f32.mrf.mxu0 }
 0xa01   : > { %v2310_v33 = vsel %vm596_vm2, %v2271_v39, 0  ;;  %v2270_v13 = vpack.c.bf16 %v2238_v19, %v2235_v14  ;;  %v2301_v27 = vsel %vm596_vm2, %v2268_v10, 0  ;;  %v2298_v14 = vsel %vm596_vm2, %v2267_v17, 0 }
 0xa03   : > { %v2307_v28 = vsel %vm596_vm2, %v2270_v13, 0 }
 0xa29   : > { %v4214_v2 = vpop.f32.mrf.mxu0 }
 0xa2b   : > { %v2251_v34 = vpop.f32.mrf.mxu0 }
 0xa2d   : > { %v4215_v7 = vpop.f32.mrf.mxu0 }
 0xa2e   : > { %v2273_v47 = vpack.c.bf16 %v4215_v7, %v4214_v2  ;;  %v2304_v2 = vsel %vm596_vm2, %v2269_v52, 0 }
 0xa2f   : > { %v2254_v30 = vpop.f32.mrf.mxu0 }
 0xa30   : > { %v2316_v5 = vsel %vm596_vm2, %v2273_v47, 0  ;;  %v2272_v59 = vpack.c.bf16 %v2254_v30, %v2251_v34  ;;  %4440 = vmatprep.subr.msk.bf16.mxu0 %vm596_vm2, %v2273_v47 }
 0xa31   : > { %4217 = vmatpush3.bf16.xpose.msra.mxu0 %v2316_v5 }
 0xa32   : > { %4441 = vmatprep.subr.msk.bf16.mxu0 %vm596_vm2, %v2272_v59  ;;  %v2313_v38 = vsel %vm596_vm2, %v2272_v59, 0 }
 0xa39   : > { %4219 = vmatpush3.bf16.xpose.msra.mxu0 %v2313_v38 }
 0xa3a   : > { %4442 = vmatprep.subr.msk.bf16.mxu0 %vm596_vm2, %v2271_v39 }
 0xa41   : > { %4221 = vmatpush3.bf16.xpose.msra.mxu0 %v2310_v33 }
 0xa42   : > { %4443 = vmatprep.subr.msk.bf16.mxu0 %vm596_vm2, %v2270_v13 }
 0xa49   : > { %4223 = vmatpush3.bf16.xpose.msra.mxu0 %v2307_v28 }
 0xa4a   : > { %4444 = vmatprep.subr.msk.bf16.mxu0 %vm596_vm2, %v2269_v52 }
 0xa51   : > { %4225 = vmatpush3.bf16.xpose.msra.mxu0 %v2304_v2 }
 0xa52   : > { %4445 = vmatprep.subr.msk.bf16.mxu0 %vm596_vm2, %v2268_v10 }
 0xa59   : > { %4227 = vmatpush3.bf16.xpose.msra.mxu0 %v2301_v27 }
 0xa5a   : > { %4446 = vmatprep.subr.msk.bf16.mxu0 %vm596_vm2, %v2267_v17  ;;  %v2521_v17 = vsel %vm596_vm2, %v5985_v60, 0 }
 0xa61   : > { %4229 = vmatpush3.bf16.xpose.msra.mxu0 %v2298_v14 }
 0xa62   : > { %4447 = vmatprep.subr.msk.bf16.mxu0 %vm596_vm2, %v2266_v56 }
 0xa69   : > { %4231 = vmatpush3.bf16.xpose.msra.mxu0 %v2295_v23 }
 0xa6a   : > { %4456 = vmatprep.subr.msk.bf16.mxu0 %vm596_vm2, %v5977_v8  ;;  %v2515_v8 = vsel %vm596_vm2, %v5990_v20, 0 }
 0xa70   : > { %4233 = vmatmul.mubr.msk.bf16.vlgmr.msra.gmra.mxu0 %vm596_vm2, %v5982_v26  ;;  %v2518_v26 = vsel %vm596_vm2, %v6013_v15, 0 }
 0xa71   : > { %4257 = vmatpush3.bf16.xpose.msra.mxu0 %v2524_v31  ;;  %4272 = vmatprep.mubr.msk.bf16.mxu0 %vm596_vm2, %v6027_v58 }
 0xa72   : > { %4457 = vmatprep.subr.msk.bf16.mxu0 %vm596_vm2, %v5985_v60  ;;  %v2512_v60 = vsel %vm596_vm2, %v6019_v46, 0 }
 0xa79   : > { %4259 = vmatpush3.bf16.xpose.msra.mxu0 %v2521_v17 }
 0xa7a   : > { %4458 = vmatprep.subr.msk.bf16.mxu0 %vm596_vm2, %v6013_v15  ;;  %v2509_v15 = vsel %vm596_vm2, %v5993_v55, 0 }
 0xa81   : > { %4261 = vmatpush3.bf16.xpose.msra.mxu0 %v2518_v26 }
 0xa82   : > { %4459 = vmatprep.subr.msk.bf16.mxu0 %vm596_vm2, %v5990_v20  ;;  %v2506_v20 = vsel %vm596_vm2, %v6025_v36, 0 }
 0xa89   : > { %4263 = vmatpush3.bf16.xpose.msra.mxu0 %v2515_v8 }
 0xa8a   : > { %4460 = vmatprep.subr.msk.bf16.mxu0 %vm596_vm2, %v6019_v46  ;;  %v2503_v46 = vsel %vm596_vm2, %v5996_v37, 0 }
 0xa91   : > { %4265 = vmatpush3.bf16.xpose.msra.mxu0 %v2512_v60 }
 0xa92   : > { %4461 = vmatprep.subr.msk.bf16.mxu0 %vm596_vm2, %v5993_v55  ;;  %v3069_v55 = vsel %vm596_vm2, %v6042_v62, 0 }
 0xa99   : > { %4267 = vmatpush3.bf16.xpose.msra.mxu0 %v2509_v15 }
 0xa9a   : > { %4462 = vmatprep.subr.msk.bf16.mxu0 %vm596_vm2, %v6025_v36 }
 0xaa1   : > { %4269 = vmatpush3.bf16.xpose.msra.mxu0 %v2506_v20 }
 0xaa2   : > { %4463 = vmatprep.subr.msk.bf16.mxu0 %vm596_vm2, %v5996_v37  ;;  %v3066_v37 = vsel %vm596_vm2, %v6006_v44, 0 }
 0xaa9   : > { %4271 = vmatpush3.bf16.xpose.msra.mxu0 %v2503_v46 }
 0xaaa   : > { %4472 = vmatprep.subr.msk.bf16.mxu0 %vm596_vm2, %v6042_v62 }
 0xab0   : > { %4273 = vmatmul.mubr.msk.bf16.vlgmr.msra.gmra.mxu0 %vm596_vm2, %v5998_v32  ;;  %v3063_v32 = vsel %vm596_vm2, %v6008_v21, 0 }
 0xab1   : > { %4276 = vmatprep.mubr.msk.bf16.mxu0 %vm596_vm2, %v6032_v57  ;;  %4341 = vmatpush3.bf16.xpose.msra.mxu0 %v3069_v55 }
 0xab2   : > { %4473 = vmatprep.subr.msk.bf16.mxu0 %vm596_vm2, %v6006_v44  ;;  %v3051_v44 = vsel %vm596_vm2, %v6015_v51, 0 }
 0xab8   : > { %4277 = vmatmul.mubr.msk.bf16.gmra.mxu0 %vm596_vm2, %v6000_v11  ;;  %v3060_v11 = vsel %vm596_vm2, %v6046_v9, 0 }
 0xab9   : > { %4280 = vmatprep.mubr.msk.bf16.mxu0 %vm596_vm2, %v6036_v25  ;;  %4343 = vmatpush3.bf16.xpose.msra.mxu0 %v3066_v37 }
 0xaba   : > { %4474 = vmatprep.subr.msk.bf16.mxu0 %vm596_vm2, %v6008_v21  ;;  %v3048_v21 = vsel %vm596_vm2, %v6023_v48, 0 }
 0xac0   : > { %4281 = vmatmul.mubr.msk.bf16.gmra.mxu0 %vm596_vm2, %v6002_v42  ;;  %v3057_v42 = vsel %vm596_vm2, %v6011_v41, 0 }
 0xac1   : > { %4284 = vmatprep.mubr.msk.bf16.mxu0 %vm596_vm2, %v6038_v61  ;;  %4345 = vmatpush3.bf16.xpose.msra.mxu0 %v3063_v32 }
 0xac2   : > { %4475 = vmatprep.subr.msk.bf16.mxu0 %vm596_vm2, %v6046_v9 }
 0xac8   : > { %4285 = vmatmul.mubr.msk.bf16.gmra.mxu0 %vm596_vm2, %v6004_v40  ;;  %v3054_v40 = vsel %vm596_vm2, %v6048_v6, 0 }
 0xac9   : > { %4347 = vmatpush3.bf16.xpose.msra.mxu0 %v3060_v11  ;;  %4356 = vmatprep.mubr.msk.bf16.mxu0 %vm596_vm2, %v6030_v29 }
 0xaca   : > { %4476 = vmatprep.subr.msk.bf16.mxu0 %vm596_vm2, %v6011_v41 }
 0xad1   : > { %4349 = vmatpush3.bf16.xpose.msra.mxu0 %v3057_v42 }
 0xad2   : > { %4477 = vmatprep.subr.msk.bf16.mxu0 %vm596_vm2, %v6048_v6 }
 0xad9   : > { %4351 = vmatpush3.bf16.xpose.msra.mxu0 %v3054_v40 }
 0xada   : > { %4478 = vmatprep.subr.msk.bf16.mxu0 %vm596_vm2, %v6015_v51 }
 0xae1   : > { %4353 = vmatpush3.bf16.xpose.msra.mxu0 %v3051_v44 }
 0xae2   : > { %4479 = vmatprep.subr.msk.bf16.mxu0 %vm596_vm2, %v6023_v48 }
 0xae9   : > { %4355 = vmatpush3.bf16.xpose.msra.mxu0 %v3048_v21 }
 0xaf0   : > { %4357 = vmatmul.mubr.msk.bf16.vlgmr.msra.gmra.mxu0 %vm596_vm2, %v6034_v45 }
 0xaf1   : > { %4360 = vmatprep.mubr.msk.bf16.mxu0 %vm596_vm2, %v6040_v63 }
 0xaf8   : > { %4361 = vmatmul.mubr.msk.bf16.gmra.mxu0 %vm596_vm2, %v6044_v0 }
 0xaf9   : > { %4364 = vmatprep.mubr.msk.bf16.mxu0 %vm596_vm2, %v6052_v4 }
 0xb00   : > { %4365 = vmatmul.mubr.msk.bf16.gmra.mxu0 %vm596_vm2, %v6050_v35 }
 0xb01   : > { %4368 = vmatprep.mubr.msk.bf16.mxu0 %vm596_vm2, %v6056_v43 }
 0xb08   : > { %4369 = vmatmul.mubr.msk.bf16.gmra.mxu0 %vm596_vm2, %v6054_v12 }
 0xb30   : > { %v6172_v41 = vpop.f32.mrf.mxu0 }
 0xb32   : > { %v6174_v51 = vpop.f32.mrf.mxu0 }
 0xb34   : > { %v6176_v48 = vpop.f32.mrf.mxu0 }
 0xb36   : > { %v6178_v36 = vpop.f32.mrf.mxu0 }
 0xb70   : > { %v4274_v58 = vpop.f32.mrf.mxu0 }
 0xb71   : > { %2627 = vmax.xlane.f32.xlu0 %v4274_v58 }
 0xb72   : > { %v2560_v29 = vpop.f32.mrf.mxu0 }
 0xb73   : > { %2623 = vmax.xlane.f32.xlu1 %v2560_v29 }
 0xb74   : > { %v4275_v57 = vpop.f32.mrf.mxu0 }
 0xb75   : > { %2629 = vmax.xlane.f32.xlu0 %v4275_v57 }
 0xb76   : > { %v2563_v45 = vpop.f32.mrf.mxu0 }
 0xb78   : > { %v4278_v25 = vpop.f32.mrf.mxu0 }
 0xb79   : > { %2625 = vmax.xlane.f32.xlu0 %v2563_v45 }
 0xb7a   : > { %v2576_v61 = vpop.f32.mrf.mxu0 }
 0xb7c   : > { %v4279_v63 = vpop.f32.mrf.mxu0 }
 0xb7d   : > { %2635 = vmax.xlane.f32.xlu0 %v4278_v25 }
 0xb7e   : > { %v2579_v62 = vpop.f32.mrf.mxu0 }
 0xb80   : > { %v6180_v0 = vpop.f32.mrf.mxu0 }
 0xb81   : > { %2631 = vmax.xlane.f32.xlu0 %v2576_v61 }
 0xb82   : > { %v6182_v9 = vpop.f32.mrf.mxu0 }
 0xb84   : > { %v6184_v6 = vpop.f32.mrf.mxu0 }
 0xb85   : > { %2637 = vmax.xlane.f32.xlu0 %v4279_v63 }
 0xb86   : > { %v6186_v35 = vpop.f32.mrf.mxu0 }
 0xb87   : > { %2641 = vmax.xlane.f32.xlu1 %v6186_v35 }
 0xb88   : > { %v6189_v4 = vpop.f32.mrf.mxu0 }
 0xb89   : > { %2633 = vmax.xlane.f32.xlu0 %v2579_v62 }
 0xb8a   : > { %v6191_v12 = vpop.f32.mrf.mxu0 }
 0xb8b   : > { %2651 = vmax.xlane.f32.xlu1 %v6189_v4 }
 0xb8c   : > { %v6195_v43 = vpop.f32.mrf.mxu0 }
 0xb8d   : > { %2643 = vmax.xlane.f32.xlu0 %v6180_v0 }
 0xb8e   : > { %v6199_v56 = vpop.f32.mrf.mxu0 }
 0xb8f   : > { %2653 = vmax.xlane.f32.xlu1 %v6195_v43 }
 0xb91   : > { %2639 = vmax.xlane.f32.xlu0 %v6182_v9 }
 0xb93   : > { %2649 = vmax.xlane.f32.xlu1 %v6199_v56 }
 0xb95   : > { %2645 = vmax.xlane.f32.xlu0 %v6184_v6 }
 0xb99   : > { %2647 = vmax.xlane.f32.xlu0 %v6191_v12 }
 0xba4   : > { %2779 = vrot.lane.b32.xlu1 %v5526_v50, %s4870_s20 }
 0xbaf   : > { %2781 = vrot.lane.b32.xlu0 %v5521_v1, %s4870_s20 }
 0xbfa   : > { %v2628_v49 = vpop.xlane.xlu0 %2627 }
 0xbfb   : > { %v2657_v16 = vsub.f32 %v4274_v58, %v2628_v49 }
 0xbfc   : > { %v2624_v19 = vpop.xlane.xlu1 %2623 }
 0xbfd   : > { %v2675_v34 = vmul.f32 1.442695, %v2657_v16  ;;  %v2655_v7 = vsub.f32 %v2560_v29, %v2624_v19 }
 0xbfe   : > { %v2630_v47 = vpop.xlane.xlu0 %2629 }
 0xbff   : > { %4675 = vpow2.f32 %v2675_v34  ;;  %v2671_v30 = vmul.f32 1.442695, %v2655_v7  ;;  %v2658_v5 = vsub.f32 %v4275_v57, %v2630_v47 }
 0xc01   : > { %4677 = vpow2.f32 %v2671_v30  ;;  %v2677_v59 = vmul.f32 1.442695, %v2658_v5 }
 0xc02   : > { %v2626_v39 = vpop.xlane.xlu0 %2625 }
 0xc03   : > { %4679 = vpow2.f32 %v2677_v59  ;;  %v2656_v38 = vsub.f32 %v2563_v45, %v2626_v39 }
 0xc05   : > { %v2673_v33 = vmul.f32 1.442695, %v2656_v38  ;;  %v6256_v38 = vpop.f32.mrf.mxu0 }
 0xc06   : > { %v2636_v13 = vpop.xlane.xlu0 %2635 }
 0xc07   : > { %4681 = vpow2.f32 %v2673_v33  ;;  %v2661_v52 = vsub.f32 %v4278_v25, %v2636_v13  ;;  %v6258_v33 = vpop.f32.mrf.mxu0 }
 0xc09   : > { %v2683_v28 = vmul.f32 1.442695, %v2661_v52  ;;  %v6260_v13 = vpop.f32.mrf.mxu0 }
 0xc0a   : > { %v2632_v2 = vpop.xlane.xlu0 %2631 }
 0xc0b   : > { %4683 = vpow2.f32 %v2683_v28  ;;  %v2659_v10 = vsub.f32 %v2576_v61, %v2632_v2  ;;  %v6264_v52 = vpop.f32.mrf.mxu0 }
 0xc0c   : > { %v6208_v27 = vpop.eup %4675 }
 0xc0d   : > { %v2679_v14 = vmul.f32 1.442695, %v2659_v10  ;;  %2707 = vadd.xlane.f32.xlu0 %v6208_v27  ;;  %v6268_v28 = vpop.f32.mrf.mxu0 }
 0xc0e   : > { %v6211_v23 = vpop.eup %4677  ;;  %v2638_v31 = vpop.xlane.xlu0 %2637 }
 0xc0f   : > { %4685 = vpow2.f32 %v2679_v14  ;;  %v2662_v17 = vsub.f32 %v4279_v63, %v2638_v31  ;;  %2703 = vadd.xlane.f32.xlu1 %v6211_v23  ;;  %v6270_v2 = vpop.f32.mrf.mxu0 }
 0xc10   : > { %v6214_v26 = vpop.eup %4679  ;;  %v2642_v8 = vpop.xlane.xlu1 %2641 }
 0xc11   : > { %v2685_v60 = vmul.f32 1.442695, %v2662_v17  ;;  %2709 = vadd.xlane.f32.xlu0 %v6214_v26  ;;  %v2664_v25 = vsub.f32 %v6186_v35, %v2642_v8  ;;  %v6273_v14 = vpop.f32.mrf.mxu0 }
 0xc12   : > { %v2634_v15 = vpop.xlane.xlu0 %2633 }
 0xc13   : > { %4687 = vpow2.f32 %v2685_v60  ;;  %v2660_v20 = vsub.f32 %v2579_v62, %v2634_v15  ;;  %v2689_v49 = vmul.f32 1.442695, %v2664_v25  ;;  %v6276_v8 = vpop.f32.mrf.mxu0 }
 0xc14   : > { %v6217_v46 = vpop.eup %4681  ;;  %v2652_v37 = vpop.xlane.xlu1 %2651 }
 0xc15   : > { %v2681_v55 = vmul.f32 1.442695, %v2660_v20  ;;  %2705 = vadd.xlane.f32.xlu0 %v6217_v46  ;;  %v2669_v44 = vsub.f32 %v6189_v4, %v2652_v37  ;;  %v6278_v15 = vpop.f32.mrf.mxu0 }
 0xc16   : > { %v2644_v32 = vpop.xlane.xlu0 %2643 }
 0xc17   : > { %4689 = vpow2.f32 %v2681_v55  ;;  %v2665_v11 = vsub.f32 %v6180_v0, %v2644_v32  ;;  %v2699_v61 = vmul.f32 1.442695, %v2669_v44  ;;  %v6280_v20 = vpop.f32.mrf.mxu0 }
 0xc18   : > { %v6221_v42 = vpop.eup %4683  ;;  %v2654_v57 = vpop.xlane.xlu1 %2653 }
 0xc19   : > { %v2691_v40 = vmul.f32 1.442695, %v2665_v11  ;;  %2715 = vadd.xlane.f32.xlu1 %v6221_v42  ;;  %v2670_v31 = vsub.f32 %v6195_v43, %v2654_v57  ;;  %v6282_v55 = vpop.f32.mrf.mxu0  ;;  %v6303_v11 = vld [vmem:[%s6593_s11] sm:$0xff]  }
 0xc1a   : > { %v2640_v21 = vpop.xlane.xlu0 %2639 }
 0xc1b   : > { %4691 = vpow2.f32 %v2691_v40  ;;  %v2663_v58 = vsub.f32 %v6182_v9, %v2640_v21  ;;  %v2701_v60 = vmul.f32 1.442695, %v2670_v31  ;;  %v6286_v32 = vpop.f32.mrf.mxu0  ;;  %v6311_v40 = vld [vmem:[%s6593_s11 + $0x8] sm:$0xff]  }
 0xc1c   : > { %v6226_v29 = vpop.eup %4685  ;;  %v2650_v9 = vpop.xlane.xlu1 %2649 }
 0xc1d   : > { %v2687_v45 = vmul.f32 1.442695, %v2663_v58  ;;  %2711 = vadd.xlane.f32.xlu1 %v6226_v29  ;;  %v2668_v10 = vsub.f32 %v6199_v56, %v2650_v9  ;;  %v6292_v56 = vpop.f32.mrf.mxu0 }
 0xc1e   : > { %v2646_v63 = vpop.xlane.xlu0 %2645 }
 0xc1f   : > { %4693 = vpow2.f32 %v2687_v45  ;;  %v2666_v62 = vsub.f32 %v6184_v6, %v2646_v63  ;;  %v2697_v17 = vmul.f32 1.442695, %v2668_v10  ;;  %v6326_v21 = vpop.f32.mrf.mxu0 }
 0xc20   : > { %v6231_v0 = vpop.eup %4687  ;;  %4695 = vpow2.f32 %v2699_v61  ;;  %v2780_v47 = vpop.permute.xlu1 %2779 }
 0xc21   : > { %v2693_v4 = vmul.f32 1.442695, %v2666_v62  ;;  %2717 = vadd.xlane.f32.xlu0 %v6231_v0 }
 0xc22   : > { %v2648_v16 = vpop.xlane.xlu0 %2647 }
 0xc23   : > { %4697 = vpow2.f32 %v2693_v4  ;;  %v2667_v19 = vsub.f32 %v6191_v12, %v2648_v16 }
 0xc24   : > { %v6235_v34 = vpop.eup %4689  ;;  %4699 = vpow2.f32 %v2689_v49 }
 0xc25   : > { %v2695_v35 = vmul.f32 1.442695, %v2667_v19  ;;  %2713 = vadd.xlane.f32.xlu0 %v6235_v34 }
 0xc26   : > { %v2782_v7 = vpop.permute.xlu0 %2781 }
 0xc27   : > { %4701 = vpow2.f32 %v2695_v35  ;;  %4296 = vmatprep.subr.bf16.mxu1 %v2782_v7 }
 0xc28   : > { %v6238_v6 = vpop.eup %4691  ;;  %4297 = vmatpush3.bf16.msra.mxu1 %v2782_v7  ;;  %4703 = vpow2.f32 %v2697_v17 }
 0xc29   : > { %2723 = vadd.xlane.f32.xlu1 %v6238_v6  ;;  %4298 = vmatprep.subr.bf16.mxu1 %v2780_v47  ;;  %4705 = vpow2.f32 %v2701_v60 }
 0xc2c   : > { %v6241_v30 = vpop.eup %4693  ;;  %4299 = vmatpush3.bf16.msra.mxu1 %v2780_v47 }
 0xc2d   : > { %2719 = vadd.xlane.f32.xlu1 %v6241_v30  ;;  %v6244_v12 = vpop.eup %4695 }
 0xc30   : > { %v6246_v5 = vpop.eup %4697 }
 0xc31   : > { %2725 = vadd.xlane.f32.xlu0 %v6246_v5  ;;  %2731 = vadd.xlane.f32.xlu1 %v6244_v12  ;;  %v6250_v59 = vpop.eup %4699 }
 0xc34   : > { %v6252_v39 = vpop.eup %4701 }
 0xc35   : > { %2721 = vadd.xlane.f32.xlu0 %v6250_v59  ;;  %2727 = vadd.xlane.f32.xlu1 %v6252_v39  ;;  %v6284_v37 = vpop.eup %4703 }
 0xc36   : > { %v6290_v43 = vpop.eup %4705 }
 0xc46   : > { %2775 = vrot.lane.b32.xlu1 %v5541_v22, %s4870_s20 }
 0xc4b   : > { %2777 = vrot.lane.b32.xlu0 %v5535_v53, %s4870_s20 }
 0xc6a   : > { %3176 = vmax.xlane.f32.xlu1 %v6270_v2  ;;  %2729 = vadd.xlane.f32.xlu0 %v6284_v37 }
 0xc6e   : > { %3196 = vmax.xlane.f32.xlu1 %v6292_v56  ;;  %2733 = vadd.xlane.f32.xlu0 %v6290_v43 }
 0xc72   : > { %3168 = vmax.xlane.f32.xlu0 %v6258_v33 }
 0xc76   : > { %3170 = vmax.xlane.f32.xlu0 %v6264_v52 }
 0xc7a   : > { %3172 = vmax.xlane.f32.xlu0 %v6256_v38 }
 0xc7e   : > { %3174 = vmax.xlane.f32.xlu0 %v6260_v13 }
 0xc7f   : > { %2904 = vrot.lane.b32.xlu1 %v6303_v11, %s4870_s20 }
 0xc82   : > { %3178 = vmax.xlane.f32.xlu0 %v6276_v8 }
 0xc83   : > { %2906 = vrot.lane.b32.xlu1 %v6311_v40, %s4870_s20  ;;  %s6538_s20 = scalar_lea.hbm %s6595_s13, %s3765_s30 }
 0xc86   : > { %3180 = vmax.xlane.f32.xlu0 %v6268_v28 }
 0xc87   : > { %3330 = vrot.lane.b32.xlu1 %v5509_v24, %s4871_s22  ;;  %v6329_v24 = vpop.f32.mrf.mxu0 }
 0xc89   : > { %v6332_v45 = vpop.f32.mrf.mxu0 }
 0xc8a   : > { %3182 = vmax.xlane.f32.xlu0 %v6273_v14 }
 0xc8b   : > { %3326 = vrot.lane.b32.xlu1 %v5521_v1, %s4871_s22 }
 0xc8e   : > { %3184 = vmax.xlane.f32.xlu0 %v6280_v20 }
 0xc8f   : > { %3322 = vrot.lane.b32.xlu1 %v5535_v53, %s4871_s22 }
 0xc92   : > { %3186 = vmax.xlane.f32.xlu0 %v6286_v32 }
 0xc96   : > { %v2708_v44 = vpop.xlane.xlu0 %2707  ;;  %3188 = vmax.xlane.f32.xlu0 %v6278_v15 }
 0xc98   : > { %v2704_v58 = vpop.xlane.xlu1 %2703 }
 0xc99   : > { %4707 = vrcp.f32 %v2704_v58 }
 0xc9a   : > { %v2710_v57 = vpop.xlane.xlu0 %2709  ;;  %3190 = vmax.xlane.f32.xlu0 %v6282_v55 }
 0xc9e   : > { %v2706_v1 = vpop.xlane.xlu0 %2705  ;;  %3192 = vmax.xlane.f32.xlu0 %v6326_v21 }
 0xc9f   : > { %4709 = vrcp.f32 %v2706_v1 }
 0xca0   : > { %4711 = vrcp.f32 %v2710_v57 }
 0xca2   : > { %3194 = vmax.xlane.f32.xlu0 %v6332_v45  ;;  %v2716_v53 = vpop.xlane.xlu1 %2715 }
 0xca6   : > { %3198 = vmax.xlane.f32.xlu0 %v6329_v24  ;;  %v4708_v25 = vpop.eup %4707  ;;  %v2712_v49 = vpop.xlane.xlu1 %2711 }
 0xca7   : > { %v2751_v62 = vmul.f32 %v4708_v25, %v6211_v23 }
 0xcaa   : > { %v2718_v63 = vpop.xlane.xlu0 %2717 }
 0xcac   : > { %v4710_v61 = vpop.eup %4709 }
 0xcad   : > { %v2752_v4 = vmul.f32 %v4710_v61, %v6217_v46  ;;  %v4712_v46 = vpop.eup %4711 }
 0xcae   : > { %v2714_v19 = vpop.xlane.xlu0 %2713  ;;  %v2754_v58 = vmul.f32 %v4712_v46, %v6214_v26 }
 0xcaf   : > { %v2767_v9 = vpack.c.bf16 %v2752_v4, %v2751_v62  ;;  %4713 = vrcp.f32 %v2714_v19 }
 0xcb0   : > { %4715 = vrcp.f32 %v2708_v44 }
 0xcb1   : > { %4304 = vmatprep.mubr.bf16.mxu1 %v2767_v9  ;;  %4717 = vrcp.f32 %v2712_v49 }
 0xcb2   : > { %v2724_v16 = vpop.xlane.xlu1 %2723  ;;  %4719 = vrcp.f32 %v2718_v63 }
 0xcb3   : > { %4721 = vrcp.f32 %v2716_v53 }
 0xcb6   : > { %v2720_v35 = vpop.xlane.xlu1 %2719 }
 0xcba   : > { %v2726_v7 = vpop.xlane.xlu0 %2725  ;;  %v2732_v47 = vpop.xlane.xlu1 %2731 }
 0xcbc   : > { %3334 = vrot.lane.b32.xlu0 %v5496_v54, %s4871_s22  ;;  %v4714_v17 = vpop.eup %4713 }
 0xcbd   : > { %v4716_v60 = vpop.eup %4715  ;;  %v2756_v57 = vmul.f32 %v4714_v17, %v6235_v34 }
 0xcbe   : > { %v2722_v23 = vpop.xlane.xlu0 %2721  ;;  %v2728_v10 = vpop.xlane.xlu1 %2727 }
 0xcbf   : > { %4723 = vrcp.f32 %v2722_v23  ;;  %v4718_v54 = vpop.eup %4717 }
 0xcc0   : > { %4725 = vrcp.f32 %v2720_v35  ;;  %3332 = vrot.lane.b32.xlu0 %v5500_v18, %s4871_s22  ;;  %v2753_v18 = vmul.f32 %v4716_v60, %v6208_v27  ;;  %v2755_v1 = vmul.f32 %v4718_v54, %v6226_v29  ;;  %v4720_v25 = vpop.eup %4719 }
 0xcc1   : > { %4727 = vrcp.f32 %v2726_v7  ;;  %v4722_v61 = vpop.eup %4721  ;;  %v2758_v26 = vmul.f32 %v4720_v25, %v6231_v0 }
 0xcc2   : > { %v2778_v31 = vpop.permute.xlu0 %2777  ;;  %v2776_v44 = vpop.permute.xlu1 %2775  ;;  %4729 = vrcp.f32 %v2724_v16  ;;  %v2768_v53 = vpack.c.bf16 %v2754_v58, %v2753_v18  ;;  %v2757_v27 = vmul.f32 %v4722_v61, %v6221_v42 }
 0xcc3   : > { %4300 = vmatprep.subr.bf16.mxu1 %v2778_v31  ;;  %4731 = vrcp.f32 %v2728_v10 }
 0xcc4   : > { %3328 = vrot.lane.b32.xlu0 %v5513_v3, %s4871_s22  ;;  %4301 = vmatpush3.bf16.msra.mxu1 %v2778_v31  ;;  %v2769_v3 = vpack.c.bf16 %v2756_v57, %v2755_v1 }
 0xcc5   : > { %4302 = vmatprep.subr.bf16.mxu1 %v2776_v44 }
 0xcc8   : > { %3324 = vrot.lane.b32.xlu0 %v5526_v50, %s4871_s22  ;;  %4303 = vmatpush3.bf16.msra.mxu1 %v2776_v44  ;;  %v2770_v50 = vpack.c.bf16 %v2758_v26, %v2757_v27 }
 0xccb   : > { %4305 = vmatmul.mubr.bf16.vlgmr.msra.gmra.mxu1 %v2768_v53 }
 0xccc   : > { %v4724_v63 = vpop.eup %4723  ;;  %4308 = vmatprep.mubr.bf16.mxu1 %v2769_v3 }
 0xccd   : > { %v4726_v62 = vpop.eup %4725  ;;  %v2760_v34 = vmul.f32 %v4724_v63, %v6250_v59 }
 0xcce   : > { %v2759_v4 = vmul.f32 %v4726_v62, %v6241_v30  ;;  %v4728_v49 = vpop.eup %4727 }
 0xccf   : > { %v4730_v29 = vpop.eup %4729  ;;  %v2762_v16 = vmul.f32 %v4728_v49, %v6246_v5 }
 0xcd0   : > { %v2771_v9 = vpack.c.bf16 %v2760_v34, %v2759_v4  ;;  %v2761_v19 = vmul.f32 %v4730_v29, %v6238_v6  ;;  %v4732_v23 = vpop.eup %4731 }
 0xcd1   : > { %v2763_v5 = vmul.f32 %v4732_v23, %v6252_v39 }
 0xcd2   : > { %v2772_v35 = vpack.c.bf16 %v2762_v16, %v2761_v19 }
 0xcd3   : > { %4309 = vmatmul.mubr.bf16.gmra.mxu1 %v2770_v50 }
 0xcd4   : > { %4312 = vmatprep.mubr.bf16.mxu1 %v2771_v9 }
 0xcdb   : > { %4313 = vmatmul.mubr.bf16.gmra.mxu1 %v2772_v35 }
 0xcf3   : > { %v2730_v0 = vpop.xlane.xlu0 %2729  ;;  %v3177_v46 = vpop.xlane.xlu1 %3176 }
 0xcf4   : > { %4733 = vrcp.f32 %v2730_v0 }
 0xcf5   : > { %4735 = vrcp.f32 %v2732_v47 }
 0xcf7   : > { %v2734_v59 = vpop.xlane.xlu0 %2733  ;;  %v6361_v58 = vpop.xlane.xlu1 %3196 }
 0xcf8   : > { %4737 = vrcp.f32 %v2734_v59 }
 0xcfb   : > { %v3169_v42 = vpop.xlane.xlu0 %3168 }
 0xcfc   : > { %v3200_v30 = vsub.f32 %v6258_v33, %v3169_v42  ;;  %v3214_v42 = vsub.f32 %v6292_v56, %v6361_v58 }
 0xcfe   : > { %v3216_v7 = vmul.f32 1.442695, %v3200_v30 }
 0xcff   : > { %v3171_v31 = vpop.xlane.xlu0 %3170 }
 0xd00   : > { %4739 = vpow2.f32 %v3216_v7  ;;  %v3201_v10 = vsub.f32 %v6264_v52, %v3171_v31 }
 0xd01   : > { %v4734_v17 = vpop.eup %4733 }
 0xd02   : > { %v2764_v6 = vmul.f32 %v4734_v17, %v6284_v37  ;;  %v4736_v44 = vpop.eup %4735  ;;  %v3218_v18 = vmul.f32 1.442695, %v3201_v10  ;;  %v3204_v37 = vsub.f32 %v6270_v2, %v3177_v46 }
 0xd03   : > { %v3173_v60 = vpop.xlane.xlu0 %3172  ;;  %v2765_v53 = vmul.f32 %v4736_v44, %v6244_v12 }
 0xd04   : > { %v3202_v47 = vsub.f32 %v6256_v38, %v3173_v60  ;;  %v2773_v54 = vpack.c.bf16 %v2764_v6, %v2763_v5  ;;  %v2905_v38 = vpop.permute.xlu1 %2904  ;;  %v3224_v63 = vmul.f32 1.442695, %v3204_v37 }
 0xd05   : > { %v4738_v33 = vpop.eup %4737 }
 0xd06   : > { %v3220_v57 = vmul.f32 1.442695, %v3202_v47  ;;  %4316 = vmatprep.mubr.bf16.mxu1 %v2773_v54  ;;  %v2766_v39 = vmul.f32 %v4738_v33, %v6290_v43 }
 0xd07   : > { %v3175_v1 = vpop.xlane.xlu0 %3174 }
 0xd08   : > { %4741 = vpow2.f32 %v3220_v57  ;;  %v3203_v52 = vsub.f32 %v6260_v13, %v3175_v1  ;;  %v2774_v25 = vpack.c.bf16 %v2766_v39, %v2765_v53  ;;  %v6434_v1 = vpop.f32.mrf.mxu1 }
 0xd09   : > { %4743 = vpow2.f32 %v3218_v18 }
 0xd0a   : > { %v3222_v3 = vmul.f32 1.442695, %v3203_v52  ;;  %4317 = vmatmul.mubr.bf16.gmra.mxu1 %v2774_v25  ;;  %v6436_v53 = vpop.f32.mrf.mxu1 }
 0xd0b   : > { %v3179_v61 = vpop.xlane.xlu0 %3178  ;;  %4336 = vmatprep.mubr.msk.bf16.mxu1 %vm596_vm2, %v2905_v38 }
 0xd0c   : > { %4745 = vpow2.f32 %v3222_v3  ;;  %v3205_v12 = vsub.f32 %v6276_v8, %v3179_v61  ;;  %v6438_v39 = vpop.f32.mrf.mxu1 }
 0xd0d   : > { %v6368_v62 = vpop.eup %4739  ;;  %4747 = vpow2.f32 %v3224_v63 }
 0xd0e   : > { %3248 = vadd.xlane.f32.xlu1 %v6368_v62  ;;  %v3226_v26 = vmul.f32 1.442695, %v3205_v12  ;;  %v6440_v37 = vpop.f32.mrf.mxu1 }
 0xd0f   : > { %v3181_v2 = vpop.xlane.xlu0 %3180 }
 0xd10   : > { %v3206_v13 = vsub.f32 %v6268_v28, %v3181_v2 }
 0xd12   : > { %v3228_v43 = vmul.f32 1.442695, %v3206_v13 }
 0xd13   : > { %v3183_v34 = vpop.xlane.xlu0 %3182 }
 0xd14   : > { %4749 = vpow2.f32 %v3228_v43  ;;  %v3207_v27 = vsub.f32 %v6273_v14, %v3183_v34 }
 0xd15   : > { %v6374_v4 = vpop.eup %4741  ;;  %4751 = vpow2.f32 %v3226_v26 }
 0xd16   : > { %v3230_v50 = vmul.f32 1.442695, %v3207_v27  ;;  %3252 = vadd.xlane.f32.xlu0 %v6374_v4  ;;  %v6377_v9 = vpop.eup %4743 }
 0xd17   : > { %v3185_v49 = vpop.xlane.xlu0 %3184 }
 0xd18   : > { %4753 = vpow2.f32 %v3230_v50  ;;  %v3208_v8 = vsub.f32 %v6280_v20, %v3185_v49 }
 0xd19   : > { %v6380_v29 = vpop.eup %4745 }
 0xd1a   : > { %v3232_v28 = vmul.f32 1.442695, %v3208_v8  ;;  %3250 = vadd.xlane.f32.xlu0 %v6377_v9  ;;  %3254 = vadd.xlane.f32.xlu1 %v6380_v29  ;;  %v6384_v16 = vpop.eup %4747 }
 0xd1b   : > { %v3187_v14 = vpop.xlane.xlu0 %3186 }
 0xd1c   : > { %4755 = vpow2.f32 %v3232_v28  ;;  %v3209_v19 = vsub.f32 %v6286_v32, %v3187_v14 }
 0xd1e   : > { %3256 = vadd.xlane.f32.xlu1 %v6384_v16  ;;  %v3234_v30 = vmul.f32 1.442695, %v3209_v19 }
 0xd1f   : > { %v3189_v35 = vpop.xlane.xlu0 %3188 }
 0xd20   : > { %v3210_v0 = vsub.f32 %v6278_v15, %v3189_v35  ;;  %v3244_v15 = vmul.f32 1.442695, %v3214_v42 }
 0xd21   : > { %v6389_v59 = vpop.eup %4749 }
 0xd22   : > { %v3236_v20 = vmul.f32 1.442695, %v3210_v0  ;;  %3260 = vadd.xlane.f32.xlu0 %v6389_v59  ;;  %v6394_v23 = vpop.eup %4751 }
 0xd23   : > { %v3191_v7 = vpop.xlane.xlu0 %3190 }
 0xd24   : > { %4757 = vpow2.f32 %v3236_v20  ;;  %v3211_v46 = vsub.f32 %v6282_v55, %v3191_v7  ;;  %v2907_v7 = vpop.permute.xlu1 %2906 }
 0xd25   : > { %v6397_v31 = vpop.eup %4753  ;;  %4759 = vpow2.f32 %v3234_v30 }
 0xd26   : > { %v3238_v32 = vmul.f32 1.442695, %v3211_v46  ;;  %3258 = vadd.xlane.f32.xlu0 %v6394_v23  ;;  %3262 = vadd.xlane.f32.xlu1 %v6397_v31 }
 0xd27   : > { %v3193_v17 = vpop.xlane.xlu0 %3192 }
 0xd28   : > { %4761 = vpow2.f32 %v3238_v32  ;;  %v3212_v56 = vsub.f32 %v6326_v21, %v3193_v17  ;;  %v3331_v17 = vpop.permute.xlu1 %3330 }
 0xd29   : > { %v6402_v5 = vpop.eup %4755  ;;  %4763 = vpow2.f32 %v3244_v15 }
 0xd2a   : > { %v3240_v6 = vmul.f32 1.442695, %v3212_v56  ;;  %3264 = vadd.xlane.f32.xlu1 %v6402_v5 }
 0xd2b   : > { %v3195_v55 = vpop.xlane.xlu0 %3194 }
 0xd2c   : > { %4765 = vpow2.f32 %v3240_v6  ;;  %v3213_v10 = vsub.f32 %v6332_v45, %v3195_v55  ;;  %v3327_v6 = vpop.permute.xlu1 %3326 }
 0xd2e   : > { %v3242_v60 = vmul.f32 1.442695, %v3213_v10 }
 0xd2f   : > { %v3199_v44 = vpop.xlane.xlu0 %3198 }
 0xd30   : > { %4767 = vpow2.f32 %v3242_v60  ;;  %v3215_v47 = vsub.f32 %v6329_v24, %v3199_v44  ;;  %v3323_v44 = vpop.permute.xlu1 %3322 }
 0xd31   : > { %v6407_v54 = vpop.eup %4757 }
 0xd32   : > { %v3246_v58 = vmul.f32 1.442695, %v3215_v47  ;;  %3268 = vadd.xlane.f32.xlu0 %v6407_v54  ;;  %v6410_v21 = vpop.eup %4759 }
 0xd33   : > { %v3335_v0 = vpop.permute.xlu0 %3334 }
 0xd34   : > { %4769 = vpow2.f32 %v3246_v58 }
 0xd35   : > { %v6412_v33 = vpop.eup %4761 }
 0xd36   : > { %3266 = vadd.xlane.f32.xlu0 %v6410_v21  ;;  %3270 = vadd.xlane.f32.xlu1 %v6412_v33  ;;  %v6416_v45 = vpop.eup %4763 }
 0xd37   : > { %v3333_v30 = vpop.permute.xlu0 %3332 }
 0xd39   : > { %v6418_v57 = vpop.eup %4765 }
 0xd3a   : > { %3272 = vadd.xlane.f32.xlu1 %v6418_v57  ;;  %3276 = vadd.xlane.f32.xlu0 %v6416_v45 }
 0xd3b   : > { %v3329_v46 = vpop.permute.xlu0 %3328 }
 0xd3d   : > { %v6422_v24 = vpop.eup %4767 }
 0xd3e   : > { %3274 = vadd.xlane.f32.xlu0 %v6422_v24 }
 0xd3f   : > { %v3325_v56 = vpop.permute.xlu0 %3324 }
 0xd41   : > { %v6425_v18 = vpop.eup %4769 }
 0xd42   : > { %3278 = vadd.xlane.f32.xlu1 %v6425_v18 }
 0xd53   : > { %3449 = vrot.lane.b32.xlu1 %v6303_v11, %s4871_s22 }
 0xd54   : > { %3320 = vrot.lane.b32.xlu0 %v5541_v22, %s4871_s22 }
 0xd57   : > { %3451 = vrot.lane.b32.xlu1 %v6311_v40, %s4871_s22  ;;  %s453_s22 = scalar_lea.vmem %s6603_s0, %s3763_s16  ;;  %s4809_s0 = sshll.u32 %s4873_s23, 4  ;;  %s4810_s0 = int_to_ptr.vmem [resolvable:$false] %s4809_s0 }
 0xd58   : > { %s4811_s2 = scalar_lea.vmem %s4810_s0, 1024  ;;  %p4812_p0 = scmp.lt.s32.totalorder %s6533_s24, %s4810_s0 }
 0xd59   : > { %p4813_p1 = scmp.lt.s32.totalorder %s4811_s2, %s4805_s29 }
 0xd5b   : > { %p4814_p2 = por %p4813_p1, %p4812_p0 }
 0xd5d   : > { %p4815_p3 = pnand %p4814_p2, %p4808_p13 }
 0xd8b   : > { %v4306_v52 = vpop.f32.mrf.mxu1 }
 0xd8d   : > { %v2833_v25 = vpop.f32.mrf.mxu1 }
 0xd8f   : > { %v4307_v3 = vpop.f32.mrf.mxu1 }
 0xd90   : > { %v2897_v38 = vpack.c.bf16 %v4307_v3, %v4306_v52 }
 0xd91   : > { %v2836_v61 = vpop.f32.mrf.mxu1 }
 0xd92   : > { %v2896_v11 = vpack.c.bf16 %v2836_v61, %v2833_v25  ;;  %v2918_v25 = vsel %vm596_vm2, %v2897_v38, 0 }
 0xd93   : > { %v4310_v63 = vpop.f32.mrf.mxu1 }
 0xd95   : > { %v2849_v12 = vpop.f32.mrf.mxu1 }
 0xd97   : > { %v4311_v22 = vpop.f32.mrf.mxu1  ;;  %v3249_v52 = vpop.xlane.xlu1 %3248 }
 0xd98   : > { %v2899_v32 = vpack.c.bf16 %v4311_v22, %v4310_v63  ;;  %v2915_v63 = vsel %vm596_vm2, %v2896_v11, 0 }
 0xd99   : > { %v2852_v2 = vpop.f32.mrf.mxu1 }
 0xd9a   : > { %v2924_v55 = vsel %vm596_vm2, %v2899_v32, 0  ;;  %v2898_v10 = vpack.c.bf16 %v2852_v2, %v2849_v12 }
 0xd9b   : > { %v4314_v13 = vpop.f32.mrf.mxu1 }
 0xd9c   : > { %v2921_v47 = vsel %vm596_vm2, %v2898_v10, 0 }
 0xd9d   : > { %v2865_v40 = vpop.f32.mrf.mxu1 }
 0xd9f   : > { %v4315_v43 = vpop.f32.mrf.mxu1  ;;  %v3253_v60 = vpop.xlane.xlu0 %3252 }
 0xda0   : > { %v2901_v19 = vpack.c.bf16 %v4315_v43, %v4314_v13 }
 0xda1   : > { %v2868_v26 = vpop.f32.mrf.mxu1 }
 0xda2   : > { %v2930_v20 = vsel %vm596_vm2, %v2901_v19, 0  ;;  %v2900_v42 = vpack.c.bf16 %v2868_v26, %v2865_v40 }
 0xda3   : > { %v3251_v58 = vpop.xlane.xlu0 %3250  ;;  %v3255_v43 = vpop.xlane.xlu1 %3254 }
 0xda4   : > { %v2927_v15 = vsel %vm596_vm2, %v2900_v42, 0  ;;  %4771 = vrcp.f32 %v3251_v58 }
 0xda5   : > { %4773 = vrcp.f32 %v3249_v52 }
 0xda6   : > { %4775 = vrcp.f32 %v3255_v43  ;;  %v2443_v43 = vadd.f32 %v6438_v39, %v6176_v48 }
 0xda7   : > { %v3257_v26 = vpop.xlane.xlu1 %3256 }
 0xdab   : > { %v3261_v3 = vpop.xlane.xlu0 %3260 }
 0xdaf   : > { %v3259_v2 = vpop.xlane.xlu0 %3258 }
 0xdb0   : > { %4777 = vrcp.f32 %v3259_v2 }
 0xdb1   : > { %v4772_v61 = vpop.eup %4771  ;;  %4779 = vrcp.f32 %v3253_v60 }
 0xdb2   : > { %v4774_v12 = vpop.eup %4773  ;;  %v3297_v22 = vmul.f32 %v4772_v61, %v6377_v9  ;;  %4781 = vrcp.f32 %v3257_v26 }
 0xdb3   : > { %v3296_v13 = vmul.f32 %v4774_v12, %v6368_v62 }
 0xdb5   : > { %v3312_v40 = vpack.c.bf16 %v3297_v22, %v3296_v13 }
 0xdca   : > { %v4318_v34 = vpop.f32.mrf.mxu1 }
 0xdcc   : > { %v2881_v27 = vpop.f32.mrf.mxu1 }
 0xdce   : > { %v4319_v50 = vpop.f32.mrf.mxu1 }
 0xdcf   : > { %v2903_v49 = vpack.c.bf16 %v4319_v50, %v4318_v34  ;;  %v3263_v34 = vpop.xlane.xlu1 %3262 }
 0xdd0   : > { %v2884_v8 = vpop.f32.mrf.mxu1  ;;  %4783 = vrcp.f32 %v3263_v34 }
 0xdd1   : > { %v2936_v28 = vsel %vm596_vm2, %v2903_v49, 0  ;;  %v2902_v14 = vpack.c.bf16 %v2884_v8, %v2881_v27  ;;  %4464 = vmatprep.subr.msk.bf16.mxu1 %vm596_vm2, %v2903_v49  ;;  %v4776_v49 = vpop.eup %4775 }
 0xdd2   : > { %4321 = vmatpush3.bf16.xpose.msra.mxu1 %v2936_v28  ;;  %v4778_v8 = vpop.eup %4777 }
 0xdd3   : > { %4465 = vmatprep.subr.msk.bf16.mxu1 %vm596_vm2, %v2902_v14  ;;  %v2933_v35 = vsel %vm596_vm2, %v2902_v14, 0  ;;  %v3265_v9 = vpop.xlane.xlu1 %3264  ;;  %v4780_v28 = vpop.eup %4779 }
 0xdd7   : > { %v3271_v50 = vpop.xlane.xlu1 %3270 }
 0xdda   : > { %4323 = vmatpush3.bf16.xpose.msra.mxu1 %v2933_v35 }
 0xddb   : > { %4466 = vmatprep.subr.msk.bf16.mxu1 %vm596_vm2, %v2901_v19  ;;  %v4782_v19 = vpop.eup %4781  ;;  %v3273_v35 = vpop.xlane.xlu1 %3272 }
 0xde2   : > { %4325 = vmatpush3.bf16.xpose.msra.mxu1 %v2930_v20  ;;  %v3301_v20 = vmul.f32 %v4778_v8, %v6394_v23 }
 0xde3   : > { %4467 = vmatprep.subr.msk.bf16.mxu1 %vm596_vm2, %v2900_v42  ;;  %v3298_v42 = vmul.f32 %v4780_v28, %v6374_v4 }
 0xdea   : > { %4327 = vmatpush3.bf16.xpose.msra.mxu1 %v2927_v15 }
 0xdeb   : > { %4468 = vmatprep.subr.msk.bf16.mxu1 %vm596_vm2, %v2899_v32  ;;  %v3279_v32 = vpop.xlane.xlu1 %3278 }
 0xdef   : > { %v3450_v2 = vpop.permute.xlu1 %3449 }
 0xdf0   : > { %4420 = vmatprep.mubr.msk.bf16.mxu0 %vm596_vm2, %v3450_v2 }
 0xdf2   : > { %4329 = vmatpush3.bf16.xpose.msra.mxu1 %v2924_v55 }
 0xdf3   : > { %4469 = vmatprep.subr.msk.bf16.mxu1 %vm596_vm2, %v2898_v10 }
 0xdfa   : > { %4331 = vmatpush3.bf16.xpose.msra.mxu1 %v2921_v47 }
 0xdfb   : > { %4470 = vmatprep.subr.msk.bf16.mxu1 %vm596_vm2, %v2897_v38  ;;  %v3269_v38 = vpop.xlane.xlu0 %3268 }
 0xe02   : > { %4333 = vmatpush3.bf16.xpose.msra.mxu1 %v2918_v25 }
 0xe03   : > { %4471 = vmatprep.subr.msk.bf16.mxu1 %vm596_vm2, %v2896_v11  ;;  %v3267_v11 = vpop.xlane.xlu0 %3266 }
 0xe04   : > { %4785 = vrcp.f32 %v3267_v11 }
 0xe05   : > { %4787 = vrcp.f32 %v3261_v3 }
 0xe06   : > { %4789 = vrcp.f32 %v3265_v9 }
 0xe07   : > { %v3277_v62 = vpop.xlane.xlu0 %3276  ;;  %4791 = vrcp.f32 %v3271_v50 }
 0xe0a   : > { %4335 = vmatpush3.bf16.xpose.msra.mxu1 %v2915_v63 }
 0xe0b   : > { %4372 = vmatprep.subr.bf16.mxu1 %v3335_v0  ;;  %v3275_v27 = vpop.xlane.xlu0 %3274 }
 0xe0c   : > { %4793 = vrcp.f32 %v3275_v27 }
 0xe0d   : > { %4795 = vrcp.f32 %v3269_v38 }
 0xe0e   : > { %4797 = vrcp.f32 %v3273_v35 }
 0xe0f   : > { %v3321_v14 = vpop.permute.xlu0 %3320  ;;  %4799 = vrcp.f32 %v3279_v32 }
 0xe10   : > { %4801 = vrcp.f32 %v3277_v62 }
 0xe11   : > { %4337 = vmatmul.mubr.msk.bf16.vlgmr.msra.gmra.mxu1 %vm596_vm2, %v2907_v7 }
 0xe12   : > { %4373 = vmatpush3.bf16.msra.mxu1 %v3335_v0  ;;  %4388 = vmatprep.mubr.bf16.mxu1 %v3312_v40  ;;  %v3299_v0 = vmul.f32 %v4776_v49, %v6380_v29  ;;  %v3543_v40 = vld [vmem:[%s6594_s12 + $0x18] sm:$0xff] }
 0xe13   : > { %4374 = vmatprep.subr.bf16.mxu1 %v3333_v30 }
 0xe14   : > { %v3313_v7 = vpack.c.bf16 %v3299_v0, %v3298_v42 }
 0xe16   : > { %4375 = vmatpush3.bf16.msra.mxu1 %v3333_v30  ;;  %v3300_v30 = vmul.f32 %v4782_v19, %v6384_v16 }
 0xe17   : > { %4376 = vmatprep.subr.bf16.mxu1 %v3331_v17 }
 0xe18   : > { %v3314_v15 = vpack.c.bf16 %v3301_v20, %v3300_v30 }
 0xe1a   : > { %4377 = vmatpush3.bf16.msra.mxu1 %v3331_v17 }
 0xe1b   : > { %4378 = vmatprep.subr.bf16.mxu1 %v3329_v46 }
 0xe1e   : > { %4379 = vmatpush3.bf16.msra.mxu1 %v3329_v46  ;;  %v4784_v46 = vpop.eup %4783 }
 0xe1f   : > { %4380 = vmatprep.subr.bf16.mxu1 %v3327_v6  ;;  %v4786_v17 = vpop.eup %4785  ;;  %v3303_v29 = vmul.f32 %v4784_v46, %v6397_v31 }
 0xe20   : > { %v3305_v23 = vmul.f32 %v4786_v17, %v6410_v21 }
 0xe22   : > { %4381 = vmatpush3.bf16.msra.mxu1 %v3327_v6 }
 0xe23   : > { %4382 = vmatprep.subr.bf16.mxu1 %v3325_v56 }
 0xe26   : > { %4383 = vmatpush3.bf16.msra.mxu1 %v3325_v56  ;;  %v4788_v56 = vpop.eup %4787 }
 0xe27   : > { %4384 = vmatprep.subr.bf16.mxu1 %v3323_v44  ;;  %v4790_v6 = vpop.eup %4789  ;;  %v3302_v4 = vmul.f32 %v4788_v56, %v6389_v59 }
 0xe28   : > { %v3304_v55 = vmul.f32 %v4790_v6, %v6402_v5  ;;  %v4792_v10 = vpop.eup %4791 }
 0xe29   : > { %v3315_v16 = vpack.c.bf16 %v3303_v29, %v3302_v4  ;;  %v3307_v52 = vmul.f32 %v4792_v10, %v6412_v33  ;;  %v3541_v33 = vld [vmem:[%s6594_s12 + $0x8] sm:$0xff] }
 0xe2a   : > { %4385 = vmatpush3.bf16.msra.mxu1 %v3323_v44  ;;  %v3316_v60 = vpack.c.bf16 %v3305_v23, %v3304_v55  ;;  %v4794_v44 = vpop.eup %4793 }
 0xe2b   : > { %4386 = vmatprep.subr.bf16.mxu1 %v3321_v14  ;;  %v4796_v47 = vpop.eup %4795  ;;  %v3309_v25 = vmul.f32 %v4794_v44, %v6422_v24  ;;  %v3452_v44 = vpop.permute.xlu1 %3451 }
 0xe2c   : > { %v4798_v58 = vpop.eup %4797  ;;  %v3306_v31 = vmul.f32 %v4796_v47, %v6407_v54  ;;  %v2440_v54 = vadd.f32 %v6434_v1, %v6172_v41  ;;  %v3542_v1 = vld [vmem:[%s6594_s12 + $0x10] sm:$0xff] }
 0xe2d   : > { %v3308_v21 = vmul.f32 %v4798_v58, %v6418_v57  ;;  %v4800_v59 = vpop.eup %4799  ;;  %v3540_v57 = vld [vmem:[%s6594_s12] sm:$0xff] }
 0xe2e   : > { %4387 = vmatpush3.bf16.msra.mxu1 %v3321_v14  ;;  %v3317_v3 = vpack.c.bf16 %v3307_v52, %v3306_v31  ;;  %v4802_v5 = vpop.eup %4801  ;;  %v3311_v63 = vmul.f32 %v4800_v59, %v6425_v18  ;;  %v4872_v18 = vmov 0   ;;  %v462_v52 = vld [vmem:[%s453_s22 + $0x10] sm:$0xff] }
 0xe2f   : > { %v3318_v61 = vpack.c.bf16 %v3309_v25, %v3308_v21  ;;  %v3310_v12 = vmul.f32 %v4802_v5, %v6416_v45  ;;  %4536 = vset.pattern.permute.xlu1 %v4872_v18  ;;  %4535 = vset.pattern.permute.xlu0 %v4872_v18  ;;  %v2432_v45 = vadd.f32 %v6436_v53, %v6174_v51  ;;  %v460_v21 = vld [vmem:[%s453_s22] sm:$0xff] }
 0xe30   : > { %3551 = vperm.xlu1 %4536, %v3541_v33   ;;  %3546 = vperm.xlu0 %4535, %v3540_v57   ;;  %v2435_v51 = vadd.f32 %v6440_v37, %v6178_v36  ;;  %v461_v33 = vld [vmem:[%s453_s22 + $0x8] sm:$0xff] }
 0xe31   : > { %4389 = vmatmul.mubr.bf16.vlgmr.msra.gmra.mxu1 %v3313_v7  ;;  %v3319_v22 = vpack.c.bf16 %v3311_v63, %v3310_v12  ;;  %v463_v12 = vld [vmem:[%s453_s22 + $0x18] sm:$0xff]  ;;  %s6542_s22 = scalar_lea.sflag [#allocation3], %s446_s21 }
 0xe32   : > { %4392 = vmatprep.mubr.bf16.mxu1 %v3314_v15 }
 0xe34   : > { %3556 = vperm.xlu1 %4536, %v3542_v1   ;;  %3561 = vperm.xlu0 %4535, %v3543_v40  }
 0xe39   : > { %4393 = vmatmul.mubr.bf16.gmra.mxu1 %v3315_v16 }
 0xe3a   : > { %4396 = vmatprep.mubr.bf16.mxu1 %v3316_v60 }
 0xe41   : > { %4397 = vmatmul.mubr.bf16.gmra.mxu1 %v3317_v3 }
 0xe42   : > { %4400 = vmatprep.mubr.bf16.mxu1 %v3318_v61 }
 0xe49   : > { %4401 = vmatmul.mubr.bf16.gmra.mxu1 %v3319_v22 }
 0xeab   : > { %v3552_v47 = vpop.permute.xlu1 %3551  ;;  %v3547_v31 = vpop.permute.xlu0 %3546 }
 0xeaf   : > { %v3557_v59 = vpop.permute.xlu1 %3556 }
 0xed1   : > { %v4338_v24 = vpop.f32.mrf.mxu1 }
 0xed2   : > { %v6486_v13 = vadd.f32 %v4338_v24, %v2440_v54 }
 0xed3   : > { %v2972_v41 = vpop.f32.mrf.mxu1 }
 0xed4   : > { %v6496_v38 = vadd.f32 %v2972_v41, %v2432_v45 }
 0xed5   : > { %v4339_v26 = vpop.f32.mrf.mxu1 }
 0xed6   : > { %v6500_v53 = vadd.f32 %v4339_v26, %v2443_v43 }
 0xed7   : > { %v2975_v11 = vpop.f32.mrf.mxu1 }
 0xed8   : > { %v6502_v34 = vadd.f32 %v2975_v11, %v2435_v51 }
 0xef1   : > { %v4390_v62 = vpop.f32.mrf.mxu1 }
 0xef3   : > { %v3378_v9 = vpop.f32.mrf.mxu1 }
 0xef5   : > { %v4391_v27 = vpop.f32.mrf.mxu1 }
 0xef6   : > { %v3442_v50 = vpack.c.bf16 %v4391_v27, %v4390_v62 }
 0xef7   : > { %v3381_v49 = vpop.f32.mrf.mxu1 }
 0xef8   : > { %v3441_v8 = vpack.c.bf16 %v3381_v49, %v3378_v9  ;;  %v3463_v10 = vsel %vm596_vm2, %v3442_v50, 0 }
 0xef9   : > { %v4394_v48 = vpop.f32.mrf.mxu1 }
 0xefa   : > { %v3460_v60 = vsel %vm596_vm2, %v3441_v8, 0 }
 0xefb   : > { %v3394_v39 = vpop.f32.mrf.mxu1 }
 0xefd   : > { %v4395_v28 = vpop.f32.mrf.mxu1 }
 0xefe   : > { %v3444_v29 = vpack.c.bf16 %v4395_v28, %v4394_v48 }
 0xeff   : > { %v3397_v14 = vpop.f32.mrf.mxu1 }
 0xf00   : > { %v3469_v4 = vsel %vm596_vm2, %v3444_v29, 0  ;;  %v3443_v55 = vpack.c.bf16 %v3397_v14, %v3394_v39 }
 0xf01   : > { %v4398_v19 = vpop.f32.mrf.mxu1 }
 0xf02   : > { %v3466_v16 = vsel %vm596_vm2, %v3443_v55, 0 }
 0xf03   : > { %v3410_v35 = vpop.f32.mrf.mxu1 }
 0xf05   : > { %v4399_v36 = vpop.f32.mrf.mxu1 }
 0xf06   : > { %v3446_v15 = vpack.c.bf16 %v4399_v36, %v4398_v19 }
 0xf07   : > { %v3413_v37 = vpop.f32.mrf.mxu1 }
 0xf08   : > { %v3475_v56 = vsel %vm596_vm2, %v3446_v15, 0  ;;  %v3445_v6 = vpack.c.bf16 %v3413_v37, %v3410_v35 }
 0xf09   : > { %v4402_v0 = vpop.f32.mrf.mxu1 }
 0xf0a   : > { %v3472_v23 = vsel %vm596_vm2, %v3445_v6, 0 }
 0xf0b   : > { %v3426_v20 = vpop.f32.mrf.mxu1 }
 0xf0d   : > { %v4403_v42 = vpop.f32.mrf.mxu1 }
 0xf0e   : > { %v3448_v30 = vpack.c.bf16 %v4403_v42, %v4402_v0 }
 0xf0f   : > { %v3429_v7 = vpop.f32.mrf.mxu1 }
 0xf10   : > { %v3481_v46 = vsel %vm596_vm2, %v3448_v30, 0  ;;  %v3447_v32 = vpack.c.bf16 %v3429_v7, %v3426_v20  ;;  %4480 = vmatprep.subr.msk.bf16.mxu0 %vm596_vm2, %v3448_v30 }
 0xf11   : > { %4405 = vmatpush3.bf16.xpose.msra.mxu0 %v3481_v46 }
 0xf12   : > { %4481 = vmatprep.subr.msk.bf16.mxu0 %vm596_vm2, %v3447_v32  ;;  %v3478_v17 = vsel %vm596_vm2, %v3447_v32, 0 }
 0xf19   : > { %4407 = vmatpush3.bf16.xpose.msra.mxu0 %v3478_v17 }
 0xf1a   : > { %4482 = vmatprep.subr.msk.bf16.mxu0 %vm596_vm2, %v3446_v15 }
 0xf21   : > { %4409 = vmatpush3.bf16.xpose.msra.mxu0 %v3475_v56 }
 0xf22   : > { %4483 = vmatprep.subr.msk.bf16.mxu0 %vm596_vm2, %v3445_v6 }
 0xf29   : > { %4411 = vmatpush3.bf16.xpose.msra.mxu0 %v3472_v23 }
 0xf2a   : > { %4484 = vmatprep.subr.msk.bf16.mxu0 %vm596_vm2, %v3444_v29 }
 0xf31   : > { %4413 = vmatpush3.bf16.xpose.msra.mxu0 %v3469_v4 }
 0xf32   : > { %4485 = vmatprep.subr.msk.bf16.mxu0 %vm596_vm2, %v3443_v55 }
 0xf39   : > { %4415 = vmatpush3.bf16.xpose.msra.mxu0 %v3466_v16 }
 0xf3a   : > { %4486 = vmatprep.subr.msk.bf16.mxu0 %vm596_vm2, %v3442_v50 }
 0xf41   : > { %4417 = vmatpush3.bf16.xpose.msra.mxu0 %v3463_v10 }
 0xf42   : > { %4487 = vmatprep.subr.msk.bf16.mxu0 %vm596_vm2, %v3441_v8 }
 0xf49   : > { %4419 = vmatpush3.bf16.xpose.msra.mxu0 %v3460_v60 }
 0xf50   : > { %4421 = vmatmul.mubr.msk.bf16.vlgmr.msra.gmra.mxu0 %vm596_vm2, %v3452_v44 }
0x1010   : > { %v4422_v58 = vpop.f32.mrf.mxu0 }
0x1011   : > { %v3534_v25 = vadd.f32 %v4422_v58, %v6486_v13  ;;  %v3562_v13 = vpop.permute.xlu0 %3561 }
0x1012   : > { %v3517_v3 = vpop.f32.mrf.mxu0 }
0x1013   : > { %v3532_v61 = vadd.f32 %v3517_v3, %v6496_v38  ;;  %v3538_v5 = vadd.f32 %v3534_v25, %v462_v52 }
0x1014   : > { %v4423_v63 = vpop.f32.mrf.mxu0 }
0x1015   : > { %v3536_v22 = vadd.f32 %v3532_v61, %v460_v21  ;;  %v3535_v2 = vadd.f32 %v4423_v63, %v6500_v53  ;;  %v3566_v54 = vadd.f32 %v3557_v59, %v3538_v5 }
0x1016   : > { %v3520_v57 = vpop.f32.mrf.mxu0 }
0x1017   : > { %v3564_v24 = vadd.f32 %v3547_v31, %v3536_v22  ;;  %3570 = vst [vmem:[%s448_s15 + $0x10] sm:$0xff] %v3566_v54  ;;  %v3539_v18 = vadd.f32 %v3535_v2, %v463_v12  ;;  %v3533_v45 = vadd.f32 %v3520_v57, %v6502_v34 }
0x1019   : > { %3568 = vst [vmem:[%s448_s15] sm:$0xff] %v3564_v24  ;;  %v3567_v41 = vadd.f32 %v3562_v13, %v3539_v18  ;;  %v3537_v1 = vadd.f32 %v3533_v45, %v461_v33 }
0x101b   : > { %3571 = vst [vmem:[%s448_s15 + $0x18] sm:$0xff] %v3567_v41  ;;  %v3565_v40 = vadd.f32 %v3552_v47, %v3537_v1 }
0x101d   : > { %3569 = vst [vmem:[%s448_s15 + $0x8] sm:$0xff] %v3565_v40 }
0x101e   : > { %4818 = shalt.err (!%p4815_p3)
}
0x101f   : > { %s4819_s21 = scalar_lea.hbm %s6538_s20, 512  ;;  %s4823_s16 = scalar_lea.hbm %s6595_s13, 1024 }
0x1020   : > { %p4820_p4 = scmp.ne.s32.totalorder %s6538_s20, %s4819_s21  ;;  %p4824_p9 = scmp.lt.s32.totalorder %s6538_s20, %s6595_s13 }
0x1021   : > { %p4825_p10 = scmp.lt.s32.totalorder %s4823_s16, %s4819_s21 }
0x1022   : > { %p4821_p7 = pnand %p4820_p4, %p4984_p5 }
0x1023   : > { %p4826_p11 = por %p4825_p10, %p4824_p9 }
0x1024   : > { %p4822_p8 = pneg %p4821_p7 }
0x1026   : > { %p4827_p12 = pnand %p4826_p11, %p4822_p8 }
0x1028   : > { %4830 = shalt.err (!%p4827_p12)
}
0x1029   : > { %s4874_s0 = smov 128   ;;  %s4875_s2 = smov 8  }
0x102a   : > { %4488 = dma.vmem_to_hbm [thread:$0]  (%p4984_p5), %s6533_s24, 512, %s6538_s20, %s6542_s22, %s4874_s0, %s4874_s0, %s4875_s2  }
0x102b PF: > { %p4494_p13 = scmp.ge.s32.totalorder %s4865_s28, 2  ;;  %s3601_s29 = sand.u32 1, %s4853_s25  }
0x102c   : > { %s3602_s21 = scalar_lea.sflag [#allocation3], %s3601_s29 }
0x102d   : > { %p4491_p0 = pnand %p4494_p13, %p4988_p6 }
0x102f   : > { %p4492_p1 = pneg %p4491_p0 }
0x1031   : > { %4848 = dma.done.wait (%p4492_p1), %s3602_s21, 512  }
0x1032   : > { %4850 = vsyncadd (%p4492_p1), %s3602_s21, 4294966784  ;;  %p23_p2 = scmp.ge.s32.totalorder %s4971_s14, 4   ;;  %s6604_s25 = smov %s4857_s26 }
0x1033   : > { %s6605_s26 = smov %s4861_s27  ;;  %s6606_s27 = smov %s4982_s17 }
0x1034   : > { %s6607_s28 = smov %s4971_s14  ;;  %25 = sbr.rel (!%p23_p2) target bundleno = 7 (0x7), region = 110 }
0x1039   :  { %3607 = vsyncpa [#allocation3], 1 }
0x103a   :  { %3609 = vsyncpa [#allocation3 + $0x1], 1 }

</bundles_post_ra>
